<compile_context>
chip_gen: v5e
topology: v5e:2x2
jax: 0.10.0
libtpu: 0.0.40
codegen_flags: <defaults>
</compile_context>

<pallas_src>
import functools

import numpy as np
import jax
import jax.numpy as jnp
from jax.experimental import pallas as pl
from jax.experimental.pallas import tpu as pltpu


# ---------------------------------------------------------------------------
# Small static helpers (run once, outside jit)
# ---------------------------------------------------------------------------

def _conv_out(n, k, stride, pad):
    return (n + 2 * pad - k) // stride + 1


def _conv_selection(n, hin, win, hout, wout, stride, pad, k=3, di=0, dj=0):
    """Per-tap 0/1 selection matrices S[t] (n*hout*wout, n*hin*win), t = ki*k + kj.

    Output row (b, oh, ow) of tap (ki, kj) selects input row
    (b, stride*oh + di - pad + ki, stride*ow + dj - pad + kj); zero row if out of bounds
    (i.e. zero padding).  Data independent -> built once as constants.
    """
    s = np.zeros((k * k, n * hout * wout, n * hin * win), np.float32)
    for ki in range(k):
        for kj in range(k):
            t = ki * k + kj
            for b in range(n):
                for oh in range(hout):
                    for ow in range(wout):
                        h = stride * oh + di - pad + ki
                        w = stride * ow + dj - pad + kj
                        if 0 <= h < hin and 0 <= w < win:
                            s[t, (b * hout + oh) * wout + ow,
                              (b * hin + h) * win + w] = 1.0
    return s


def im2col(x_nhwc, k, stride, pad):
    """Patch matrix (N*OH*OW, Cin*k*k), feature order (Cin, KH, KW) to match PyTorch weights.
    Used only for conv1 (raw-input patches) before the single fused kernel."""
    n, h, w, c = x_nhwc.shape
    xp = jnp.pad(x_nhwc, ((0, 0), (pad, pad), (pad, pad), (0, 0)))
    oh = _conv_out(h, k, stride, pad)
    ow = _conv_out(w, k, stride, pad)
    taps = []
    for i in range(k):
        for j in range(k):
            taps.append(xp[:, i:i + stride * oh:stride, j:j + stride * ow:stride, :])
    pm = jnp.stack(taps, axis=0).reshape(k, k, n, oh, ow, c)
    pm = pm.transpose(2, 3, 4, 5, 0, 1).reshape(n * oh * ow, c * k * k)
    return pm, oh, ow


# ---------------------------------------------------------------------------
# The single fused Pallas kernel
# ---------------------------------------------------------------------------

def _fused_forward_kernel(p1_ref, w1_ref, b1_ref,
                          s2_ref, w2_ref, b2_ref,
                          s3_ref, w3c_ref, b3c_ref,
                          wl_ref, bl_ref, wo_ref, bo_ref,
                          o_ref, *, n_batch, n_spatial3):
    bf16 = jnp.bfloat16

    # ---- tanh1: 7x7 stride-2 conv as one GEMM over precomputed patches, bias + ReLU fused.
    y1 = jnp.dot(p1_ref[...], w1_ref[...], preferred_element_type=jnp.float32)
    y1 = jnp.maximum(y1 + b1_ref[...], 0.0).astype(bf16)            # (N*H1*W1, 32)

    # ---- tanh2: 3x3 stride-2 conv via 9 static taps: (selection @ y1) @ W2[tap], summed.
    def tap2(t):
        p = jnp.dot(s2_ref[t], y1, preferred_element_type=jnp.float32).astype(bf16)
        return jnp.dot(p, w2_ref[t], preferred_element_type=jnp.float32)

    acc2 = tap2(0)
    for t in range(1, s2_ref.shape[0]):
        acc2 = acc2 + tap2(t)
    y2 = jnp.maximum(acc2 + b2_ref[...], 0.0).astype(bf16)          # (N*H2*W2, 96)

    # ---- tanh3 + attention conv in the SAME tap loop.
    #      w3c = [w3 | wa]: column `c_att` is the attention score.  Selection rows are 4 slab
    #      blocks (the four positions of each 2x2 pooling window); block 0 doubles as the
    #      conv3 stride-2 grid (identical patches).
    def tap3(t):
        p = jnp.dot(s3_ref[t], y2, preferred_element_type=jnp.float32).astype(bf16)
        return jnp.dot(p, w3c_ref[t], preferred_element_type=jnp.float32)

    acc3 = tap3(0)
    for t in range(1, s3_ref.shape[0]):
        acc3 = acc3 + tap3(t)
    z = acc3 + b3c_ref[...]                                         # (4*M3, 257)

    m3 = n_batch * n_spatial3
    c_att = w3c_ref.shape[2] - 1
    y3 = jnp.maximum(z[0:m3, 0:c_att], 0.0)                         # conv3 + ReLU, (M3, 256)

    # MaxPool2d(2,2) over the attention map == elementwise max over the 4 slab blocks
    # (the attention bias is position-invariant, so adding it before the max is exact).
    a = jnp.maximum(jnp.maximum(z[0:m3, c_att:], z[m3:2 * m3, c_att:]),
                    jnp.maximum(z[2 * m3:3 * m3, c_att:], z[3 * m3:4 * m3, c_att:]))
    gate = 1.0 / (1.0 + jnp.exp(-a))                                # sigmoid, (M3, 1)
    gated = (y3 * gate).astype(bf16)                                # (M3, 256)

    # ---- AdaptiveAvgPool2d((1,1)): per-sample mean over the n_spatial3 rows, as a tiny
    #      iota-built averaging matmul (no HBM input, no XLA glue).
    rows = jax.lax.broadcasted_iota(jnp.int32, (n_batch, m3), 0)
    cols = jax.lax.broadcasted_iota(jnp.int32, (n_batch, m3), 1)
    seg = (cols >= rows * n_spatial3) & (cols < (rows + 1) * n_spatial3)
    pool_m = jnp.where(seg, 1.0 / n_spatial3, 0.0).astype(bf16)
    pooled = jnp.dot(pool_m, gated, preferred_element_type=jnp.float32)   # (N, 256)

    # ---- Linear(256, 64) + ReLU   (Dropout == identity in eval mode).
    h = jnp.dot(pooled.astype(bf16), wl_ref[...], preferred_element_type=jnp.float32)
    h = jnp.maximum(h + bl_ref[...], 0.0)

    # ---- OutBlock: Linear(64, num_classes) + log_softmax.
    logits = jnp.dot(h.astype(bf16), wo_ref[...], preferred_element_type=jnp.float32)
    logits = logits + bo_ref[...]
    mx = jnp.max(logits, axis=-1, keepdims=True)
    s = logits - mx
    o_ref[...] = (s - jnp.log(jnp.sum(jnp.exp(s), axis=-1, keepdims=True))
                  ).astype(o_ref.dtype)


def fused_forward(p1, pp, *, n_batch, n_spatial3):
    """Entire network forward as a single pallas_call (everything VMEM resident)."""
    num_classes = pp["wo"].shape[1]
    args = (p1, pp["w1"], pp["b1"], pp["s2"], pp["w2"], pp["b2"],
            pp["s3"], pp["w3c"], pp["b3c"], pp["wl"], pp["bl"], pp["wo"], pp["bo"])

    def spec(a):
        nd = a.ndim
        return pl.BlockSpec(a.shape, lambda i, _nd=nd: (0,) * _nd)

    kernel = functools.partial(_fused_forward_kernel,
                               n_batch=n_batch, n_spatial3=n_spatial3)
    return pl.pallas_call(
        kernel,
        out_shape=jax.ShapeDtypeStruct((n_batch, num_classes), jnp.float32),
        grid=(1,),
        in_specs=[spec(a) for a in args],
        out_specs=pl.BlockSpec((n_batch, num_classes), lambda i: (0, 0)),
        compiler_params=pltpu.CompilerParams(dimension_semantics=("arbitrary",)),
    )(*args)


# ---------------------------------------------------------------------------
# Parameter preparation (runs once, outside jit)
# ---------------------------------------------------------------------------

def init_torch_params(key, num_classes=4, in_channels=1):
    """Random parameters in native PyTorch layouts."""
    ks = jax.random.split(key, 12)

    def nrm(k, shape, scale):
        return jax.random.normal(k, shape, jnp.float32) * scale

    return {
        # Conv2d weight layout: (Cout, Cin, KH, KW)
        "w1": nrm(ks[0], (32, in_channels, 7, 7), 0.08), "b1": nrm(ks[1], (32,), 0.05),
        "w2": nrm(ks[2], (96, 32, 3, 3), 0.05),          "b2": nrm(ks[3], (96,), 0.05),
        "w3": nrm(ks[4], (256, 96, 3, 3), 0.03),         "b3": nrm(ks[5], (256,), 0.03),
        "wa": nrm(ks[6], (1, 96, 3, 3), 0.03),           "ba": nrm(ks[7], (1,), 0.03),
        # Linear weight layout: (out_features, in_features)
        "wl": nrm(ks[8], (64, 256), 0.05),               "bl": nrm(ks[9], (64,), 0.05),
        "wo": nrm(ks[10], (num_classes, 64), 0.1),       "bo": nrm(ks[11], (num_classes,), 0.1),
    }


def prepare_params(p, n_batch, image_hw=(16, 16)):
    """One-time relayout: bf16 GEMM weights, per-tap conv weights, fused conv3+attention weight,
    and constant 0/1 selection matrices for in-kernel patch extraction."""
    h0, w0 = image_hw
    h1, w1 = _conv_out(h0, 7, 2, 3), _conv_out(w0, 7, 2, 3)
    h2, w2 = _conv_out(h1, 3, 2, 1), _conv_out(w1, 3, 2, 1)
    h3, w3 = _conv_out(h2, 3, 2, 1), _conv_out(w2, 3, 2, 1)
    assert h2 % 2 == 0 and w2 % 2 == 0, "MaxPool2d(2,2) grid must tile the attention map"

    bf = lambda a: jnp.asarray(a, jnp.bfloat16)
    f32 = lambda a: jnp.asarray(a, jnp.float32)

    cout1 = p["w1"].shape[0]
    w1g = p["w1"].reshape(cout1, -1).T                    # (Cin*49, 32), order (ci, ki, kj)

    def per_tap(w):                                       # (Cout,Cin,k,k) -> (k*k, Cin, Cout)
        k = w.shape[2]
        return jnp.transpose(w, (2, 3, 1, 0)).reshape(k * k, w.shape[1], w.shape[0])

    w2t = per_tap(p["w2"])                                # (9, 32, 96)
    w3t = per_tap(p["w3"])                                # (9, 96, 256)
    wat = per_tap(p["wa"])                                # (9, 96, 1)
    w3c = jnp.concatenate([w3t, wat], axis=2)             # (9, 96, 257)  [conv3 | attention]
    b3c = jnp.concatenate([p["b3"], p["ba"]]).reshape(1, -1)

    s2 = _conv_selection(n_batch, h1, w1, h2, w2, stride=2, pad=1, k=3)
    # Slab (0,0) == conv3 stride-2 grid; slabs (0,1)/(1,0)/(1,1) are the other 2x2-pool positions.
    s3 = np.concatenate(
        [_conv_selection(n_batch, h2, w2, h3, w3, stride=2, pad=1, k=3, di=di, dj=dj)
         for (di, dj) in ((0, 0), (0, 1), (1, 0), (1, 1))], axis=1)

    return {
        "w1": bf(w1g),       "b1": f32(p["b1"].reshape(1, -1)),
        "s2": bf(s2),        "w2": bf(w2t), "b2": f32(p["b2"].reshape(1, -1)),
        "s3": bf(s3),        "w3c": bf(w3c), "b3c": f32(b3c),
        "wl": bf(p["wl"].T), "bl": f32(p["bl"].reshape(1, -1)),
        "wo": bf(p["wo"].T), "bo": f32(p["bo"].reshape(1, -1)),
    }


# ---------------------------------------------------------------------------
# Forward (one XLA im2col of the raw input, then the single fused kernel)
# ---------------------------------------------------------------------------

def forward(x_nchw, pp):
    n, _, h0, w0 = x_nchw.shape
    h1, w1 = _conv_out(h0, 7, 2, 3), _conv_out(w0, 7, 2, 3)
    h2, w2 = _conv_out(h1, 3, 2, 1), _conv_out(w1, 3, 2, 1)
    h3, w3 = _conv_out(h2, 3, 2, 1), _conv_out(w2, 3, 2, 1)

    x = jnp.transpose(x_nchw, (0, 2, 3, 1)).astype(jnp.float32)    # NCHW -> NHWC
    p1, _, _ = im2col(x, 7, stride=2, pad=3)                       # (N*H1*W1, Cin*49)
    p1 = p1.astype(jnp.bfloat16)
    return fused_forward(p1, pp, n_batch=n, n_spatial3=h3 * w3)


forward_jit = jax.jit(forward)


# ---------------------------------------------------------------------------
# Pure-XLA f32 reference (same module assumptions) for a correctness check
# ---------------------------------------------------------------------------

def reference_forward(x_nchw, p):
    def conv(x, w, b, stride, pad):
        y = jax.lax.conv_general_dilated(
            x, w, window_strides=(stride, stride),
            padding=((pad, pad), (pad, pad)),
            dimension_numbers=("NCHW", "OIHW", "NCHW"))
        return y + b.reshape(1, -1, 1, 1)

    x = x_nchw.astype(jnp.float32)
    y1 = jnp.maximum(conv(x, p["w1"], p["b1"], 2, 3), 0.0)
    y2 = jnp.maximum(conv(y1, p["w2"], p["b2"], 2, 1), 0.0)
    a = conv(y2, p["wa"], p["ba"], 1, 1)
    y3 = jnp.maximum(conv(y2, p["w3"], p["b3"], 2, 1), 0.0)
    n, _, ha, wa = a.shape
    am = a.reshape(n, 1, ha // 2, 2, wa // 2, 2).max(axis=(3, 5))
    g = y3 * jax.nn.sigmoid(am)
    pooled = g.mean(axis=(2, 3))
    h = jnp.maximum(pooled @ p["wl"].T + p["bl"], 0.0)
    logits = h @ p["wo"].T + p["bo"]
    return jax.nn.log_softmax(logits, axis=-1)


reference_jit = jax.jit(reference_forward)


if __name__ == "__main__":
    key = jax.random.PRNGKey(0)
    kx, kp = jax.random.split(key)

    # "Small images": (batch=2, in_channels=1, 16x16).  Spatial trace:
    # 16 -(tanh1)-> 8 -(tanh2)-> 4 -(tanh3 / maxpool(attention))-> 2 -(avgpool)-> 1.
    batch, in_channels, hw, num_classes = 2, 1, 16, 4
    x = jax.random.normal(kx, (batch, in_channels, hw, hw), jnp.float32)

    torch_params = init_torch_params(kp, num_classes=num_classes, in_channels=in_channels)
    pp = prepare_params(torch_params, n_batch=batch, image_hw=(hw, hw))

    out = jax.block_until_ready(forward_jit(x, pp))
    ref = jax.block_until_ready(reference_jit(x, torch_params))

    assert out.shape == (batch, num_classes)
    assert bool(jnp.all(jnp.isfinite(out)))
    # log_softmax rows should (numerically) exponentiate-sum to 1.
    assert jnp.allclose(jnp.exp(out).sum(axis=1), 1.0, atol=1e-4)
    # bf16-weight kernel vs f32 XLA reference (loose tolerance for the bf16 path).
    max_diff = float(jnp.max(jnp.abs(out - ref)))
    assert max_diff < 0.1, f"mismatch vs XLA reference: max|diff|={max_diff}"
    print("KERNEL_OK")
</pallas_src>

<mosaic_0001>
module attributes {stable_mosaic.version = 11 : i64} {
  func.func @_fused_forward_kernel(%arg0: i32, %arg1: memref<128x49xbf16, #tpu.memory_space<vmem>>, %arg2: memref<49x32xbf16, #tpu.memory_space<vmem>>, %arg3: memref<1x32xf32, #tpu.memory_space<vmem>>, %arg4: memref<9x32x128xbf16, #tpu.memory_space<vmem>>, %arg5: memref<9x32x96xbf16, #tpu.memory_space<vmem>>, %arg6: memref<1x96xf32, #tpu.memory_space<vmem>>, %arg7: memref<9x32x32xbf16, #tpu.memory_space<vmem>>, %arg8: memref<9x96x257xbf16, #tpu.memory_space<vmem>>, %arg9: memref<1x257xf32, #tpu.memory_space<vmem>>, %arg10: memref<256x64xbf16, #tpu.memory_space<vmem>>, %arg11: memref<1x64xf32, #tpu.memory_space<vmem>>, %arg12: memref<64x4xbf16, #tpu.memory_space<vmem>>, %arg13: memref<1x4xf32, #tpu.memory_space<vmem>>, %arg14: memref<2x4xf32, #tpu.memory_space<vmem>>) attributes {dimension_semantics = [#tpu.dimension_semantics<arbitrary>], iteration_bounds = array<i64: 1>, scalar_prefetch = 0 : i64, scratch_operands = 0 : i64, tpu.core_type = #tpu.core_type<tc>, window_params = [{pipeline_mode = #tpu.pipeline_mode<synchronous>, transform_indices = @transform_0, window_bounds = array<i64: 128, 49>}, {pipeline_mode = #tpu.pipeline_mode<synchronous>, transform_indices = @transform_1, window_bounds = array<i64: 49, 32>}, {pipeline_mode = #tpu.pipeline_mode<synchronous>, transform_indices = @transform_2, window_bounds = array<i64: 1, 32>}, {pipeline_mode = #tpu.pipeline_mode<synchronous>, transform_indices = @transform_3, window_bounds = array<i64: 9, 32, 128>}, {pipeline_mode = #tpu.pipeline_mode<synchronous>, transform_indices = @transform_4, window_bounds = array<i64: 9, 32, 96>}, {pipeline_mode = #tpu.pipeline_mode<synchronous>, transform_indices = @transform_5, window_bounds = array<i64: 1, 96>}, {pipeline_mode = #tpu.pipeline_mode<synchronous>, transform_indices = @transform_6, window_bounds = array<i64: 9, 32, 32>}, {pipeline_mode = #tpu.pipeline_mode<synchronous>, transform_indices = @transform_7, window_bounds = array<i64: 9, 96, 257>}, {pipeline_mode = #tpu.pipeline_mode<synchronous>, transform_indices = @transform_8, window_bounds = array<i64: 1, 257>}, {pipeline_mode = #tpu.pipeline_mode<synchronous>, transform_indices = @transform_9, window_bounds = array<i64: 256, 64>}, {pipeline_mode = #tpu.pipeline_mode<synchronous>, transform_indices = @transform_10, window_bounds = array<i64: 1, 64>}, {pipeline_mode = #tpu.pipeline_mode<synchronous>, transform_indices = @transform_11, window_bounds = array<i64: 64, 4>}, {pipeline_mode = #tpu.pipeline_mode<synchronous>, transform_indices = @transform_12, window_bounds = array<i64: 1, 4>}, {pipeline_mode = #tpu.pipeline_mode<synchronous>, transform_indices = @transform_13, window_bounds = array<i64: 2, 4>}]} {
    %c0 = arith.constant 0 : index
    %c0_0 = arith.constant 0 : index
    %0 = vector.load %arg1[%c0, %c0_0] : memref<128x49xbf16, #tpu.memory_space<vmem>>, vector<128x49xbf16>
    %c0_1 = arith.constant 0 : index
    %c0_2 = arith.constant 0 : index
    %1 = vector.load %arg2[%c0_1, %c0_2] : memref<49x32xbf16, #tpu.memory_space<vmem>>, vector<49x32xbf16>
    %cst = arith.constant dense<0.000000e+00> : vector<128x32xf32>
    %2 = tpu.matmul %0, %1, %cst {dimension_numbers = #tpu.dot_dimension_numbers<[1], [0], [0], [1], [0, 0, 1, 1], [], []>} : vector<128x49xbf16>, vector<49x32xbf16>, vector<128x32xf32> -> vector<128x32xf32>
    %c0_3 = arith.constant 0 : index
    %c0_4 = arith.constant 0 : index
    %3 = vector.load %arg3[%c0_3, %c0_4] : memref<1x32xf32, #tpu.memory_space<vmem>>, vector<1x32xf32>
    %4 = vector.broadcast %3 : vector<1x32xf32> to vector<128x32xf32>
    %5 = arith.addf %2, %4 : vector<128x32xf32>
    %cst_5 = arith.constant 0.000000e+00 : f32
    %6 = vector.broadcast %cst_5 : f32 to vector<128x32xf32>
    %7 = arith.maximumf %5, %6 : vector<128x32xf32>
    %8 = arith.truncf %7 : vector<128x32xf32> to vector<128x32xbf16>
    %c0_6 = arith.constant 0 : index
    %c0_7 = arith.constant 0 : index
    %c0_8 = arith.constant 0 : index
    %9 = vector.load %arg4[%c0_6, %c0_7, %c0_8] : memref<9x32x128xbf16, #tpu.memory_space<vmem>>, vector<1x32x128xbf16>
    %10 = vector.shape_cast %9 : vector<1x32x128xbf16> to vector<32x128xbf16>
    %cst_9 = arith.constant dense<0.000000e+00> : vector<32x32xf32>
    %11 = tpu.matmul %10, %8, %cst_9 {dimension_numbers = #tpu.dot_dimension_numbers<[1], [0], [0], [1], [0, 0, 1, 1], [], []>} : vector<32x128xbf16>, vector<128x32xbf16>, vector<32x32xf32> -> vector<32x32xf32>
    %12 = arith.truncf %11 : vector<32x32xf32> to vector<32x32xbf16>
    %c0_10 = arith.constant 0 : index
    %c0_11 = arith.constant 0 : index
    %c0_12 = arith.constant 0 : index
    %13 = vector.load %arg5[%c0_10, %c0_11, %c0_12] : memref<9x32x96xbf16, #tpu.memory_space<vmem>>, vector<1x32x96xbf16>
    %14 = vector.shape_cast %13 : vector<1x32x96xbf16> to vector<32x96xbf16>
    %cst_13 = arith.constant dense<0.000000e+00> : vector<32x96xf32>
    %15 = tpu.matmul %12, %14, %cst_13 {dimension_numbers = #tpu.dot_dimension_numbers<[1], [0], [0], [1], [0, 0, 1, 1], [], []>} : vector<32x32xbf16>, vector<32x96xbf16>, vector<32x96xf32> -> vector<32x96xf32>
    %c1 = arith.constant 1 : index
    %c0_14 = arith.constant 0 : index
    %c0_15 = arith.constant 0 : index
    %16 = vector.load %arg4[%c1, %c0_14, %c0_15] : memref<9x32x128xbf16, #tpu.memory_space<vmem>>, vector<1x32x128xbf16>
    %17 = vector.shape_cast %16 : vector<1x32x128xbf16> to vector<32x128xbf16>
    %cst_16 = arith.constant dense<0.000000e+00> : vector<32x32xf32>
    %18 = tpu.matmul %17, %8, %cst_16 {dimension_numbers = #tpu.dot_dimension_numbers<[1], [0], [0], [1], [0, 0, 1, 1], [], []>} : vector<32x128xbf16>, vector<128x32xbf16>, vector<32x32xf32> -> vector<32x32xf32>
    %19 = arith.truncf %18 : vector<32x32xf32> to vector<32x32xbf16>
    %c1_17 = arith.constant 1 : index
    %c0_18 = arith.constant 0 : index
    %c0_19 = arith.constant 0 : index
    %20 = vector.load %arg5[%c1_17, %c0_18, %c0_19] : memref<9x32x96xbf16, #tpu.memory_space<vmem>>, vector<1x32x96xbf16>
    %21 = vector.shape_cast %20 : vector<1x32x96xbf16> to vector<32x96xbf16>
    %cst_20 = arith.constant dense<0.000000e+00> : vector<32x96xf32>
    %22 = tpu.matmul %19, %21, %cst_20 {dimension_numbers = #tpu.dot_dimension_numbers<[1], [0], [0], [1], [0, 0, 1, 1], [], []>} : vector<32x32xbf16>, vector<32x96xbf16>, vector<32x96xf32> -> vector<32x96xf32>
    %23 = arith.addf %15, %22 : vector<32x96xf32>
    %c2 = arith.constant 2 : index
    %c0_21 = arith.constant 0 : index
    %c0_22 = arith.constant 0 : index
    %24 = vector.load %arg4[%c2, %c0_21, %c0_22] : memref<9x32x128xbf16, #tpu.memory_space<vmem>>, vector<1x32x128xbf16>
    %25 = vector.shape_cast %24 : vector<1x32x128xbf16> to vector<32x128xbf16>
    %cst_23 = arith.constant dense<0.000000e+00> : vector<32x32xf32>
    %26 = tpu.matmul %25, %8, %cst_23 {dimension_numbers = #tpu.dot_dimension_numbers<[1], [0], [0], [1], [0, 0, 1, 1], [], []>} : vector<32x128xbf16>, vector<128x32xbf16>, vector<32x32xf32> -> vector<32x32xf32>
    %27 = arith.truncf %26 : vector<32x32xf32> to vector<32x32xbf16>
    %c2_24 = arith.constant 2 : index
    %c0_25 = arith.constant 0 : index
    %c0_26 = arith.constant 0 : index
    %28 = vector.load %arg5[%c2_24, %c0_25, %c0_26] : memref<9x32x96xbf16, #tpu.memory_space<vmem>>, vector<1x32x96xbf16>
    %29 = vector.shape_cast %28 : vector<1x32x96xbf16> to vector<32x96xbf16>
    %cst_27 = arith.constant dense<0.000000e+00> : vector<32x96xf32>
    %30 = tpu.matmul %27, %29, %cst_27 {dimension_numbers = #tpu.dot_dimension_numbers<[1], [0], [0], [1], [0, 0, 1, 1], [], []>} : vector<32x32xbf16>, vector<32x96xbf16>, vector<32x96xf32> -> vector<32x96xf32>
    %31 = arith.addf %23, %30 : vector<32x96xf32>
    %c3 = arith.constant 3 : index
    %c0_28 = arith.constant 0 : index
    %c0_29 = arith.constant 0 : index
    %32 = vector.load %arg4[%c3, %c0_28, %c0_29] : memref<9x32x128xbf16, #tpu.memory_space<vmem>>, vector<1x32x128xbf16>
    %33 = vector.shape_cast %32 : vector<1x32x128xbf16> to vector<32x128xbf16>
    %cst_30 = arith.constant dense<0.000000e+00> : vector<32x32xf32>
    %34 = tpu.matmul %33, %8, %cst_30 {dimension_numbers = #tpu.dot_dimension_numbers<[1], [0], [0], [1], [0, 0, 1, 1], [], []>} : vector<32x128xbf16>, vector<128x32xbf16>, vector<32x32xf32> -> vector<32x32xf32>
    %35 = arith.truncf %34 : vector<32x32xf32> to vector<32x32xbf16>
    %c3_31 = arith.constant 3 : index
    %c0_32 = arith.constant 0 : index
    %c0_33 = arith.constant 0 : index
    %36 = vector.load %arg5[%c3_31, %c0_32, %c0_33] : memref<9x32x96xbf16, #tpu.memory_space<vmem>>, vector<1x32x96xbf16>
    %37 = vector.shape_cast %36 : vector<1x32x96xbf16> to vector<32x96xbf16>
    %cst_34 = arith.constant dense<0.000000e+00> : vector<32x96xf32>
    %38 = tpu.matmul %35, %37, %cst_34 {dimension_numbers = #tpu.dot_dimension_numbers<[1], [0], [0], [1], [0, 0, 1, 1], [], []>} : vector<32x32xbf16>, vector<32x96xbf16>, vector<32x96xf32> -> vector<32x96xf32>
    %39 = arith.addf %31, %38 : vector<32x96xf32>
    %c4 = arith.constant 4 : index
    %c0_35 = arith.constant 0 : index
    %c0_36 = arith.constant 0 : index
    %40 = vector.load %arg4[%c4, %c0_35, %c0_36] : memref<9x32x128xbf16, #tpu.memory_space<vmem>>, vector<1x32x128xbf16>
    %41 = vector.shape_cast %40 : vector<1x32x128xbf16> to vector<32x128xbf16>
    %cst_37 = arith.constant dense<0.000000e+00> : vector<32x32xf32>
    %42 = tpu.matmul %41, %8, %cst_37 {dimension_numbers = #tpu.dot_dimension_numbers<[1], [0], [0], [1], [0, 0, 1, 1], [], []>} : vector<32x128xbf16>, vector<128x32xbf16>, vector<32x32xf32> -> vector<32x32xf32>
    %43 = arith.truncf %42 : vector<32x32xf32> to vector<32x32xbf16>
    %c4_38 = arith.constant 4 : index
    %c0_39 = arith.constant 0 : index
    %c0_40 = arith.constant 0 : index
    %44 = vector.load %arg5[%c4_38, %c0_39, %c0_40] : memref<9x32x96xbf16, #tpu.memory_space<vmem>>, vector<1x32x96xbf16>
    %45 = vector.shape_cast %44 : vector<1x32x96xbf16> to vector<32x96xbf16>
    %cst_41 = arith.constant dense<0.000000e+00> : vector<32x96xf32>
    %46 = tpu.matmul %43, %45, %cst_41 {dimension_numbers = #tpu.dot_dimension_numbers<[1], [0], [0], [1], [0, 0, 1, 1], [], []>} : vector<32x32xbf16>, vector<32x96xbf16>, vector<32x96xf32> -> vector<32x96xf32>
    %47 = arith.addf %39, %46 : vector<32x96xf32>
    %c5 = arith.constant 5 : index
    %c0_42 = arith.constant 0 : index
    %c0_43 = arith.constant 0 : index
    %48 = vector.load %arg4[%c5, %c0_42, %c0_43] : memref<9x32x128xbf16, #tpu.memory_space<vmem>>, vector<1x32x128xbf16>
    %49 = vector.shape_cast %48 : vector<1x32x128xbf16> to vector<32x128xbf16>
    %cst_44 = arith.constant dense<0.000000e+00> : vector<32x32xf32>
    %50 = tpu.matmul %49, %8, %cst_44 {dimension_numbers = #tpu.dot_dimension_numbers<[1], [0], [0], [1], [0, 0, 1, 1], [], []>} : vector<32x128xbf16>, vector<128x32xbf16>, vector<32x32xf32> -> vector<32x32xf32>
    %51 = arith.truncf %50 : vector<32x32xf32> to vector<32x32xbf16>
    %c5_45 = arith.constant 5 : index
    %c0_46 = arith.constant 0 : index
    %c0_47 = arith.constant 0 : index
    %52 = vector.load %arg5[%c5_45, %c0_46, %c0_47] : memref<9x32x96xbf16, #tpu.memory_space<vmem>>, vector<1x32x96xbf16>
    %53 = vector.shape_cast %52 : vector<1x32x96xbf16> to vector<32x96xbf16>
    %cst_48 = arith.constant dense<0.000000e+00> : vector<32x96xf32>
    %54 = tpu.matmul %51, %53, %cst_48 {dimension_numbers = #tpu.dot_dimension_numbers<[1], [0], [0], [1], [0, 0, 1, 1], [], []>} : vector<32x32xbf16>, vector<32x96xbf16>, vector<32x96xf32> -> vector<32x96xf32>
    %55 = arith.addf %47, %54 : vector<32x96xf32>
    %c6 = arith.constant 6 : index
    %c0_49 = arith.constant 0 : index
    %c0_50 = arith.constant 0 : index
    %56 = vector.load %arg4[%c6, %c0_49, %c0_50] : memref<9x32x128xbf16, #tpu.memory_space<vmem>>, vector<1x32x128xbf16>
    %57 = vector.shape_cast %56 : vector<1x32x128xbf16> to vector<32x128xbf16>
    %cst_51 = arith.constant dense<0.000000e+00> : vector<32x32xf32>
    %58 = tpu.matmul %57, %8, %cst_51 {dimension_numbers = #tpu.dot_dimension_numbers<[1], [0], [0], [1], [0, 0, 1, 1], [], []>} : vector<32x128xbf16>, vector<128x32xbf16>, vector<32x32xf32> -> vector<32x32xf32>
    %59 = arith.truncf %58 : vector<32x32xf32> to vector<32x32xbf16>
    %c6_52 = arith.constant 6 : index
    %c0_53 = arith.constant 0 : index
    %c0_54 = arith.constant 0 : index
    %60 = vector.load %arg5[%c6_52, %c0_53, %c0_54] : memref<9x32x96xbf16, #tpu.memory_space<vmem>>, vector<1x32x96xbf16>
    %61 = vector.shape_cast %60 : vector<1x32x96xbf16> to vector<32x96xbf16>
    %cst_55 = arith.constant dense<0.000000e+00> : vector<32x96xf32>
    %62 = tpu.matmul %59, %61, %cst_55 {dimension_numbers = #tpu.dot_dimension_numbers<[1], [0], [0], [1], [0, 0, 1, 1], [], []>} : vector<32x32xbf16>, vector<32x96xbf16>, vector<32x96xf32> -> vector<32x96xf32>
    %63 = arith.addf %55, %62 : vector<32x96xf32>
    %c7 = arith.constant 7 : index
    %c0_56 = arith.constant 0 : index
    %c0_57 = arith.constant 0 : index
    %64 = vector.load %arg4[%c7, %c0_56, %c0_57] : memref<9x32x128xbf16, #tpu.memory_space<vmem>>, vector<1x32x128xbf16>
    %65 = vector.shape_cast %64 : vector<1x32x128xbf16> to vector<32x128xbf16>
    %cst_58 = arith.constant dense<0.000000e+00> : vector<32x32xf32>
    %66 = tpu.matmul %65, %8, %cst_58 {dimension_numbers = #tpu.dot_dimension_numbers<[1], [0], [0], [1], [0, 0, 1, 1], [], []>} : vector<32x128xbf16>, vector<128x32xbf16>, vector<32x32xf32> -> vector<32x32xf32>
    %67 = arith.truncf %66 : vector<32x32xf32> to vector<32x32xbf16>
    %c7_59 = arith.constant 7 : index
    %c0_60 = arith.constant 0 : index
    %c0_61 = arith.constant 0 : index
    %68 = vector.load %arg5[%c7_59, %c0_60, %c0_61] : memref<9x32x96xbf16, #tpu.memory_space<vmem>>, vector<1x32x96xbf16>
    %69 = vector.shape_cast %68 : vector<1x32x96xbf16> to vector<32x96xbf16>
    %cst_62 = arith.constant dense<0.000000e+00> : vector<32x96xf32>
    %70 = tpu.matmul %67, %69, %cst_62 {dimension_numbers = #tpu.dot_dimension_numbers<[1], [0], [0], [1], [0, 0, 1, 1], [], []>} : vector<32x32xbf16>, vector<32x96xbf16>, vector<32x96xf32> -> vector<32x96xf32>
    %71 = arith.addf %63, %70 : vector<32x96xf32>
    %c8 = arith.constant 8 : index
    %c0_63 = arith.constant 0 : index
    %c0_64 = arith.constant 0 : index
    %72 = vector.load %arg4[%c8, %c0_63, %c0_64] : memref<9x32x128xbf16, #tpu.memory_space<vmem>>, vector<1x32x128xbf16>
    %73 = vector.shape_cast %72 : vector<1x32x128xbf16> to vector<32x128xbf16>
    %cst_65 = arith.constant dense<0.000000e+00> : vector<32x32xf32>
    %74 = tpu.matmul %73, %8, %cst_65 {dimension_numbers = #tpu.dot_dimension_numbers<[1], [0], [0], [1], [0, 0, 1, 1], [], []>} : vector<32x128xbf16>, vector<128x32xbf16>, vector<32x32xf32> -> vector<32x32xf32>
    %75 = arith.truncf %74 : vector<32x32xf32> to vector<32x32xbf16>
    %c8_66 = arith.constant 8 : index
    %c0_67 = arith.constant 0 : index
    %c0_68 = arith.constant 0 : index
    %76 = vector.load %arg5[%c8_66, %c0_67, %c0_68] : memref<9x32x96xbf16, #tpu.memory_space<vmem>>, vector<1x32x96xbf16>
    %77 = vector.shape_cast %76 : vector<1x32x96xbf16> to vector<32x96xbf16>
    %cst_69 = arith.constant dense<0.000000e+00> : vector<32x96xf32>
    %78 = tpu.matmul %75, %77, %cst_69 {dimension_numbers = #tpu.dot_dimension_numbers<[1], [0], [0], [1], [0, 0, 1, 1], [], []>} : vector<32x32xbf16>, vector<32x96xbf16>, vector<32x96xf32> -> vector<32x96xf32>
    %79 = arith.addf %71, %78 : vector<32x96xf32>
    %c0_70 = arith.constant 0 : index
    %c0_71 = arith.constant 0 : index
    %80 = vector.load %arg6[%c0_70, %c0_71] : memref<1x96xf32, #tpu.memory_space<vmem>>, vector<1x96xf32>
    %81 = vector.broadcast %80 : vector<1x96xf32> to vector<32x96xf32>
    %82 = arith.addf %79, %81 : vector<32x96xf32>
    %cst_72 = arith.constant 0.000000e+00 : f32
    %83 = vector.broadcast %cst_72 : f32 to vector<32x96xf32>
    %84 = arith.maximumf %82, %83 : vector<32x96xf32>
    %85 = arith.truncf %84 : vector<32x96xf32> to vector<32x96xbf16>
    %c0_73 = arith.constant 0 : index
    %c0_74 = arith.constant 0 : index
    %c0_75 = arith.constant 0 : index
    %86 = vector.load %arg7[%c0_73, %c0_74, %c0_75] : memref<9x32x32xbf16, #tpu.memory_space<vmem>>, vector<1x32x32xbf16>
    %87 = vector.shape_cast %86 : vector<1x32x32xbf16> to vector<32x32xbf16>
    %cst_76 = arith.constant dense<0.000000e+00> : vector<32x96xf32>
    %88 = tpu.matmul %87, %85, %cst_76 {dimension_numbers = #tpu.dot_dimension_numbers<[1], [0], [0], [1], [0, 0, 1, 1], [], []>} : vector<32x32xbf16>, vector<32x96xbf16>, vector<32x96xf32> -> vector<32x96xf32>
    %89 = arith.truncf %88 : vector<32x96xf32> to vector<32x96xbf16>
    %c0_77 = arith.constant 0 : index
    %c0_78 = arith.constant 0 : index
    %c0_79 = arith.constant 0 : index
    %90 = vector.load %arg8[%c0_77, %c0_78, %c0_79] : memref<9x96x257xbf16, #tpu.memory_space<vmem>>, vector<1x96x257xbf16>
    %91 = vector.shape_cast %90 : vector<1x96x257xbf16> to vector<96x257xbf16>
    %cst_80 = arith.constant dense<0.000000e+00> : vector<32x257xf32>
    %92 = tpu.matmul %89, %91, %cst_80 {dimension_numbers = #tpu.dot_dimension_numbers<[1], [0], [0], [1], [0, 0, 1, 1], [], []>} : vector<32x96xbf16>, vector<96x257xbf16>, vector<32x257xf32> -> vector<32x257xf32>
    %c1_81 = arith.constant 1 : index
    %c0_82 = arith.constant 0 : index
    %c0_83 = arith.constant 0 : index
    %93 = vector.load %arg7[%c1_81, %c0_82, %c0_83] : memref<9x32x32xbf16, #tpu.memory_space<vmem>>, vector<1x32x32xbf16>
    %94 = vector.shape_cast %93 : vector<1x32x32xbf16> to vector<32x32xbf16>
    %cst_84 = arith.constant dense<0.000000e+00> : vector<32x96xf32>
    %95 = tpu.matmul %94, %85, %cst_84 {dimension_numbers = #tpu.dot_dimension_numbers<[1], [0], [0], [1], [0, 0, 1, 1], [], []>} : vector<32x32xbf16>, vector<32x96xbf16>, vector<32x96xf32> -> vector<32x96xf32>
    %96 = arith.truncf %95 : vector<32x96xf32> to vector<32x96xbf16>
    %c1_85 = arith.constant 1 : index
    %c0_86 = arith.constant 0 : index
    %c0_87 = arith.constant 0 : index
    %97 = vector.load %arg8[%c1_85, %c0_86, %c0_87] : memref<9x96x257xbf16, #tpu.memory_space<vmem>>, vector<1x96x257xbf16>
    %98 = vector.shape_cast %97 : vector<1x96x257xbf16> to vector<96x257xbf16>
    %cst_88 = arith.constant dense<0.000000e+00> : vector<32x257xf32>
    %99 = tpu.matmul %96, %98, %cst_88 {dimension_numbers = #tpu.dot_dimension_numbers<[1], [0], [0], [1], [0, 0, 1, 1], [], []>} : vector<32x96xbf16>, vector<96x257xbf16>, vector<32x257xf32> -> vector<32x257xf32>
    %100 = arith.addf %92, %99 : vector<32x257xf32>
    %c2_89 = arith.constant 2 : index
    %c0_90 = arith.constant 0 : index
    %c0_91 = arith.constant 0 : index
    %101 = vector.load %arg7[%c2_89, %c0_90, %c0_91] : memref<9x32x32xbf16, #tpu.memory_space<vmem>>, vector<1x32x32xbf16>
    %102 = vector.shape_cast %101 : vector<1x32x32xbf16> to vector<32x32xbf16>
    %cst_92 = arith.constant dense<0.000000e+00> : vector<32x96xf32>
    %103 = tpu.matmul %102, %85, %cst_92 {dimension_numbers = #tpu.dot_dimension_numbers<[1], [0], [0], [1], [0, 0, 1, 1], [], []>} : vector<32x32xbf16>, vector<32x96xbf16>, vector<32x96xf32> -> vector<32x96xf32>
    %104 = arith.truncf %103 : vector<32x96xf32> to vector<32x96xbf16>
    %c2_93 = arith.constant 2 : index
    %c0_94 = arith.constant 0 : index
    %c0_95 = arith.constant 0 : index
    %105 = vector.load %arg8[%c2_93, %c0_94, %c0_95] : memref<9x96x257xbf16, #tpu.memory_space<vmem>>, vector<1x96x257xbf16>
    %106 = vector.shape_cast %105 : vector<1x96x257xbf16> to vector<96x257xbf16>
    %cst_96 = arith.constant dense<0.000000e+00> : vector<32x257xf32>
    %107 = tpu.matmul %104, %106, %cst_96 {dimension_numbers = #tpu.dot_dimension_numbers<[1], [0], [0], [1], [0, 0, 1, 1], [], []>} : vector<32x96xbf16>, vector<96x257xbf16>, vector<32x257xf32> -> vector<32x257xf32>
    %108 = arith.addf %100, %107 : vector<32x257xf32>
    %c3_97 = arith.constant 3 : index
    %c0_98 = arith.constant 0 : index
    %c0_99 = arith.constant 0 : index
    %109 = vector.load %arg7[%c3_97, %c0_98, %c0_99] : memref<9x32x32xbf16, #tpu.memory_space<vmem>>, vector<1x32x32xbf16>
    %110 = vector.shape_cast %109 : vector<1x32x32xbf16> to vector<32x32xbf16>
    %cst_100 = arith.constant dense<0.000000e+00> : vector<32x96xf32>
    %111 = tpu.matmul %110, %85, %cst_100 {dimension_numbers = #tpu.dot_dimension_numbers<[1], [0], [0], [1], [0, 0, 1, 1], [], []>} : vector<32x32xbf16>, vector<32x96xbf16>, vector<32x96xf32> -> vector<32x96xf32>
    %112 = arith.truncf %111 : vector<32x96xf32> to vector<32x96xbf16>
    %c3_101 = arith.constant 3 : index
    %c0_102 = arith.constant 0 : index
    %c0_103 = arith.constant 0 : index
    %113 = vector.load %arg8[%c3_101, %c0_102, %c0_103] : memref<9x96x257xbf16, #tpu.memory_space<vmem>>, vector<1x96x257xbf16>
    %114 = vector.shape_cast %113 : vector<1x96x257xbf16> to vector<96x257xbf16>
    %cst_104 = arith.constant dense<0.000000e+00> : vector<32x257xf32>
    %115 = tpu.matmul %112, %114, %cst_104 {dimension_numbers = #tpu.dot_dimension_numbers<[1], [0], [0], [1], [0, 0, 1, 1], [], []>} : vector<32x96xbf16>, vector<96x257xbf16>, vector<32x257xf32> -> vector<32x257xf32>
    %116 = arith.addf %108, %115 : vector<32x257xf32>
    %c4_105 = arith.constant 4 : index
    %c0_106 = arith.constant 0 : index
    %c0_107 = arith.constant 0 : index
    %117 = vector.load %arg7[%c4_105, %c0_106, %c0_107] : memref<9x32x32xbf16, #tpu.memory_space<vmem>>, vector<1x32x32xbf16>
    %118 = vector.shape_cast %117 : vector<1x32x32xbf16> to vector<32x32xbf16>
    %cst_108 = arith.constant dense<0.000000e+00> : vector<32x96xf32>
    %119 = tpu.matmul %118, %85, %cst_108 {dimension_numbers = #tpu.dot_dimension_numbers<[1], [0], [0], [1], [0, 0, 1, 1], [], []>} : vector<32x32xbf16>, vector<32x96xbf16>, vector<32x96xf32> -> vector<32x96xf32>
    %120 = arith.truncf %119 : vector<32x96xf32> to vector<32x96xbf16>
    %c4_109 = arith.constant 4 : index
    %c0_110 = arith.constant 0 : index
    %c0_111 = arith.constant 0 : index
    %121 = vector.load %arg8[%c4_109, %c0_110, %c0_111] : memref<9x96x257xbf16, #tpu.memory_space<vmem>>, vector<1x96x257xbf16>
    %122 = vector.shape_cast %121 : vector<1x96x257xbf16> to vector<96x257xbf16>
    %cst_112 = arith.constant dense<0.000000e+00> : vector<32x257xf32>
    %123 = tpu.matmul %120, %122, %cst_112 {dimension_numbers = #tpu.dot_dimension_numbers<[1], [0], [0], [1], [0, 0, 1, 1], [], []>} : vector<32x96xbf16>, vector<96x257xbf16>, vector<32x257xf32> -> vector<32x257xf32>
    %124 = arith.addf %116, %123 : vector<32x257xf32>
    %c5_113 = arith.constant 5 : index
    %c0_114 = arith.constant 0 : index
    %c0_115 = arith.constant 0 : index
    %125 = vector.load %arg7[%c5_113, %c0_114, %c0_115] : memref<9x32x32xbf16, #tpu.memory_space<vmem>>, vector<1x32x32xbf16>
    %126 = vector.shape_cast %125 : vector<1x32x32xbf16> to vector<32x32xbf16>
    %cst_116 = arith.constant dense<0.000000e+00> : vector<32x96xf32>
    %127 = tpu.matmul %126, %85, %cst_116 {dimension_numbers = #tpu.dot_dimension_numbers<[1], [0], [0], [1], [0, 0, 1, 1], [], []>} : vector<32x32xbf16>, vector<32x96xbf16>, vector<32x96xf32> -> vector<32x96xf32>
    %128 = arith.truncf %127 : vector<32x96xf32> to vector<32x96xbf16>
    %c5_117 = arith.constant 5 : index
    %c0_118 = arith.constant 0 : index
    %c0_119 = arith.constant 0 : index
    %129 = vector.load %arg8[%c5_117, %c0_118, %c0_119] : memref<9x96x257xbf16, #tpu.memory_space<vmem>>, vector<1x96x257xbf16>
    %130 = vector.shape_cast %129 : vector<1x96x257xbf16> to vector<96x257xbf16>
    %cst_120 = arith.constant dense<0.000000e+00> : vector<32x257xf32>
    %131 = tpu.matmul %128, %130, %cst_120 {dimension_numbers = #tpu.dot_dimension_numbers<[1], [0], [0], [1], [0, 0, 1, 1], [], []>} : vector<32x96xbf16>, vector<96x257xbf16>, vector<32x257xf32> -> vector<32x257xf32>
    %132 = arith.addf %124, %131 : vector<32x257xf32>
    %c6_121 = arith.constant 6 : index
    %c0_122 = arith.constant 0 : index
    %c0_123 = arith.constant 0 : index
    %133 = vector.load %arg7[%c6_121, %c0_122, %c0_123] : memref<9x32x32xbf16, #tpu.memory_space<vmem>>, vector<1x32x32xbf16>
    %134 = vector.shape_cast %133 : vector<1x32x32xbf16> to vector<32x32xbf16>
    %cst_124 = arith.constant dense<0.000000e+00> : vector<32x96xf32>
    %135 = tpu.matmul %134, %85, %cst_124 {dimension_numbers = #tpu.dot_dimension_numbers<[1], [0], [0], [1], [0, 0, 1, 1], [], []>} : vector<32x32xbf16>, vector<32x96xbf16>, vector<32x96xf32> -> vector<32x96xf32>
    %136 = arith.truncf %135 : vector<32x96xf32> to vector<32x96xbf16>
    %c6_125 = arith.constant 6 : index
    %c0_126 = arith.constant 0 : index
    %c0_127 = arith.constant 0 : index
    %137 = vector.load %arg8[%c6_125, %c0_126, %c0_127] : memref<9x96x257xbf16, #tpu.memory_space<vmem>>, vector<1x96x257xbf16>
    %138 = vector.shape_cast %137 : vector<1x96x257xbf16> to vector<96x257xbf16>
    %cst_128 = arith.constant dense<0.000000e+00> : vector<32x257xf32>
    %139 = tpu.matmul %136, %138, %cst_128 {dimension_numbers = #tpu.dot_dimension_numbers<[1], [0], [0], [1], [0, 0, 1, 1], [], []>} : vector<32x96xbf16>, vector<96x257xbf16>, vector<32x257xf32> -> vector<32x257xf32>
    %140 = arith.addf %132, %139 : vector<32x257xf32>
    %c7_129 = arith.constant 7 : index
    %c0_130 = arith.constant 0 : index
    %c0_131 = arith.constant 0 : index
    %141 = vector.load %arg7[%c7_129, %c0_130, %c0_131] : memref<9x32x32xbf16, #tpu.memory_space<vmem>>, vector<1x32x32xbf16>
    %142 = vector.shape_cast %141 : vector<1x32x32xbf16> to vector<32x32xbf16>
    %cst_132 = arith.constant dense<0.000000e+00> : vector<32x96xf32>
    %143 = tpu.matmul %142, %85, %cst_132 {dimension_numbers = #tpu.dot_dimension_numbers<[1], [0], [0], [1], [0, 0, 1, 1], [], []>} : vector<32x32xbf16>, vector<32x96xbf16>, vector<32x96xf32> -> vector<32x96xf32>
    %144 = arith.truncf %143 : vector<32x96xf32> to vector<32x96xbf16>
    %c7_133 = arith.constant 7 : index
    %c0_134 = arith.constant 0 : index
    %c0_135 = arith.constant 0 : index
    %145 = vector.load %arg8[%c7_133, %c0_134, %c0_135] : memref<9x96x257xbf16, #tpu.memory_space<vmem>>, vector<1x96x257xbf16>
    %146 = vector.shape_cast %145 : vector<1x96x257xbf16> to vector<96x257xbf16>
    %cst_136 = arith.constant dense<0.000000e+00> : vector<32x257xf32>
    %147 = tpu.matmul %144, %146, %cst_136 {dimension_numbers = #tpu.dot_dimension_numbers<[1], [0], [0], [1], [0, 0, 1, 1], [], []>} : vector<32x96xbf16>, vector<96x257xbf16>, vector<32x257xf32> -> vector<32x257xf32>
    %148 = arith.addf %140, %147 : vector<32x257xf32>
    %c8_137 = arith.constant 8 : index
    %c0_138 = arith.constant 0 : index
    %c0_139 = arith.constant 0 : index
    %149 = vector.load %arg7[%c8_137, %c0_138, %c0_139] : memref<9x32x32xbf16, #tpu.memory_space<vmem>>, vector<1x32x32xbf16>
    %150 = vector.shape_cast %149 : vector<1x32x32xbf16> to vector<32x32xbf16>
    %cst_140 = arith.constant dense<0.000000e+00> : vector<32x96xf32>
    %151 = tpu.matmul %150, %85, %cst_140 {dimension_numbers = #tpu.dot_dimension_numbers<[1], [0], [0], [1], [0, 0, 1, 1], [], []>} : vector<32x32xbf16>, vector<32x96xbf16>, vector<32x96xf32> -> vector<32x96xf32>
    %152 = arith.truncf %151 : vector<32x96xf32> to vector<32x96xbf16>
    %c8_141 = arith.constant 8 : index
    %c0_142 = arith.constant 0 : index
    %c0_143 = arith.constant 0 : index
    %153 = vector.load %arg8[%c8_141, %c0_142, %c0_143] : memref<9x96x257xbf16, #tpu.memory_space<vmem>>, vector<1x96x257xbf16>
    %154 = vector.shape_cast %153 : vector<1x96x257xbf16> to vector<96x257xbf16>
    %cst_144 = arith.constant dense<0.000000e+00> : vector<32x257xf32>
    %155 = tpu.matmul %152, %154, %cst_144 {dimension_numbers = #tpu.dot_dimension_numbers<[1], [0], [0], [1], [0, 0, 1, 1], [], []>} : vector<32x96xbf16>, vector<96x257xbf16>, vector<32x257xf32> -> vector<32x257xf32>
    %156 = arith.addf %148, %155 : vector<32x257xf32>
    %c0_145 = arith.constant 0 : index
    %c0_146 = arith.constant 0 : index
    %157 = vector.load %arg9[%c0_145, %c0_146] : memref<1x257xf32, #tpu.memory_space<vmem>>, vector<1x257xf32>
    %158 = vector.broadcast %157 : vector<1x257xf32> to vector<32x257xf32>
    %159 = arith.addf %156, %158 : vector<32x257xf32>
    %160 = vector.extract_strided_slice %159 {offsets = [0, 0], sizes = [8, 256], strides = [1, 1]} : vector<32x257xf32> to vector<8x256xf32>
    %cst_147 = arith.constant 0.000000e+00 : f32
    %161 = vector.broadcast %cst_147 : f32 to vector<8x256xf32>
    %162 = arith.maximumf %160, %161 : vector<8x256xf32>
    %163 = vector.extract_strided_slice %159 {offsets = [0, 256], sizes = [8, 1], strides = [1, 1]} : vector<32x257xf32> to vector<8x1xf32>
    %164 = vector.extract_strided_slice %159 {offsets = [8, 256], sizes = [8, 1], strides = [1, 1]} : vector<32x257xf32> to vector<8x1xf32>
    %165 = arith.maximumf %163, %164 : vector<8x1xf32>
    %166 = vector.extract_strided_slice %159 {offsets = [16, 256], sizes = [8, 1], strides = [1, 1]} : vector<32x257xf32> to vector<8x1xf32>
    %167 = vector.extract_strided_slice %159 {offsets = [24, 256], sizes = [8, 1], strides = [1, 1]} : vector<32x257xf32> to vector<8x1xf32>
    %168 = arith.maximumf %166, %167 : vector<8x1xf32>
    %169 = arith.maximumf %165, %168 : vector<8x1xf32>
    %cst_148 = arith.constant 0.000000e+00 : f32
    %170 = vector.broadcast %cst_148 : f32 to vector<8x1xf32>
    %171 = arith.subf %170, %169 : vector<8x1xf32>
    %172 = math.exp %171 : vector<8x1xf32>
    %cst_149 = arith.constant 1.000000e+00 : f32
    %173 = vector.broadcast %cst_149 : f32 to vector<8x1xf32>
    %174 = arith.addf %173, %172 : vector<8x1xf32>
    %cst_150 = arith.constant 1.000000e+00 : f32
    %175 = vector.broadcast %cst_150 : f32 to vector<8x1xf32>
    %176 = arith.divf %175, %174 : vector<8x1xf32>
    %177 = vector.broadcast %176 : vector<8x1xf32> to vector<8x256xf32>
    %178 = arith.mulf %162, %177 : vector<8x256xf32>
    %179 = arith.truncf %178 : vector<8x256xf32> to vector<8x256xbf16>
    %180 = tpu.iota {dimensions = array<i32: 0>} : vector<2x8xi32>
    %181 = tpu.iota {dimensions = array<i32: 1>} : vector<2x8xi32>
    %c4_i32 = arith.constant 4 : i32
    %182 = vector.broadcast %c4_i32 : i32 to vector<2x8xi32>
    %183 = arith.muli %180, %182 : vector<2x8xi32>
    %184 = arith.cmpi sge, %181, %183 : vector<2x8xi32>
    %c1_i32 = arith.constant 1 : i32
    %185 = vector.broadcast %c1_i32 : i32 to vector<2x8xi32>
    %186 = arith.addi %180, %185 : vector<2x8xi32>
    %c4_i32_151 = arith.constant 4 : i32
    %187 = vector.broadcast %c4_i32_151 : i32 to vector<2x8xi32>
    %188 = arith.muli %186, %187 : vector<2x8xi32>
    %189 = arith.cmpi slt, %181, %188 : vector<2x8xi32>
    %190 = arith.andi %184, %189 : vector<2x8xi1>
    %cst_152 = arith.constant 2.500000e-01 : f32
    %cst_153 = arith.constant 0.000000e+00 : f32
    %191 = vector.broadcast %cst_152 : f32 to vector<2x8xf32>
    %192 = vector.broadcast %cst_153 : f32 to vector<2x8xf32>
    %193 = arith.select %190, %191, %192 : vector<2x8xi1>, vector<2x8xf32>
    %194 = arith.truncf %193 : vector<2x8xf32> to vector<2x8xbf16>
    %cst_154 = arith.constant dense<0.000000e+00> : vector<2x256xf32>
    %195 = tpu.matmul %194, %179, %cst_154 {dimension_numbers = #tpu.dot_dimension_numbers<[1], [0], [0], [1], [0, 0, 1, 1], [], []>} : vector<2x8xbf16>, vector<8x256xbf16>, vector<2x256xf32> -> vector<2x256xf32>
    %196 = arith.truncf %195 : vector<2x256xf32> to vector<2x256xbf16>
    %c0_155 = arith.constant 0 : index
    %c0_156 = arith.constant 0 : index
    %197 = vector.load %arg10[%c0_155, %c0_156] : memref<256x64xbf16, #tpu.memory_space<vmem>>, vector<256x64xbf16>
    %cst_157 = arith.constant dense<0.000000e+00> : vector<2x64xf32>
    %198 = tpu.matmul %196, %197, %cst_157 {dimension_numbers = #tpu.dot_dimension_numbers<[1], [0], [0], [1], [0, 0, 1, 1], [], []>} : vector<2x256xbf16>, vector<256x64xbf16>, vector<2x64xf32> -> vector<2x64xf32>
    %c0_158 = arith.constant 0 : index
    %c0_159 = arith.constant 0 : index
    %199 = vector.load %arg11[%c0_158, %c0_159] : memref<1x64xf32, #tpu.memory_space<vmem>>, vector<1x64xf32>
    %200 = vector.broadcast %199 : vector<1x64xf32> to vector<2x64xf32>
    %201 = arith.addf %198, %200 : vector<2x64xf32>
    %cst_160 = arith.constant 0.000000e+00 : f32
    %202 = vector.broadcast %cst_160 : f32 to vector<2x64xf32>
    %203 = arith.maximumf %201, %202 : vector<2x64xf32>
    %204 = arith.truncf %203 : vector<2x64xf32> to vector<2x64xbf16>
    %c0_161 = arith.constant 0 : index
    %c0_162 = arith.constant 0 : index
    %205 = vector.load %arg12[%c0_161, %c0_162] : memref<64x4xbf16, #tpu.memory_space<vmem>>, vector<64x4xbf16>
    %cst_163 = arith.constant dense<0.000000e+00> : vector<2x4xf32>
    %206 = tpu.matmul %204, %205, %cst_163 {dimension_numbers = #tpu.dot_dimension_numbers<[1], [0], [0], [1], [0, 0, 1, 1], [], []>} : vector<2x64xbf16>, vector<64x4xbf16>, vector<2x4xf32> -> vector<2x4xf32>
    %c0_164 = arith.constant 0 : index
    %c0_165 = arith.constant 0 : index
    %207 = vector.load %arg13[%c0_164, %c0_165] : memref<1x4xf32, #tpu.memory_space<vmem>>, vector<1x4xf32>
    %208 = vector.broadcast %207 : vector<1x4xf32> to vector<2x4xf32>
    %209 = arith.addf %206, %208 : vector<2x4xf32>
    %cst_166 = arith.constant dense<0xFF800000> : vector<2xf32>
    %210 = vector.multi_reduction <maximumf>, %209, %cst_166 [1] : vector<2x4xf32> to vector<2xf32>
    %211 = vector.shape_cast %210 : vector<2xf32> to vector<2x1xf32>
    %212 = vector.broadcast %211 : vector<2x1xf32> to vector<2x4xf32>
    %213 = arith.subf %209, %212 : vector<2x4xf32>
    %214 = math.exp %213 : vector<2x4xf32>
    %cst_167 = arith.constant dense<0.000000e+00> : vector<2xf32>
    %215 = vector.multi_reduction <add>, %214, %cst_167 [1] : vector<2x4xf32> to vector<2xf32>
    %216 = vector.shape_cast %215 : vector<2xf32> to vector<2x1xf32>
    %217 = math.log %216 : vector<2x1xf32>
    %218 = vector.broadcast %217 : vector<2x1xf32> to vector<2x4xf32>
    %219 = arith.subf %213, %218 : vector<2x4xf32>
    %c0_168 = arith.constant 0 : index
    %c0_169 = arith.constant 0 : index
    %220 = vector.load %arg14[%c0_168, %c0_169] : memref<2x4xf32, #tpu.memory_space<vmem>>, vector<2x4xf32>
    tpu.vector_store %arg14[%c0_168, %c0_169], %219 {strides = array<i32>} : memref<2x4xf32, #tpu.memory_space<vmem>>, vector<2x4xf32>,
    return
  }
  func.func @transform_0(%arg0: i32) -> (i32, i32) {
    %c0_i32 = arith.constant 0 : i32
    %c0_i32_0 = arith.constant 0 : i32
    %c0_i32_1 = arith.constant 0 : i32
    return %c0_i32, %c0_i32_0 : i32, i32
  }
  func.func @transform_1(%arg0: i32) -> (i32, i32) {
    %c0_i32 = arith.constant 0 : i32
    %c0_i32_0 = arith.constant 0 : i32
    %c0_i32_1 = arith.constant 0 : i32
    return %c0_i32, %c0_i32_0 : i32, i32
  }
  func.func @transform_2(%arg0: i32) -> (i32, i32) {
    %c0_i32 = arith.constant 0 : i32
    %c0_i32_0 = arith.constant 0 : i32
    %c0_i32_1 = arith.constant 0 : i32
    return %c0_i32, %c0_i32_0 : i32, i32
  }
  func.func @transform_3(%arg0: i32) -> (i32, i32, i32) {
    %c0_i32 = arith.constant 0 : i32
    %c0_i32_0 = arith.constant 0 : i32
    %c0_i32_1 = arith.constant 0 : i32
    %c0_i32_2 = arith.constant 0 : i32
    return %c0_i32, %c0_i32_0, %c0_i32_1 : i32, i32, i32
  }
  func.func @transform_4(%arg0: i32) -> (i32, i32, i32) {
    %c0_i32 = arith.constant 0 : i32
    %c0_i32_0 = arith.constant 0 : i32
    %c0_i32_1 = arith.constant 0 : i32
    %c0_i32_2 = arith.constant 0 : i32
    return %c0_i32, %c0_i32_0, %c0_i32_1 : i32, i32, i32
  }
  func.func @transform_5(%arg0: i32) -> (i32, i32) {
    %c0_i32 = arith.constant 0 : i32
    %c0_i32_0 = arith.constant 0 : i32
    %c0_i32_1 = arith.constant 0 : i32
    return %c0_i32, %c0_i32_0 : i32, i32
  }
  func.func @transform_6(%arg0: i32) -> (i32, i32, i32) {
    %c0_i32 = arith.constant 0 : i32
    %c0_i32_0 = arith.constant 0 : i32
    %c0_i32_1 = arith.constant 0 : i32
    %c0_i32_2 = arith.constant 0 : i32
    return %c0_i32, %c0_i32_0, %c0_i32_1 : i32, i32, i32
  }
  func.func @transform_7(%arg0: i32) -> (i32, i32, i32) {
    %c0_i32 = arith.constant 0 : i32
    %c0_i32_0 = arith.constant 0 : i32
    %c0_i32_1 = arith.constant 0 : i32
    %c0_i32_2 = arith.constant 0 : i32
    return %c0_i32, %c0_i32_0, %c0_i32_1 : i32, i32, i32
  }
  func.func @transform_8(%arg0: i32) -> (i32, i32) {
    %c0_i32 = arith.constant 0 : i32
    %c0_i32_0 = arith.constant 0 : i32
    %c0_i32_1 = arith.constant 0 : i32
    return %c0_i32, %c0_i32_0 : i32, i32
  }
  func.func @transform_9(%arg0: i32) -> (i32, i32) {
    %c0_i32 = arith.constant 0 : i32
    %c0_i32_0 = arith.constant 0 : i32
    %c0_i32_1 = arith.constant 0 : i32
    return %c0_i32, %c0_i32_0 : i32, i32
  }
  func.func @transform_10(%arg0: i32) -> (i32, i32) {
    %c0_i32 = arith.constant 0 : i32
    %c0_i32_0 = arith.constant 0 : i32
    %c0_i32_1 = arith.constant 0 : i32
    return %c0_i32, %c0_i32_0 : i32, i32
  }
  func.func @transform_11(%arg0: i32) -> (i32, i32) {
    %c0_i32 = arith.constant 0 : i32
    %c0_i32_0 = arith.constant 0 : i32
    %c0_i32_1 = arith.constant 0 : i32
    return %c0_i32, %c0_i32_0 : i32, i32
  }
  func.func @transform_12(%arg0: i32) -> (i32, i32) {
    %c0_i32 = arith.constant 0 : i32
    %c0_i32_0 = arith.constant 0 : i32
    %c0_i32_1 = arith.constant 0 : i32
    return %c0_i32, %c0_i32_0 : i32, i32
  }
  func.func @transform_13(%arg0: i32) -> (i32, i32) {
    %c0_i32 = arith.constant 0 : i32
    %c0_i32_0 = arith.constant 0 : i32
    %c0_i32_1 = arith.constant 0 : i32
    return %c0_i32, %c0_i32_0 : i32, i32
  }
}

</mosaic_0001>

<bundles_post_ra>
// kernel: forward.1
= control target key start
LH: loop header
LB: loop body
LE: loop exit
PB: predicated region body
PF: predicated region fallthrough
CT: control target
= control target key end

     0   :  { %vm159_vm0 = vcmask 1040384   ;;  %v5027_v2 = vmov 0   ;;  %s6641_s0 = inlined_call_operand.vmem [shape: bf16[128,49], index: 0, kind: input, shape index: {}]   ;;  %s6642_s1 = inlined_call_operand.vmem [shape: bf16[49,32], index: 1, kind: input, shape index: {}]   ;;  %s6643_s2 = inlined_call_operand.vmem [shape: f32[1,32], index: 2, kind: input, shape index: {}]   ;;  %s6644_s3 = inlined_call_operand.vmem [shape: bf16[9,32,128], index: 3, kind: input, shape index: {}]   ;;  %s6645_s4 = inlined_call_operand.vmem [shape: bf16[9,32,96], index: 4, kind: input, shape index: {}]   ;;  %s6646_s5 = inlined_call_operand.vmem [shape: f32[1,96], index: 5, kind: input, shape index: {}]   ;;  %s6647_s6 = inlined_call_operand.vmem [shape: bf16[9,32,32], index: 6, kind: input, shape index: {}]   ;;  %s6648_s7 = inlined_call_operand.vmem [shape: bf16[9,96,257], index: 7, kind: input, shape index: {}]   ;;  %s6649_s8 = inlined_call_operand.vmem [shape: f32[1,257], index: 8, kind: input, shape index: {}]   ;;  %s6650_s9 = inlined_call_operand.vmem [shape: bf16[256,64], index: 9, kind: input, shape index: {}]   ;;  %s6651_s10 = inlined_call_operand.vmem [shape: f32[1,64], index: 10, kind: input, shape index: {}]   ;;  %s6652_s11 = inlined_call_operand.vmem [shape: bf16[64,4], index: 11, kind: input, shape index: {}]   ;;  %s6653_s12 = inlined_call_operand.vmem [shape: f32[1,4], index: 12, kind: input, shape index: {}]   ;;  %s6654_s13 = inlined_call_operand.hbm [shape: f32[2,4], index: 13, kind: output, shape index: {}]  }
   0x1   :  { %v68_v0 = vld [vmem:[%s6642_s1 + $0x18] sm:$0x1]  ;;  %v161_v3 = vsel %vm159_vm0, 65535, %v5027_v2  ;;  %4988 = vset.pattern.permute.xlu0 %v5027_v2 }
   0x2   :  { %v126_v1 = vunpack.c.l.b16 %v68_v0 }
   0x4   :  { %v130_v4 = vpack.c.b16 %v126_v1, %v126_v1 }
   0x5   :  { %18 = vsyncpa [#allocation3], 0  ;;  %v4748_v6 = vld [vmem:[%s6642_s1 + $0x10] sm:$0xff]  ;;  %v4747_v7 = vld [vmem:[%s6642_s1 + $0x8] sm:$0xff]  ;;  %vm134_vm1 = vcmask 400384   ;;  %vm334_vm2 = vcmask 261120  }
   0x6   :  { %v163_v5 = vand.u32 %v161_v3, %v130_v4  ;;  %v4746_v8 = vld [vmem:[%s6642_s1] sm:$0xff]  ;;  %v4739_v10 = vld [vmem:[%s6641_s0 + $0x8] sm:$0xff]  ;;  %v4740_v11 = vld [vmem:[%s6641_s0 + $0x10] sm:$0xff]  ;;  %vm1227_vm3 = vcmask 785408   ;;  %vm3083_vm11 = vcmask 1043456   ;;  %vm3079_vm12 = vcmask 64512  }
   0x7   :  { %v4738_v9 = vld [vmem:[%s6641_s0] sm:$0xff]  ;;  %v4741_v12 = vld [vmem:[%s6641_s0 + $0x18] sm:$0xff]  ;;  %v4743_v14 = vld [vmem:[%s6641_s0 + $0x28] sm:$0xff]  ;;  %vm3314_vm13 = vcmask 523264   ;;  %vm3331_vm14 = vcmask 25600   ;;  %s3352_s27 = sshll.u32 %s6654_s13, 4  ;;  %s3353_s27 = int_to_ptr.hbm [resolvable:$true] %s3352_s27 }
   0x8   :  { %169 = vmatpush.bf16.msra.mxu0 %v163_v5  ;;  %v4742_v13 = vld [vmem:[%s6641_s0 + $0x20] sm:$0xff]  ;;  %v4744_v15 = vld [vmem:[%s6641_s0 + $0x30] sm:$0xff]  ;;  %v4745_v16 = vld [vmem:[%s6641_s0 + $0x38] sm:$0xff] }
   0x9   :  { %v4989_v32 = vld [vmem:[%s6643_s2] ss:$0 sm:$0xff] }
   0xc   :  { %170 = vmatpush.bf16.msra.mxu0 %v4748_v6 }
  0x10   :  { %171 = vmatpush.bf16.msra.mxu0 %v4747_v7 }
  0x14   :  { %172 = vmatpush.bf16.msra.mxu0 %v4746_v8 }
  0x17   :  { %3405 = vmatmul.msk.bf16.vlgmr.msra.gmra.mxu0 %vm134_vm1, %v4738_v9  ;;  %v4760_v9 = vld [vmem:[%s6645_s4 + $0x28] sm:$0xff] }
  0x27   :  { %3406 = vmatmul.msk.bf16.gmra.mxu0 %vm134_vm1, %v4739_v10 }
  0x37   :  { %3407 = vmatmul.msk.bf16.gmra.mxu0 %vm134_vm1, %v4740_v11  ;;  %v4749_v11 = vld [vmem:[%s6644_s3] sm:$0xff] }
  0x47   :  { %3408 = vmatmul.msk.bf16.gmra.mxu0 %vm134_vm1, %v4741_v12  ;;  %v4753_v12 = vld [vmem:[%s6644_s3 + $0x10] sm:$0xff] }
  0x57   :  { %3409 = vmatmul.msk.bf16.gmra.mxu0 %vm134_vm1, %v4742_v13  ;;  %v4759_v13 = vld [vmem:[%s6645_s4 + $0x20] sm:$0xff] }
  0x67   :  { %3410 = vmatmul.msk.bf16.gmra.mxu0 %vm134_vm1, %v4743_v14  ;;  %v4750_v14 = vld [vmem:[%s6644_s3 + $0x8] sm:$0xff] }
  0x77   :  { %3411 = vmatmul.msk.bf16.gmra.mxu0 %vm134_vm1, %v4744_v15  ;;  %v4754_v15 = vld [vmem:[%s6644_s3 + $0x18] sm:$0xff] }
  0x87   :  { %3412 = vmatmul.msk.bf16.gmra.mxu0 %vm134_vm1, %v4745_v16  ;;  %v4764_v16 = vld [vmem:[%s6645_s4 + $0x38] sm:$0xff] }
  0x94   :  { %v174_v17 = vpop.f32.mrf.mxu0 }
  0x95   :  { %v175_v4 = vadd.f32 %v4989_v32, %v174_v17  ;;  %v4763_v17 = vld [vmem:[%s6645_s4 + $0x30] sm:$0xff] }
  0x97   :  { %v214_v8 = vmax.f32 %v175_v4, 0.0 }
  0x9c   :  { %v176_v18 = vpop.f32.mrf.mxu0 }
  0x9d   :  { %v177_v1 = vadd.f32 %v4989_v32, %v176_v18  ;;  %v4757_v18 = vld [vmem:[%s6644_s3 + $0x20] sm:$0xff] }
  0x9f   :  { %v215_v6 = vmax.f32 %v177_v1, 0.0 }
  0xa1   :  { %v5170_v10 = vpack.c.bf16 %v215_v6, %v214_v8 }
  0xa4   :  { %v179_v19 = vpop.f32.mrf.mxu0 }
  0xa5   :  { %v180_v63 = vadd.f32 %v4989_v32, %v179_v19  ;;  %v4758_v19 = vld [vmem:[%s6644_s3 + $0x28] sm:$0xff] }
  0xa7   :  { %v216_v5 = vmax.f32 %v180_v63, 0.0 }
  0xac   :  { %v181_v20 = vpop.f32.mrf.mxu0 }
  0xad   :  { %v182_v60 = vadd.f32 %v4989_v32, %v181_v20  ;;  %v4756_v20 = vld [vmem:[%s6645_s4 + $0x18] sm:$0xff] }
  0xae   :  { %347 = vmatpush.bf16.msra.mxu3 %v4756_v20  ;;  %v4778_v20 = vld [vmem:[%s6644_s3 + $0x78] sm:$0xff] }
  0xaf   :  { %v217_v2 = vmax.f32 %v182_v60, 0.0 }
  0xb1   :  { %v5163_v7 = vpack.c.bf16 %v217_v2, %v216_v5 }
  0xb4   :  { %v184_v21 = vpop.f32.mrf.mxu0 }
  0xb5   :  { %v185_v58 = vadd.f32 %v4989_v32, %v184_v21  ;;  %v4755_v21 = vld [vmem:[%s6645_s4 + $0x10] sm:$0xff] }
  0xb6   :  { %348 = vmatpush.bf16.msra.mxu3 %v4755_v21  ;;  %v4775_v21 = vld [vmem:[%s6645_s4 + $0x60] sm:$0xff] }
  0xb7   :  { %v218_v0 = vmax.f32 %v185_v58, 0.0 }
  0xbc   :  { %v186_v22 = vpop.f32.mrf.mxu0 }
  0xbd   :  { %v187_v55 = vadd.f32 %v4989_v32, %v186_v22  ;;  %v4752_v22 = vld [vmem:[%s6645_s4 + $0x8] sm:$0xff] }
  0xbe   :  { %384 = vmatpush.bf16.msrb.mxu3 %v4752_v22 }
  0xbf   :  { %v219_v61 = vmax.f32 %v187_v55, 0.0 }
  0xc1   :  { %v5159_v3 = vpack.c.bf16 %v219_v61, %v218_v0 }
  0xc4   :  { %v189_v23 = vpop.f32.mrf.mxu0 }
  0xc5   :  { %v190_v53 = vadd.f32 %v4989_v32, %v189_v23  ;;  %v4751_v23 = vld [vmem:[%s6645_s4] sm:$0xff] }
  0xc6   :  { %385 = vmatpush.bf16.msrb.mxu3 %v4751_v23 }
  0xc7   :  { %v220_v59 = vmax.f32 %v190_v53, 0.0 }
  0xcc   :  { %v191_v24 = vpop.f32.mrf.mxu0 }
  0xcd   :  { %v192_v50 = vadd.f32 %v4989_v32, %v191_v24 }
  0xcf   :  { %v221_v56 = vmax.f32 %v192_v50, 0.0 }
  0xd1   :  { %v5155_v62 = vpack.c.bf16 %v221_v56, %v220_v59 }
  0xd4   :  { %v194_v25 = vpop.f32.mrf.mxu0 }
  0xd5   :  { %v195_v48 = vadd.f32 %v4989_v32, %v194_v25 }
  0xd7   :  { %v222_v54 = vmax.f32 %v195_v48, 0.0  ;;  %v4766_v48 = vld [vmem:[%s6644_s3 + $0x48] sm:$0xff] }
  0xdc   :  { %v196_v26 = vpop.f32.mrf.mxu0 }
  0xdd   :  { %v197_v45 = vadd.f32 %v4989_v32, %v196_v26 }
  0xdf   :  { %v223_v51 = vmax.f32 %v197_v45, 0.0  ;;  %v4765_v45 = vld [vmem:[%s6644_s3 + $0x40] sm:$0xff] }
  0xe1   :  { %v5151_v57 = vpack.c.bf16 %v223_v51, %v222_v54 }
  0xe4   :  { %v199_v27 = vpop.f32.mrf.mxu0 }
  0xe5   :  { %v200_v43 = vadd.f32 %v4989_v32, %v199_v27 }
  0xe7   :  { %v224_v49 = vmax.f32 %v200_v43, 0.0 }
  0xec   :  { %v201_v28 = vpop.f32.mrf.mxu0 }
  0xed   :  { %v202_v40 = vadd.f32 %v4989_v32, %v201_v28 }
  0xef   :  { %v225_v46 = vmax.f32 %v202_v40, 0.0  ;;  %v4767_v40 = vld [vmem:[%s6645_s4 + $0x40] sm:$0xff] }
  0xf1   :  { %v5147_v52 = vpack.c.bf16 %v225_v46, %v224_v49  ;;  %v4761_v46 = vld [vmem:[%s6644_s3 + $0x30] sm:$0xff]  ;;  %v4762_v49 = vld [vmem:[%s6644_s3 + $0x38] sm:$0xff] }
  0xf4   :  { %v204_v29 = vpop.f32.mrf.mxu0 }
  0xf5   :  { %v205_v37 = vadd.f32 %v4989_v32, %v204_v29 }
  0xf7   :  { %v226_v44 = vmax.f32 %v205_v37, 0.0  ;;  %v4768_v37 = vld [vmem:[%s6645_s4 + $0x48] sm:$0xff] }
  0xfc   :  { %v206_v30 = vpop.f32.mrf.mxu0 }
  0xfd   :  { %v207_v35 = vadd.f32 %v4989_v32, %v206_v30 }
  0xff   :  { %v227_v41 = vmax.f32 %v207_v35, 0.0 }
 0x101   :  { %v5143_v47 = vpack.c.bf16 %v227_v41, %v226_v44 }
 0x104   :  { %v209_v31 = vpop.f32.mrf.mxu0 }
 0x105   :  { %v210_v33 = vadd.f32 %v4989_v32, %v209_v31 }
 0x107   :  { %v228_v38 = vmax.f32 %v210_v33, 0.0 }
 0x10c   :  { %v211_v34 = vpop.f32.mrf.mxu0 }
 0x10d   :  { %v212_v36 = vadd.f32 %v4989_v32, %v211_v34 }
 0x10f   :  { %v229_v39 = vmax.f32 %v212_v36, 0.0 }
 0x111   :  { %v5139_v42 = vpack.c.bf16 %v229_v39, %v228_v38 }
 0x113   :  { %254 = vmatpush.bf16.msra.mxu1 %v5139_v42  ;;  %296 = vmatpush.bf16.msra.mxu2 %v5139_v42 }
 0x117   :  { %255 = vmatpush.bf16.msra.mxu1 %v5143_v47  ;;  %297 = vmatpush.bf16.msra.mxu2 %v5143_v47 }
 0x11b   :  { %256 = vmatpush.bf16.msra.mxu1 %v5147_v52  ;;  %298 = vmatpush.bf16.msra.mxu2 %v5147_v52 }
 0x11f   :  { %257 = vmatpush.bf16.msra.mxu1 %v5151_v57  ;;  %299 = vmatpush.bf16.msra.mxu2 %v5151_v57 }
 0x123   :  { %258 = vmatpush.bf16.msra.mxu1 %v5155_v62  ;;  %300 = vmatpush.bf16.msra.mxu2 %v5155_v62 }
 0x127   :  { %259 = vmatpush.bf16.msra.mxu1 %v5159_v3  ;;  %301 = vmatpush.bf16.msra.mxu2 %v5159_v3 }
 0x12b   :  { %260 = vmatpush.bf16.msra.mxu1 %v5163_v7  ;;  %302 = vmatpush.bf16.msra.mxu2 %v5163_v7 }
 0x12f   :  { %261 = vmatpush.bf16.msra.mxu1 %v5170_v10  ;;  %303 = vmatpush.bf16.msra.mxu2 %v5170_v10 }
 0x132   :  { %262 = vmatmul.bf16.vlgmr.msra.gmra.mxu1 %v4749_v11  ;;  %304 = vmatmul.bf16.vlgmr.msra.gmra.mxu2 %v4753_v12 }
 0x133   :  { %414 = vmatpush.bf16.msrb.mxu1 %v5139_v42  ;;  %464 = vmatpush.bf16.msrb.mxu2 %v4760_v9 }
 0x137   :  { %415 = vmatpush.bf16.msrb.mxu1 %v5143_v47  ;;  %465 = vmatpush.bf16.msrb.mxu2 %v4759_v13 }
 0x13b   :  { %582 = vmatpush.bf16.msra.mxu2 %v5139_v42  ;;  %416 = vmatpush.bf16.msrb.mxu1 %v5147_v52 }
 0x13f   :  { %583 = vmatpush.bf16.msra.mxu2 %v5143_v47  ;;  %417 = vmatpush.bf16.msrb.mxu1 %v5151_v57 }
 0x142   :  { %267 = vmatmul.bf16.gmra.mxu1 %v4750_v14  ;;  %309 = vmatmul.bf16.gmra.mxu2 %v4754_v15 }
 0x143   :  { %584 = vmatpush.bf16.msra.mxu2 %v5147_v52  ;;  %418 = vmatpush.bf16.msrb.mxu1 %v5155_v62 }
 0x147   :  { %585 = vmatpush.bf16.msra.mxu2 %v5151_v57  ;;  %419 = vmatpush.bf16.msrb.mxu1 %v5159_v3 }
 0x14b   :  { %586 = vmatpush.bf16.msra.mxu2 %v5155_v62  ;;  %420 = vmatpush.bf16.msrb.mxu1 %v5163_v7 }
 0x14f   :  { %587 = vmatpush.bf16.msra.mxu2 %v5159_v3  ;;  %421 = vmatpush.bf16.msrb.mxu1 %v5170_v10 }
 0x152   :  { %422 = vmatmul.bf16.vlgmr.msrb.gmra.mxu1 %v4757_v18 }
 0x153   :  { %548 = vmatpush.bf16.msra.mxu1 %v4764_v16  ;;  %588 = vmatpush.bf16.msra.mxu2 %v5163_v7 }
 0x157   :  { %549 = vmatpush.bf16.msra.mxu1 %v4763_v17  ;;  %589 = vmatpush.bf16.msra.mxu2 %v5170_v10 }
 0x15b   :  { %666 = vmatpush.bf16.msrb.mxu1 %v5139_v42 }
 0x15f   :  { %667 = vmatpush.bf16.msrb.mxu1 %v5143_v47 }
 0x162   :  { %427 = vmatmul.bf16.gmra.mxu1 %v4758_v19 }
 0x163   :  { %668 = vmatpush.bf16.msrb.mxu1 %v5147_v52 }
 0x167   :  { %669 = vmatpush.bf16.msrb.mxu1 %v5151_v57 }
 0x16b   :  { %670 = vmatpush.bf16.msrb.mxu1 %v5155_v62 }
 0x16f   :  { %671 = vmatpush.bf16.msrb.mxu1 %v5159_v3 }
 0x173   :  { %672 = vmatpush.bf16.msrb.mxu1 %v5163_v7 }
 0x177   :  { %673 = vmatpush.bf16.msrb.mxu1 %v5170_v10 }
 0x1af   :  { %v263_v24 = vpop.f32.mrf.mxu1 }
 0x1b5   :  { %v305_v25 = vpop.f32.mrf.mxu2 }
 0x1b7   :  { %v265_v26 = vpop.f32.mrf.mxu1 }
 0x1b8   :  { %v273_v38 = vpack.c.bf16 %v265_v26, %v263_v24  ;;  %v4772_v24 = vld [vmem:[%s6645_s4 + $0x58] sm:$0xff] }
 0x1bd   :  { %v307_v27 = vpop.f32.mrf.mxu2 }
 0x1be   :  { %v315_v28 = vpack.c.bf16 %v307_v27, %v305_v25  ;;  %v4771_v27 = vld [vmem:[%s6645_s4 + $0x50] sm:$0xff] }
 0x1bf   :  { %v268_v29 = vpop.f32.mrf.mxu1 }
 0x1c0   :  { %3445 = vmatmul.msk.bf16.vlgmr.msra.gmra.mxu3 %vm334_vm2, %v315_v28 }
 0x1c1   :  { %498 = vmatpush.bf16.msra.mxu3 %v5139_v42 }
 0x1c5   :  { %499 = vmatpush.bf16.msra.mxu3 %v5143_v47  ;;  %v310_v30 = vpop.f32.mrf.mxu2 }
 0x1c7   :  { %v270_v31 = vpop.f32.mrf.mxu1 }
 0x1c8   :  { %v274_v44 = vpack.c.bf16 %v270_v31, %v268_v29 }
 0x1c9   :  { %500 = vmatpush.bf16.msra.mxu3 %v5147_v52 }
 0x1cd   :  { %501 = vmatpush.bf16.msra.mxu3 %v5151_v57  ;;  %v312_v32 = vpop.f32.mrf.mxu2 }
 0x1ce   :  { %v316_v33 = vpack.c.bf16 %v312_v32, %v310_v30 }
 0x1cf   :  { %v423_v34 = vpop.f32.mrf.mxu1 }
 0x1d0   :  { %3446 = vmatmul.msk.bf16.gmra.mxu3 %vm334_vm2, %v316_v33 }
 0x1d1   :  { %502 = vmatpush.bf16.msra.mxu3 %v5155_v62 }
 0x1d5   :  { %503 = vmatpush.bf16.msra.mxu3 %v5159_v3 }
 0x1d7   :  { %v425_v35 = vpop.f32.mrf.mxu1 }
 0x1d8   :  { %v433_v36 = vpack.c.bf16 %v425_v35, %v423_v34 }
 0x1d9   :  { %504 = vmatpush.bf16.msra.mxu3 %v5163_v7 }
 0x1da   :  { %3481 = vmatmul.msk.bf16.vlgmr.msrb.gmra.mxu2 %vm334_vm2, %v433_v36 }
 0x1db   :  { %716 = vmatpush.bf16.msrb.mxu2 %v4772_v24 }
 0x1dd   :  { %505 = vmatpush.bf16.msra.mxu3 %v5170_v10 }
 0x1df   :  { %v428_v39 = vpop.f32.mrf.mxu1  ;;  %717 = vmatpush.bf16.msrb.mxu2 %v4771_v27 }
 0x1e0   :  { %3455 = vmatmul.msk.bf16.vlgmr.msrb.gmra.mxu3 %vm334_vm2, %v273_v38  ;;  %v4780_v38 = vld [vmem:[%s6645_s4 + $0x78] sm:$0xff] }
 0x1e1   :  { %632 = vmatpush.bf16.msrb.mxu3 %v4768_v37 }
 0x1e5   :  { %633 = vmatpush.bf16.msrb.mxu3 %v4767_v40  ;;  %v4779_v40 = vld [vmem:[%s6645_s4 + $0x70] sm:$0xff] }
 0x1e7   :  { %v430_v41 = vpop.f32.mrf.mxu1 }
 0x1e8   :  { %v434_v43 = vpack.c.bf16 %v430_v41, %v428_v39  ;;  %v4784_v39 = vld [vmem:[%s6645_s4 + $0x88] sm:$0xff]  ;;  %v4783_v41 = vld [vmem:[%s6645_s4 + $0x80] sm:$0xff] }
 0x1ea   :  { %3482 = vmatmul.msk.bf16.gmra.mxu2 %vm334_vm2, %v434_v43 }
 0x1f0   :  { %3456 = vmatmul.msk.bf16.gmra.mxu3 %vm334_vm2, %v274_v44 }
 0x1fa   :  { %590 = vmatmul.bf16.vlgmr.msra.gmra.mxu2 %v4765_v45 }
 0x1fb   :  { %884 = vmatpush.bf16.msra.mxu2 %v4780_v38 }
 0x1ff   :  { %885 = vmatpush.bf16.msra.mxu2 %v4779_v40 }
 0x200   :  { %506 = vmatmul.bf16.vlgmr.msra.gmra.mxu3 %v4761_v46 }
 0x201   :  { %750 = vmatpush.bf16.msra.mxu3 %v5139_v42 }
 0x205   :  { %751 = vmatpush.bf16.msra.mxu3 %v5143_v47 }
 0x209   :  { %752 = vmatpush.bf16.msra.mxu3 %v5147_v52 }
 0x20a   :  { %595 = vmatmul.bf16.gmra.mxu2 %v4766_v48 }
 0x20d   :  { %753 = vmatpush.bf16.msra.mxu3 %v5151_v57 }
 0x210   :  { %511 = vmatmul.bf16.gmra.mxu3 %v4762_v49 }
 0x211   :  { %754 = vmatpush.bf16.msra.mxu3 %v5155_v62 }
 0x215   :  { %755 = vmatpush.bf16.msra.mxu3 %v5159_v3 }
 0x219   :  { %756 = vmatpush.bf16.msra.mxu3 %v5163_v7 }
 0x21d   :  { %757 = vmatpush.bf16.msra.mxu3 %v5170_v10 }
 0x243   :  { %v350_v50 = vpop.f32.mrf.mxu3 }
 0x24b   :  { %v5277_v51 = vpop.f32.mrf.mxu3 }
 0x253   :  { %v355_v53 = vpop.f32.mrf.mxu3 }
 0x25b   :  { %v5279_v54 = vpop.f32.mrf.mxu3 }
 0x25d   :  { %v467_v55 = vpop.f32.mrf.mxu2 }
 0x263   :  { %v387_v56 = vpop.f32.mrf.mxu3 }
 0x264   :  { %v388_v58 = vadd.f32 %v387_v56, %v350_v50 }
 0x265   :  { %v5281_v59 = vpop.f32.mrf.mxu2 }
 0x266   :  { %v5283_v60 = vadd.f32 %v467_v55, %v388_v58 }
 0x26b   :  { %v5285_v61 = vpop.f32.mrf.mxu3 }
 0x26d   :  { %v472_v63 = vpop.f32.mrf.mxu2 }
 0x273   :  { %v392_v0 = vpop.f32.mrf.mxu3 }
 0x274   :  { %v393_v1 = vadd.f32 %v392_v0, %v355_v53 }
 0x275   :  { %v5287_v2 = vpop.f32.mrf.mxu2 }
 0x276   :  { %v5289_v4 = vadd.f32 %v472_v63, %v393_v1 }
 0x27b   :  { %v5291_v5 = vpop.f32.mrf.mxu3 }
 0x27d   :  { %v591_v6 = vpop.f32.mrf.mxu2 }
 0x283   :  { %v507_v8 = vpop.f32.mrf.mxu3 }
 0x285   :  { %v593_v9 = vpop.f32.mrf.mxu2 }
 0x286   :  { %v601_v11 = vpack.c.bf16 %v593_v9, %v591_v6 }
 0x288   :  { %3533 = vmatmul.msk.bf16.vlgmr.msrb.gmra.mxu3 %vm334_vm2, %v601_v11 }
 0x289   :  { %918 = vmatpush.bf16.msrb.mxu3 %v5139_v42 }
 0x28b   :  { %v509_v12 = vpop.f32.mrf.mxu3 }
 0x28c   :  { %v517_v13 = vpack.c.bf16 %v509_v12, %v507_v8 }
 0x28d   :  { %919 = vmatpush.bf16.msrb.mxu3 %v5143_v47  ;;  %v596_v14 = vpop.f32.mrf.mxu2 }
 0x28e   :  { %3507 = vmatmul.msk.bf16.vlgmr.msra.gmra.mxu1 %vm334_vm2, %v517_v13 }
 0x28f   :  { %834 = vmatpush.bf16.msra.mxu1 %v5139_v42  ;;  %v4773_v42 = vld [vmem:[%s6644_s3 + $0x60] sm:$0xff] }
 0x291   :  { %920 = vmatpush.bf16.msrb.mxu3 %v5147_v52 }
 0x293   :  { %835 = vmatpush.bf16.msra.mxu1 %v5143_v47  ;;  %v512_v15 = vpop.f32.mrf.mxu3  ;;  %v4769_v47 = vld [vmem:[%s6644_s3 + $0x50] sm:$0xff] }
 0x295   :  { %921 = vmatpush.bf16.msrb.mxu3 %v5151_v57  ;;  %v598_v16 = vpop.f32.mrf.mxu2 }
 0x296   :  { %v602_v17 = vpack.c.bf16 %v598_v16, %v596_v14 }
 0x297   :  { %836 = vmatpush.bf16.msra.mxu1 %v5147_v52  ;;  %v4774_v52 = vld [vmem:[%s6644_s3 + $0x68] sm:$0xff] }
 0x298   :  { %3534 = vmatmul.msk.bf16.gmra.mxu3 %vm334_vm2, %v602_v17 }
 0x299   :  { %922 = vmatpush.bf16.msrb.mxu3 %v5155_v62 }
 0x29b   :  { %837 = vmatpush.bf16.msra.mxu1 %v5151_v57  ;;  %v514_v18 = vpop.f32.mrf.mxu3  ;;  %v4776_v57 = vld [vmem:[%s6645_s4 + $0x68] sm:$0xff] }
 0x29c   :  { %v518_v19 = vpack.c.bf16 %v514_v18, %v512_v15  ;;  %800 = vmatpush.bf16.msrb.mxu0 %v4776_v57 }
 0x29d   :  { %923 = vmatpush.bf16.msrb.mxu3 %v5159_v3 }
 0x29e   :  { %3508 = vmatmul.msk.bf16.gmra.mxu1 %vm334_vm2, %v518_v19 }
 0x29f   :  { %838 = vmatpush.bf16.msra.mxu1 %v5155_v62  ;;  %v4770_v62 = vld [vmem:[%s6644_s3 + $0x58] sm:$0xff] }
 0x2a0   :  { %801 = vmatpush.bf16.msrb.mxu0 %v4775_v21 }
 0x2a1   :  { %924 = vmatpush.bf16.msrb.mxu3 %v5163_v7 }
 0x2a3   :  { %839 = vmatpush.bf16.msra.mxu1 %v5159_v3  ;;  %v4781_v3 = vld [vmem:[%s6644_s3 + $0x80] sm:$0xff] }
 0x2a4   :  { %968 = vmatpush.bf16.msra.mxu0 %v4784_v39 }
 0x2a5   :  { %925 = vmatpush.bf16.msrb.mxu3 %v5170_v10 }
 0x2a7   :  { %840 = vmatpush.bf16.msra.mxu1 %v5163_v7  ;;  %v4777_v7 = vld [vmem:[%s6644_s3 + $0x70] sm:$0xff] }
 0x2a8   :  { %758 = vmatmul.bf16.vlgmr.msra.gmra.mxu3 %v4773_v42  ;;  %969 = vmatpush.bf16.msra.mxu0 %v4783_v41 }
 0x2ab   :  { %841 = vmatpush.bf16.msra.mxu1 %v5170_v10  ;;  %v4782_v10 = vld [vmem:[%s6644_s3 + $0x88] sm:$0xff] }
 0x2ae   :  { %674 = vmatmul.bf16.vlgmr.msrb.gmra.mxu1 %v4769_v47 }
 0x2b8   :  { %763 = vmatmul.bf16.gmra.mxu3 %v4774_v52 }
 0x2be   :  { %679 = vmatmul.bf16.gmra.mxu1 %v4770_v62  ;;  %v390_v62 = vadd.f32 %v5285_v61, %v5277_v51 }
 0x2c8   :  { %926 = vmatmul.bf16.vlgmr.msrb.gmra.mxu3 %v4781_v3 }
 0x2ce   :  { %842 = vmatmul.bf16.vlgmr.msra.gmra.mxu1 %v4777_v7  ;;  %v395_v7 = vadd.f32 %v5291_v5, %v5279_v54 }
 0x2d8   :  { %931 = vmatmul.bf16.gmra.mxu3 %v4782_v10  ;;  %v478_v10 = vadd.f32 %v5281_v59, %v390_v62  ;;  %v4800_v62 = vld [vmem:[%s6648_s7 + $0x68] sm:$0xf0] }
 0x2de   :  { %847 = vmatmul.bf16.gmra.mxu1 %v4778_v20 }
 0x30b   :  { %v551_v22 = vpop.f32.mrf.mxu1  ;;  %v635_v23 = vpop.f32.mrf.mxu3 }
 0x30c   :  { %v561_v25 = vadd.f32 %v551_v22, %v5283_v60  ;;  %v480_v22 = vadd.f32 %v5287_v2, %v395_v7  ;;  %v4817_v7 = vld [vmem:[%s6648_s7 + $0xe0] sm:$0xf0] }
 0x30e   :  { %v5347_v26 = vadd.f32 %v635_v23, %v561_v25 }
 0x313   :  { %v5352_v28 = vpop.f32.mrf.mxu1  ;;  %v5354_v29 = vpop.f32.mrf.mxu3 }
 0x314   :  { %v562_v21 = vadd.f32 %v5352_v28, %v478_v10  ;;  %v4816_v10 = vld [vmem:[%s6648_s7 + $0xdc] sm:$0xf] }
 0x316   :  { %v646_v23 = vadd.f32 %v5354_v29, %v562_v21 }
 0x31b   :  { %v556_v30 = vpop.f32.mrf.mxu1  ;;  %v640_v31 = vpop.f32.mrf.mxu3 }
 0x31c   :  { %v563_v32 = vadd.f32 %v556_v30, %v5289_v4 }
 0x31e   :  { %v647_v33 = vadd.f32 %v640_v31, %v563_v32 }
 0x323   :  { %v558_v34 = vpop.f32.mrf.mxu1  ;;  %v5357_v35 = vpop.f32.mrf.mxu3 }
 0x324   :  { %v564_v24 = vadd.f32 %v558_v34, %v480_v22  ;;  %v3733_v22 = vld [vmem:[%s6648_s7 + $0xe0] sm:$0xf] }
 0x326   :  { %v648_v61 = vadd.f32 %v5357_v35, %v564_v24  ;;  %v4818_v24 = vld [vmem:[%s6648_s7 + $0xe8] sm:$0xf0] }
 0x32b   :  { %v675_v36 = vpop.f32.mrf.mxu1  ;;  %v759_v37 = vpop.f32.mrf.mxu3 }
 0x333   :  { %v677_v43 = vpop.f32.mrf.mxu1  ;;  %v761_v44 = vpop.f32.mrf.mxu3 }
 0x334   :  { %v685_v45 = vpack.c.bf16 %v677_v43, %v675_v36  ;;  %v769_v46 = vpack.c.bf16 %v761_v44, %v759_v37 }
 0x336   :  { %3559 = vmatmul.msk.bf16.vlgmr.msrb.gmra.mxu2 %vm334_vm2, %v685_v45  ;;  %3585 = vmatmul.msk.bf16.vlgmr.msrb.gmra.mxu0 %vm334_vm2, %v769_v46 }
 0x33b   :  { %v680_v48 = vpop.f32.mrf.mxu1  ;;  %v764_v49 = vpop.f32.mrf.mxu3 }
 0x343   :  { %v682_v50 = vpop.f32.mrf.mxu1  ;;  %v766_v53 = vpop.f32.mrf.mxu3 }
 0x344   :  { %v686_v55 = vpack.c.bf16 %v682_v50, %v680_v48  ;;  %v770_v56 = vpack.c.bf16 %v766_v53, %v764_v49  ;;  %v3757_v49 = vld [vmem:[%s6648_s7 + $0x110] sm:$0xf]  ;;  %v4824_v50 = vld [vmem:[%s6648_s7 + $0x118] sm:$0xf0] }
 0x346   :  { %3560 = vmatmul.msk.bf16.gmra.mxu2 %vm334_vm2, %v686_v55  ;;  %3586 = vmatmul.msk.bf16.gmra.mxu0 %vm334_vm2, %v770_v56 }
 0x34b   :  { %v843_v58 = vpop.f32.mrf.mxu1  ;;  %v927_v60 = vpop.f32.mrf.mxu3 }
 0x353   :  { %v845_v63 = vpop.f32.mrf.mxu1  ;;  %v929_v0 = vpop.f32.mrf.mxu3 }
 0x354   :  { %v853_v1 = vpack.c.bf16 %v845_v63, %v843_v58  ;;  %v937_v4 = vpack.c.bf16 %v929_v0, %v927_v60  ;;  %v3749_v58 = vld [vmem:[%s6648_s7 + $0x108] sm:$0xf]  ;;  %v4823_v60 = vld [vmem:[%s6648_s7 + $0x110] sm:$0xf0]  ;;  %v4822_v0 = vld [vmem:[%s6648_s7 + $0x10c] sm:$0xf] }
 0x355   :  { %v3750_v63 = vor.u32 %v4823_v60, %v3749_v58  ;;  %v4791_v58 = vld [vmem:[%s6648_s7 + $0x20] sm:$0xf0] }
 0x356   :  { %3611 = vmatmul.msk.bf16.vlgmr.msra.gmra.mxu2 %vm334_vm2, %v853_v1  ;;  %3637 = vmatmul.msk.bf16.vlgmr.msra.gmra.mxu0 %vm334_vm2, %v937_v4  ;;  %v3751_v1 = vld [vmem:[%s6648_s7 + $0x114] sm:$0xf0] }
 0x357   :  { %v3827_v4 = vld [vmem:[%s6648_s7 + $0x78] sm:$0xf]  ;;  %1236 = vmatpush.bf16.msra.mxu3 %v3750_v63 }
 0x35b   :  { %v848_v6 = vpop.f32.mrf.mxu1  ;;  %v932_v8 = vpop.f32.mrf.mxu3 }
 0x363   :  { %v850_v9 = vpop.f32.mrf.mxu1  ;;  %v934_v11 = vpop.f32.mrf.mxu3 }
 0x364   :  { %v854_v12 = vpack.c.bf16 %v850_v9, %v848_v6  ;;  %v938_v13 = vpack.c.bf16 %v934_v11, %v932_v8  ;;  %v3745_v6 = vld [vmem:[%s6648_s7 + $0xf8] sm:$0xf]  ;;  %v4821_v8 = vld [vmem:[%s6648_s7 + $0x100] sm:$0xf0]  ;;  %v3754_v9 = vor.u32 %v4822_v0, %v3751_v1  ;;  %v3689_v0 = vld [vmem:[%s6648_s7 + $0x90] sm:$0xf] }
 0x365   :  { %v4803_v11 = vld [vmem:[%s6648_s7 + $0x80] sm:$0xf0]  ;;  %v3746_v21 = vor.u32 %v4821_v8, %v3745_v6  ;;  %v4808_v1 = vld [vmem:[%s6648_s7 + $0x98] sm:$0xf0]  ;;  %v3691_v8 = vld [vmem:[%s6648_s7 + $0x9c] sm:$0xf0] }
 0x366   :  { %3612 = vmatmul.msk.bf16.gmra.mxu2 %vm334_vm2, %v854_v12  ;;  %3638 = vmatmul.msk.bf16.gmra.mxu0 %vm334_vm2, %v938_v13  ;;  %v3737_v12 = vld [vmem:[%s6648_s7 + $0xf0] sm:$0xf]  ;;  %v4820_v13 = vld [vmem:[%s6648_s7 + $0xf8] sm:$0xf0]  ;;  %v3690_v6 = vor.u32 %v4808_v1, %v3689_v0  ;;  %v4866_v0 = vld [vmem:[%s6647_s6 + $0x48] sm:$0xff] }
 0x367   :  { %1252 = vmatpush.bf16.msrb.mxu0 %v3754_v9  ;;  %v3767_v9 = vld [vmem:[%s6648_s7] sm:$0xf]  ;;  %v3943_v1 = vld [vmem:[%s6648_s7 + $0x198] sm:$0xf] }
 0x3b3   :  { %v803_v14 = vpop.f32.mrf.mxu0 }
 0x3b9   :  { %v719_v15 = vpop.f32.mrf.mxu2 }
 0x3ba   :  { %v729_v27 = vadd.f32 %v719_v15, %v5347_v26  ;;  %v4990_v26 = vld [vmem:[%s6646_s5] ss:$0 sm:$0xff]  ;;  %v4805_v15 = vld [vmem:[%s6647_s6 + $0x10] sm:$0xff] }
 0x3bb   :  { %v805_v16 = vpop.f32.mrf.mxu0 }
 0x3bc   :  { %v813_v5 = vadd.f32 %v803_v14, %v729_v27  ;;  %v3758_v14 = vor.u32 %v4824_v50, %v3757_v49  ;;  %v4810_v49 = vld [vmem:[%s6648_s7 + $0xac] sm:$0xf] }
 0x3c1   :  { %v721_v17 = vpop.f32.mrf.mxu2 }
 0x3c2   :  { %v730_v30 = vadd.f32 %v721_v17, %v646_v23  ;;  %v3828_v17 = vor.u32 %v4803_v11, %v3827_v4  ;;  %v4807_v4 = vld [vmem:[%s6648_s7 + $0x94] sm:$0xf]  ;;  %v4788_v11 = vld [vmem:[%s6648_s7 + $0x8] sm:$0xf0] }
 0x3c3   :  { %v808_v18 = vpop.f32.mrf.mxu0 }
 0x3c4   :  { %v814_v59 = vadd.f32 %v805_v16, %v730_v30  ;;  %v4785_v16 = vld [vmem:[%s6647_s6] sm:$0xff]  ;;  %v3803_v30 = vld [vmem:[%s6648_s7 + $0x48] sm:$0xf] }
 0x3c9   :  { %v724_v19 = vpop.f32.mrf.mxu2 }
 0x3ca   :  { %v731_v25 = vadd.f32 %v724_v19, %v647_v33  ;;  %v3739_v19 = vld [vmem:[%s6648_s7 + $0xfc] sm:$0xf0] }
 0x3cb   :  { %v810_v42 = vpop.f32.mrf.mxu0 }
 0x3cc   :  { %v815_v32 = vadd.f32 %v808_v18, %v731_v25  ;;  %v4819_v18 = vld [vmem:[%s6648_s7 + $0xf4] sm:$0xf] }
 0x3d1   :  { %v726_v47 = vpop.f32.mrf.mxu2 }
 0x3d2   :  { %v732_v54 = vadd.f32 %v726_v47, %v648_v61  ;;  %v3738_v47 = vor.u32 %v4820_v13, %v3737_v12  ;;  %v3694_v12 = vor.u32 %v4807_v4, %v3691_v8  ;;  %v3768_v13 = vor.u32 %v4788_v11, %v3767_v9  ;;  %v4843_v4 = vld [vmem:[%s6648_s7 + $0x1a0] sm:$0xf0]  ;;  %v3945_v9 = vld [vmem:[%s6648_s7 + $0x1a4] sm:$0xf0]  ;;  %v3951_v11 = vld [vmem:[%s6648_s7 + $0x1a0] sm:$0xf] }
 0x3d3   :  { %v971_v52 = vpop.f32.mrf.mxu0  ;;  %v3944_v8 = vor.u32 %v4843_v4, %v3943_v1 }
 0x3d4   :  { %v816_v2 = vadd.f32 %v810_v42, %v732_v54  ;;  %1237 = vmatpush.bf16.msra.mxu3 %v3738_v47  ;;  %v4815_v54 = vld [vmem:[%s6648_s7 + $0xd0] sm:$0xf0]  ;;  %v4799_v47 = vld [vmem:[%s6648_s7 + $0x64] sm:$0xf] }
 0x3d9   :  { %v887_v57 = vpop.f32.mrf.mxu2 }
 0x3da   :  { %v897_v37 = vadd.f32 %v887_v57, %v813_v5  ;;  %v3815_v57 = vld [vmem:[%s6648_s7 + $0x60] sm:$0xf] }
 0x3db   :  { %v973_v3 = vpop.f32.mrf.mxu0  ;;  %v3816_v23 = vor.u32 %v4800_v62, %v3815_v57  ;;  %v3823_v57 = vld [vmem:[%s6648_s7 + $0x68] sm:$0xf] }
 0x3dc   :  { %v981_v29 = vadd.f32 %v971_v52, %v897_v37  ;;  %v3742_v52 = vor.u32 %v4819_v18, %v3739_v19  ;;  %v4804_v18 = vld [vmem:[%s6648_s7 + $0x88] sm:$0xf0] }
 0x3de   :  { %v989_v43 = vadd.f32 %v4990_v26, %v981_v29  ;;  %1253 = vmatpush.bf16.msrb.mxu0 %v3742_v52  ;;  %v3817_v52 = vld [vmem:[%s6648_s7 + $0x6c] sm:$0xf0] }
 0x3df   :  { %v3820_v62 = vor.u32 %v4799_v47, %v3817_v52  ;;  %v3939_v47 = vld [vmem:[%s6648_s7 + $0x188] sm:$0xf]  ;;  %v4841_v52 = vld [vmem:[%s6648_s7 + $0x190] sm:$0xf0] }
 0x3e0   :  { %v993_v53 = vmax.f32 %v989_v43, 0.0  ;;  %v4794_v43 = vld [vmem:[%s6648_s7 + $0x38] sm:$0xf0] }
 0x3e1   :  { %v889_v20 = vpop.f32.mrf.mxu2 }
 0x3e2   :  { %v898_v28 = vadd.f32 %v889_v20, %v814_v59  ;;  %v3727_v20 = vld [vmem:[%s6648_s7 + $0xe4] sm:$0xf0]  ;;  %v3709_v59 = vld [vmem:[%s6648_s7 + $0xb0] sm:$0xf] }
 0x3e3   :  { %v976_v31 = vpop.f32.mrf.mxu0  ;;  %v3730_v27 = vor.u32 %v4816_v10, %v3727_v20  ;;  %v4796_v20 = vld [vmem:[%s6648_s7 + $0x4c] sm:$0xf] }
 0x3e4   :  { %v982_v33 = vadd.f32 %v973_v3, %v898_v28  ;;  %v3725_v3 = vld [vmem:[%s6648_s7 + $0xd8] sm:$0xf] }
 0x3e5   :  { %v3726_v25 = vor.u32 %v4817_v7, %v3725_v3  ;;  %1254 = vmatpush.bf16.msrb.mxu0 %v3730_v27  ;;  %v3697_v28 = vld [vmem:[%s6648_s7 + $0x98] sm:$0xf]  ;;  %v4801_v3 = vld [vmem:[%s6648_s7 + $0x70] sm:$0xf0]  ;;  %v3793_v27 = vld [vmem:[%s6648_s7 + $0x3c] sm:$0xf0] }
 0x3e6   :  { %v990_v44 = vadd.f32 %v4990_v26, %v982_v33  ;;  %v4814_v33 = vld [vmem:[%s6648_s7 + $0xc8] sm:$0xf0]  ;;  %v3824_v7 = vor.u32 %v4801_v3, %v3823_v57  ;;  %v3919_v3 = vld [vmem:[%s6648_s7 + $0x168] sm:$0xf] }
 0x3e7   :  { %1238 = vmatpush.bf16.msra.mxu3 %v3726_v25  ;;  %v4793_v25 = vld [vmem:[%s6648_s7 + $0x34] sm:$0xf] }
 0x3e8   :  { %v994_v55 = vmax.f32 %v990_v44, 0.0 }
 0x3e9   :  { %v892_v51 = vpop.f32.mrf.mxu2 }
 0x3ea   :  { %v899_v36 = vadd.f32 %v892_v51, %v815_v32  ;;  %v5444_v42 = vpack.c.bf16 %v994_v55, %v993_v53  ;;  %v3734_v51 = vor.u32 %v4818_v24, %v3733_v22  ;;  %v3721_v32 = vld [vmem:[%s6648_s7 + $0xc8] sm:$0xf]  ;;  %v3703_v53 = vld [vmem:[%s6648_s7 + $0xb4] sm:$0xf0]  ;;  %v3811_v22 = vld [vmem:[%s6648_s7 + $0x50] sm:$0xf] }
 0x3eb   :  { %v978_v40 = vpop.f32.mrf.mxu0  ;;  %v3722_v5 = vor.u32 %v4815_v54, %v3721_v32  ;;  %v3779_v55 = vld [vmem:[%s6648_s7 + $0x18] sm:$0xf]  ;;  %v3706_v60 = vor.u32 %v4810_v49, %v3703_v53  ;;  %v4798_v24 = vld [vmem:[%s6648_s7 + $0x58] sm:$0xf0]  ;;  %v4825_v53 = vld [vmem:[%s6647_s6 + $0x20] sm:$0xff] }
 0x3ec   :  { %v983_v38 = vadd.f32 %v976_v31, %v899_v36  ;;  %v4797_v31 = vld [vmem:[%s6648_s7 + $0x50] sm:$0xf0]  ;;  %v4812_v36 = vld [vmem:[%s6648_s7 + $0xb8] sm:$0xf0]  ;;  %v3780_v63 = vor.u32 %v4791_v58, %v3779_v55  ;;  %v4826_v55 = vld [vmem:[%s6647_s6 + $0x28] sm:$0xff] }
 0x3ed   :  { %v3804_v61 = vor.u32 %v4797_v31, %v3803_v30  ;;  %v3710_v37 = vor.u32 %v4812_v36, %v3709_v59  ;;  %v3812_v30 = vor.u32 %v4798_v24, %v3811_v22  ;;  %v3799_v31 = vld [vmem:[%s6648_s7 + $0x38] sm:$0xf]  ;;  %v4790_v54 = vld [vmem:[%s6648_s7 + $0x1c] sm:$0xf]  ;;  %v3787_v36 = vld [vmem:[%s6648_s7 + $0x20] sm:$0xf] }
 0x3ee   :  { %v991_v41 = vadd.f32 %v4990_v26, %v983_v38  ;;  %v4809_v38 = vld [vmem:[%s6648_s7 + $0xa0] sm:$0xf0]  ;;  %v4845_v58 = vld [vmem:[%s6647_s6 + $0x30] sm:$0xff] }
 0x3ef   :  { %v3698_v29 = vor.u32 %v4809_v38, %v3697_v28  ;;  %v3927_v22 = vld [vmem:[%s6648_s7 + $0x170] sm:$0xf] }
 0x3f0   :  { %v995_v46 = vmax.f32 %v991_v41, 0.0  ;;  %v3715_v41 = vld [vmem:[%s6648_s7 + $0xcc] sm:$0xf0] }
 0x3f1   :  { %v894_v39 = vpop.f32.mrf.mxu2 }
 0x3f2   :  { %v900_v34 = vadd.f32 %v894_v39, %v816_v2  ;;  %v4806_v2 = vld [vmem:[%s6647_s6 + $0x18] sm:$0xff]  ;;  %v4786_v39 = vld [vmem:[%s6647_s6 + $0x8] sm:$0xff] }
 0x3f4   :  { %v984_v35 = vadd.f32 %v978_v40, %v900_v34  ;;  %v4813_v34 = vld [vmem:[%s6648_s7 + $0xc4] sm:$0xf] }
 0x3f5   :  { %v3718_v44 = vor.u32 %v4813_v34, %v3715_v41  ;;  %v4789_v34 = vld [vmem:[%s6648_s7 + $0x10] sm:$0xf0] }
 0x3f6   :  { %v992_v45 = vadd.f32 %v4990_v26, %v984_v35  ;;  %v3713_v26 = vld [vmem:[%s6648_s7 + $0xc0] sm:$0xf]  ;;  %v3791_v35 = vld [vmem:[%s6648_s7 + $0x30] sm:$0xf] }
 0x3f7   :  { %v3714_v40 = vor.u32 %v4814_v33, %v3713_v26  ;;  %1255 = vmatpush.bf16.msrb.mxu0 %v3718_v44  ;;  %v3769_v26 = vld [vmem:[%s6648_s7 + $0xc] sm:$0xf0]  ;;  %v3775_v33 = vld [vmem:[%s6648_s7 + $0x8] sm:$0xf] }
 0x3f8   :  { %v996_v48 = vmax.f32 %v992_v45, 0.0  ;;  %v3792_v45 = vor.u32 %v4794_v43, %v3791_v35  ;;  %v3776_v35 = vor.u32 %v4789_v34, %v3775_v33  ;;  %v3897_v33 = vld [vmem:[%s6648_s7 + $0x144] sm:$0xf0]  ;;  %v3903_v34 = vld [vmem:[%s6648_s7 + $0x140] sm:$0xf] }
 0x3f9   :  { %1239 = vmatpush.bf16.msra.mxu3 %v3714_v40 }
 0x3fa   :  { %v5398_v56 = vpack.c.bf16 %v996_v48, %v995_v46  ;;  %v3701_v46 = vld [vmem:[%s6648_s7 + $0xa8] sm:$0xf]  ;;  %v4811_v48 = vld [vmem:[%s6648_s7 + $0xb0] sm:$0xf0] }
 0x3fb   :  { %v3702_v50 = vor.u32 %v4811_v48, %v3701_v46  ;;  %1256 = vmatpush.bf16.msrb.mxu0 %v3706_v60  ;;  %v4846_v60 = vld [vmem:[%s6647_s6 + $0x38] sm:$0xff] }
 0x3fc   :  { %1025 = vmatpush.bf16.msrb.mxu1 %v5398_v56  ;;  %1091 = vmatpush.bf16.msrb.mxu2 %v5398_v56 }
 0x3fd   :  { %1240 = vmatpush.bf16.msra.mxu3 %v3702_v50 }
 0x3ff   :  { %1257 = vmatpush.bf16.msrb.mxu0 %v3694_v12  ;;  %v4844_v12 = vld [vmem:[%s6648_s7 + $0x1a8] sm:$0xf0] }
 0x400   :  { %1026 = vmatpush.bf16.msrb.mxu1 %v5444_v42  ;;  %1092 = vmatpush.bf16.msrb.mxu2 %v5444_v42 }
 0x401   :  { %1241 = vmatpush.bf16.msra.mxu3 %v3690_v6  ;;  %v4842_v6 = vld [vmem:[%s6648_s7 + $0x19c] sm:$0xf] }
 0x403   :  { %3661 = vmatmul.msk.bf16.vlgmr.msrb.gmra.mxu2 %vm334_vm2, %v4805_v15  ;;  %3647 = vmatmul.msk.bf16.vlgmr.msrb.gmra.mxu1 %vm334_vm2, %v4785_v16  ;;  %v3829_v15 = vld [vmem:[%s6648_s7 + $0x84] sm:$0xf0]  ;;  %v3835_v16 = vld [vmem:[%s6648_s7 + $0x80] sm:$0xf] }
 0x404   :  { %1268 = vmatpush.bf16.msra.mxu1 %v3758_v14  ;;  %1389 = vmatpush.bf16.msra.mxu2 %v3828_v17  ;;  %v4802_v14 = vld [vmem:[%s6648_s7 + $0x7c] sm:$0xf]  ;;  %v3836_v19 = vor.u32 %v4804_v18, %v3835_v16  ;;  %v4840_v16 = vld [vmem:[%s6648_s7 + $0x188] sm:$0xf0] }
 0x405   :  { %v3832_v17 = vor.u32 %v4802_v14, %v3829_v15  ;;  %v3952_v14 = vor.u32 %v4844_v12, %v3951_v11  ;;  %v3931_v15 = vld [vmem:[%s6648_s7 + $0x180] sm:$0xf]  ;;  %v4059_v11 = vld [vmem:[%s6648_s7 + $0x228] sm:$0xf]  ;;  %v4863_v12 = vld [vmem:[%s6648_s7 + $0x230] sm:$0xf0] }
 0x406   :  { %1421 = vmatpush.bf16.msra.mxu0 %v3836_v19  ;;  %v3932_v18 = vor.u32 %v4840_v16, %v3931_v15  ;;  %v3933_v19 = vld [vmem:[%s6648_s7 + $0x18c] sm:$0xf0]  ;;  %v4061_v15 = vld [vmem:[%s6648_s7 + $0x234] sm:$0xf0] }
 0x407   :  { %1405 = vmatpush.bf16.msrb.mxu3 %v3832_v17  ;;  %v4839_v17 = vld [vmem:[%s6648_s7 + $0x184] sm:$0xf]  ;;  %v4067_v16 = vld [vmem:[%s6648_s7 + $0x230] sm:$0xf] }
 0x408   :  { %1269 = vmatpush.bf16.msra.mxu1 %v3746_v21  ;;  %1390 = vmatpush.bf16.msra.mxu2 %v3816_v23  ;;  %v3805_v21 = vld [vmem:[%s6648_s7 + $0x54] sm:$0xf0]  ;;  %v3936_v57 = vor.u32 %v4839_v17, %v3933_v19  ;;  %v4864_v17 = vld [vmem:[%s6648_s7 + $0x238] sm:$0xf0] }
 0x409   :  { %v3808_v23 = vor.u32 %v4796_v20, %v3805_v21  ;;  %v3921_v21 = vld [vmem:[%s6648_s7 + $0x174] sm:$0xf0]  ;;  %v4068_v19 = vor.u32 %v4864_v17, %v4067_v16 }
 0x40a   :  { %1422 = vmatpush.bf16.msra.mxu0 %v3824_v7  ;;  %v4837_v7 = vld [vmem:[%s6648_s7 + $0x170] sm:$0xf0] }
 0x40b   :  { %1406 = vmatpush.bf16.msrb.mxu3 %v3820_v62  ;;  %v3940_v62 = vor.u32 %v4841_v52, %v3939_v47  ;;  %v3920_v20 = vor.u32 %v4837_v7, %v3919_v3  ;;  %v4047_v52 = vld [vmem:[%s6648_s7 + $0x210] sm:$0xf] }
 0x40c   :  { %1270 = vmatpush.bf16.msra.mxu1 %v3734_v51  ;;  %1391 = vmatpush.bf16.msra.mxu2 %v3804_v61  ;;  %v4795_v51 = vld [vmem:[%s6648_s7 + $0x40] sm:$0xf0]  ;;  %v3796_v61 = vor.u32 %v4793_v25, %v3793_v27  ;;  %v4885_v27 = vld [vmem:[%s6647_s6 + $0x50] sm:$0xff] }
 0x40d   :  { %v3800_v32 = vor.u32 %v4795_v51, %v3799_v31  ;;  %v4834_v31 = vld [vmem:[%s6648_s7 + $0x158] sm:$0xf0]  ;;  %v4833_v51 = vld [vmem:[%s6648_s7 + $0x154] sm:$0xf] }
 0x40e   :  { %1423 = vmatpush.bf16.msra.mxu0 %v3812_v30  ;;  %v3907_v30 = vld [vmem:[%s6648_s7 + $0x150] sm:$0xf] }
 0x40f   :  { %1407 = vmatpush.bf16.msrb.mxu3 %v3808_v23  ;;  %v4838_v23 = vld [vmem:[%s6648_s7 + $0x178] sm:$0xf0] }
 0x410   :  { %1271 = vmatpush.bf16.msra.mxu1 %v3722_v5  ;;  %1392 = vmatpush.bf16.msra.mxu2 %v3792_v45  ;;  %v3781_v5 = vld [vmem:[%s6648_s7 + $0x24] sm:$0xf0]  ;;  %v3928_v25 = vor.u32 %v4838_v23, %v3927_v22  ;;  %v4861_v22 = vld [vmem:[%s6648_s7 + $0x220] sm:$0xf0] }
 0x411   :  { %v3784_v38 = vor.u32 %v4790_v54, %v3781_v5  ;;  %v3908_v54 = vor.u32 %v4834_v31, %v3907_v30  ;;  %v3909_v5 = vld [vmem:[%s6648_s7 + $0x15c] sm:$0xf0]  ;;  %v4857_v30 = vld [vmem:[%s6648_s7 + $0x200] sm:$0xf0]  ;;  %v4856_v31 = vld [vmem:[%s6648_s7 + $0x1fc] sm:$0xf] }
 0x412   :  { %1424 = vmatpush.bf16.msra.mxu0 %v3800_v32 }
 0x413   :  { %3662 = vmatmul.msk.bf16.gmra.mxu2 %vm334_vm2, %v4806_v2  ;;  %3648 = vmatmul.msk.bf16.gmra.mxu1 %vm334_vm2, %v4786_v39 }
 0x414   :  { %1272 = vmatpush.bf16.msra.mxu1 %v3710_v37  ;;  %1393 = vmatpush.bf16.msra.mxu2 %v3780_v63  ;;  %v4792_v37 = vld [vmem:[%s6648_s7 + $0x28] sm:$0xf0]  ;;  %v4865_v63 = vld [vmem:[%s6647_s6 + $0x40] sm:$0xff] }
 0x415   :  { %1408 = vmatpush.bf16.msrb.mxu3 %v3796_v61  ;;  %v3788_v39 = vor.u32 %v4792_v37, %v3787_v36  ;;  %v4835_v36 = vld [vmem:[%s6648_s7 + $0x160] sm:$0xf0] }
 0x417   :  { %1425 = vmatpush.bf16.msra.mxu0 %v3788_v39  ;;  %v4831_v39 = vld [vmem:[%s6648_s7 + $0x140] sm:$0xf0] }
 0x418   :  { %1273 = vmatpush.bf16.msra.mxu1 %v3698_v29  ;;  %1394 = vmatpush.bf16.msra.mxu2 %v3768_v13  ;;  %v4787_v29 = vld [vmem:[%s6648_s7 + $0x4] sm:$0xf]  ;;  %v3948_v13 = vor.u32 %v4842_v6, %v3945_v9 }
 0x419   :  { %1409 = vmatpush.bf16.msrb.mxu3 %v3784_v38  ;;  %v3772_v40 = vor.u32 %v4787_v29, %v3769_v26  ;;  %v4830_v29 = vld [vmem:[%s6648_s7 + $0x13c] sm:$0xf] }
 0x41b   :  { %1426 = vmatpush.bf16.msra.mxu0 %v3776_v35 }
 0x41c   :  { %1465 = vmatpush.bf16.msrb.mxu1 %v5398_v56  ;;  %1609 = vmatpush.bf16.msrb.mxu2 %v3944_v8  ;;  %v4886_v8 = vld [vmem:[%s6647_s6 + $0x58] sm:$0xff] }
 0x41d   :  { %1410 = vmatpush.bf16.msrb.mxu3 %v3772_v40  ;;  %v4832_v40 = vld [vmem:[%s6648_s7 + $0x148] sm:$0xf0] }
 0x41e   :  { %v3904_v35 = vor.u32 %v4832_v40, %v3903_v34  ;;  %v4025_v40 = vld [vmem:[%s6648_s7 + $0x1ec] sm:$0xf0] }
 0x420   :  { %1466 = vmatpush.bf16.msrb.mxu1 %v5444_v42  ;;  %1610 = vmatpush.bf16.msrb.mxu2 %v3932_v18 }
 0x424   :  { %1611 = vmatpush.bf16.msrb.mxu2 %v3920_v20  ;;  %v4049_v20 = vld [vmem:[%s6648_s7 + $0x21c] sm:$0xf0] }
 0x428   :  { %1612 = vmatpush.bf16.msrb.mxu2 %v3908_v54  ;;  %v4043_v54 = vld [vmem:[%s6648_s7 + $0x200] sm:$0xf] }
 0x480   :  { %v1028_v10 = vpop.f32.mrf.mxu1 }
 0x486   :  { %v1094_v59 = vpop.f32.mrf.mxu2 }
 0x488   :  { %v1030_v28 = vpop.f32.mrf.mxu1 }
 0x489   :  { %v1038_v2 = vpack.c.bf16 %v1030_v28, %v1028_v10  ;;  %v4836_v10 = vld [vmem:[%s6648_s7 + $0x16c] sm:$0xf]  ;;  %v3912_v28 = vor.u32 %v4833_v51, %v3909_v5 }
 0x48a   :  { %v3924_v24 = vor.u32 %v4836_v10, %v3921_v21  ;;  %v4055_v21 = vld [vmem:[%s6648_s7 + $0x218] sm:$0xf]  ;;  %v4858_v5 = vld [vmem:[%s6648_s7 + $0x208] sm:$0xf0] }
 0x48b   :  { %3837 = vmatmul.msk.bf16.vlgmr.msra.gmra.mxu2 %vm1227_vm3, %v1038_v2 }
 0x48e   :  { %v1096_v41 = vpop.f32.mrf.mxu2 }
 0x48f   :  { %v1104_v43 = vpack.c.bf16 %v1096_v41, %v1094_v59  ;;  %v3915_v59 = vld [vmem:[%s6648_s7 + $0x158] sm:$0xf]  ;;  %v3900_v41 = vor.u32 %v4830_v29, %v3897_v33  ;;  %v4853_v29 = vld [vmem:[%s6648_s7 + $0x1e4] sm:$0xf] }
 0x490   :  { %v1033_v45 = vpop.f32.mrf.mxu1  ;;  %v3916_v38 = vor.u32 %v4835_v36, %v3915_v59  ;;  %v4044_v36 = vor.u32 %v4858_v5, %v4043_v54  ;;  %v4165_v54 = vld [vmem:[%s6648_s7 + $0x2ac] sm:$0xf0]  ;;  %v4171_v5 = vld [vmem:[%s6648_s7 + $0x2a8] sm:$0xf] }
 0x491   :  { %3759 = vmatmul.msk.bf16.vlgmr.msra.gmra.mxu3 %vm1227_vm3, %v1104_v43  ;;  %3761 = vmatmul.msk.bf16.vlgmr.msrb.gmra.mxu0 %vm1227_vm3, %v1104_v43 }
 0x492   :  { %3763 = vmatmul.msk.bf16.vlgmr.msra.gmra.mxu1 %vm1227_vm3, %v1104_v43  ;;  %1625 = vmatpush.bf16.msra.mxu3 %v3948_v13  ;;  %v4862_v13 = vld [vmem:[%s6648_s7 + $0x22c] sm:$0xf] }
 0x493   :  { %1691 = vmatpush.bf16.msra.mxu1 %v5398_v56  ;;  %1641 = vmatpush.bf16.msrb.mxu0 %v3952_v14  ;;  %v4060_v14 = vor.u32 %v4863_v12, %v4059_v11  ;;  %v4064_v18 = vor.u32 %v4862_v13, %v4061_v15  ;;  %v4848_v11 = vld [vmem:[%s6648_s7 + $0x1b8] sm:$0xf0]  ;;  %v4849_v15 = vld [vmem:[%s6648_s7 + $0x1c0] sm:$0xf0] }
 0x496   :  { %v1099_v44 = vpop.f32.mrf.mxu2  ;;  %1626 = vmatpush.bf16.msra.mxu3 %v3936_v57  ;;  %v4860_v57 = vld [vmem:[%s6648_s7 + $0x218] sm:$0xf0] }
 0x497   :  { %1692 = vmatpush.bf16.msra.mxu1 %v5444_v42  ;;  %1642 = vmatpush.bf16.msrb.mxu0 %v3940_v62  ;;  %v4859_v62 = vld [vmem:[%s6648_s7 + $0x214] sm:$0xf]  ;;  %v4048_v10 = vor.u32 %v4860_v57, %v4047_v52  ;;  %v4906_v57 = vld [vmem:[%s6647_s6 + $0x68] sm:$0xff] }
 0x498   :  { %v1035_v49 = vpop.f32.mrf.mxu1 }
 0x499   :  { %v1039_v50 = vpack.c.bf16 %v1035_v49, %v1033_v45  ;;  %v3883_v45 = vld [vmem:[%s6648_s7 + $0x120] sm:$0xf] }
 0x49a   :  { %1627 = vmatpush.bf16.msra.mxu3 %v3924_v24  ;;  %v4052_v24 = vor.u32 %v4859_v62, %v4049_v20 }
 0x49b   :  { %3838 = vmatmul.msk.bf16.gmra.mxu2 %vm1227_vm3, %v1039_v50  ;;  %1643 = vmatpush.bf16.msrb.mxu0 %v3928_v25  ;;  %v4056_v25 = vor.u32 %v4861_v22, %v4055_v21  ;;  %v4183_v21 = vld [vmem:[%s6648_s7 + $0x2c0] sm:$0xf]  ;;  %v4884_v22 = vld [vmem:[%s6648_s7 + $0x2c8] sm:$0xf0] }
 0x49e   :  { %v1101_v46 = vpop.f32.mrf.mxu2  ;;  %1628 = vmatpush.bf16.msra.mxu3 %v3912_v28 }
 0x49f   :  { %v1105_v48 = vpack.c.bf16 %v1101_v46, %v1099_v44  ;;  %1644 = vmatpush.bf16.msrb.mxu0 %v3916_v38  ;;  %v4828_v46 = vld [vmem:[%s6648_s7 + $0x128] sm:$0xf0]  ;;  %v4905_v38 = vld [vmem:[%s6647_s6 + $0x60] sm:$0xff] }
 0x4a1   :  { %3760 = vmatmul.msk.bf16.gmra.mxu3 %vm1227_vm3, %v1105_v48  ;;  %3762 = vmatmul.msk.bf16.gmra.mxu0 %vm1227_vm3, %v1105_v48 }
 0x4a2   :  { %3764 = vmatmul.msk.bf16.gmra.mxu1 %vm1227_vm3, %v1105_v48  ;;  %1629 = vmatpush.bf16.msra.mxu3 %v3900_v41  ;;  %v4827_v48 = vld [vmem:[%s6648_s7 + $0x124] sm:$0xf]  ;;  %v4031_v41 = vld [vmem:[%s6648_s7 + $0x1e8] sm:$0xf] }
 0x4a3   :  { %1645 = vmatpush.bf16.msrb.mxu0 %v3904_v35  ;;  %v4855_v35 = vld [vmem:[%s6648_s7 + $0x1f0] sm:$0xf0] }
 0x4b1   :  { %3839 = vmatmul.msk.bf16.vlgmr.msrb.gmra.mxu3 %vm1227_vm3, %v1038_v2  ;;  %3841 = vmatmul.msk.bf16.vlgmr.msra.gmra.mxu0 %vm1227_vm3, %v1038_v2  ;;  %v3895_v2 = vld [vmem:[%s6648_s7 + $0x138] sm:$0xf] }
 0x4b2   :  { %3855 = vmatmul.msk.bf16.vlgmr.msrb.gmra.mxu1 %vm334_vm2, %v4825_v53  ;;  %v3896_v26 = vor.u32 %v4831_v39, %v3895_v2  ;;  %v3885_v53 = vld [vmem:[%s6648_s7 + $0x12c] sm:$0xf0]  ;;  %v4023_v2 = vld [vmem:[%s6648_s7 + $0x1e0] sm:$0xf]  ;;  %v4854_v39 = vld [vmem:[%s6648_s7 + $0x1e8] sm:$0xf0] }
 0x4b3   :  { %1917 = vmatpush.bf16.msrb.mxu1 %v5398_v56  ;;  %v4024_v34 = vor.u32 %v4854_v39, %v4023_v2  ;;  %v4151_v39 = vld [vmem:[%s6648_s7 + $0x288] sm:$0xf] }
 0x4b4   :  { %1613 = vmatpush.bf16.msrb.mxu2 %v3896_v26 }
 0x4b7   :  { %1918 = vmatpush.bf16.msrb.mxu1 %v5444_v42 }
 0x4c1   :  { %3842 = vmatmul.msk.bf16.gmra.mxu0 %vm1227_vm3, %v1039_v50  ;;  %3840 = vmatmul.msk.bf16.gmra.mxu3 %vm1227_vm3, %v1039_v50  ;;  %v3884_v50 = vor.u32 %v4828_v46, %v3883_v45  ;;  %v4028_v46 = vor.u32 %v4853_v29, %v4025_v40  ;;  %v4877_v29 = vld [vmem:[%s6648_s7 + $0x290] sm:$0xf0]  ;;  %v4159_v40 = vld [vmem:[%s6648_s7 + $0x290] sm:$0xf] }
 0x4c2   :  { %3856 = vmatmul.msk.bf16.gmra.mxu1 %vm334_vm2, %v4826_v55  ;;  %v3891_v55 = vld [vmem:[%s6648_s7 + $0x128] sm:$0xf] }
 0x4c3   :  { %1614 = vmatpush.bf16.msrb.mxu2 %v3884_v50  ;;  %v4851_v50 = vld [vmem:[%s6648_s7 + $0x1d0] sm:$0xf0] }
 0x4c7   :  { %1835 = vmatpush.bf16.msra.mxu2 %v4060_v14  ;;  %v4007_v14 = vld [vmem:[%s6648_s7 + $0x1b8] sm:$0xf] }
 0x4cb   :  { %1836 = vmatpush.bf16.msra.mxu2 %v4048_v10  ;;  %v4882_v10 = vld [vmem:[%s6648_s7 + $0x2bc] sm:$0xf] }
 0x4d2   :  { %3971 = vmatmul.msk.bf16.vlgmr.msra.gmra.mxu1 %vm334_vm2, %v4845_v58  ;;  %v4829_v58 = vld [vmem:[%s6648_s7 + $0x130] sm:$0xf0] }
 0x4d3   :  { %2143 = vmatpush.bf16.msra.mxu1 %v5398_v56  ;;  %v3892_v1 = vor.u32 %v4829_v58, %v3891_v55  ;;  %v4013_v55 = vld [vmem:[%s6648_s7 + $0x1d4] sm:$0xf0]  ;;  %v4019_v58 = vld [vmem:[%s6648_s7 + $0x1d0] sm:$0xf] }
 0x4d5   :  { %1646 = vmatpush.bf16.msrb.mxu0 %v3892_v1 }
 0x4d7   :  { %2144 = vmatpush.bf16.msra.mxu1 %v5444_v42 }
 0x4d9   :  { %1867 = vmatpush.bf16.msra.mxu0 %v4068_v19 }
 0x4dd   :  { %1868 = vmatpush.bf16.msra.mxu0 %v4056_v25  ;;  %v4184_v25 = vor.u32 %v4884_v22, %v4183_v21  ;;  %v4926_v21 = vld [vmem:[%s6647_s6 + $0x78] sm:$0xff] }
 0x4e1   :  { %1869 = vmatpush.bf16.msra.mxu0 %v4044_v36 }
 0x4e2   :  { %3972 = vmatmul.msk.bf16.gmra.mxu1 %vm334_vm2, %v4846_v60 }
 0x4f2   :  { %4087 = vmatmul.msk.bf16.vlgmr.msrb.gmra.mxu1 %vm334_vm2, %v4865_v63 }
 0x4f3   :  { %2369 = vmatpush.bf16.msrb.mxu1 %v5398_v56 }
 0x4f7   :  { %2370 = vmatpush.bf16.msrb.mxu1 %v5444_v42 }
 0x502   :  { %4088 = vmatmul.msk.bf16.gmra.mxu1 %vm334_vm2, %v4866_v0  ;;  %v3888_v0 = vor.u32 %v4827_v48, %v3885_v53  ;;  %v4032_v48 = vor.u32 %v4855_v35, %v4031_v41  ;;  %v4850_v53 = vld [vmem:[%s6648_s7 + $0x1cc] sm:$0xf]  ;;  %v4878_v41 = vld [vmem:[%s6648_s7 + $0x298] sm:$0xf0] }
 0x504   :  { %1630 = vmatpush.bf16.msra.mxu3 %v3888_v0  ;;  %1870 = vmatpush.bf16.msra.mxu0 %v4032_v48  ;;  %v4016_v0 = vor.u32 %v4850_v53, %v4013_v55  ;;  %v4873_v53 = vld [vmem:[%s6648_s7 + $0x274] sm:$0xf]  ;;  %v4141_v55 = vld [vmem:[%s6648_s7 + $0x27c] sm:$0xf0] }
 0x508   :  { %1851 = vmatpush.bf16.msrb.mxu3 %v4064_v18  ;;  %v4008_v18 = vor.u32 %v4849_v15, %v4007_v14  ;;  %v4135_v14 = vld [vmem:[%s6648_s7 + $0x260] sm:$0xf]  ;;  %v4872_v15 = vld [vmem:[%s6648_s7 + $0x268] sm:$0xf0] }
 0x50c   :  { %1852 = vmatpush.bf16.msrb.mxu3 %v4052_v24 }
 0x50e   :  { %v5744_v61 = vpop.f32.mrf.mxu0  ;;  %v1396_v32 = vpop.f32.mrf.mxu2 }
 0x50f   :  { %v5755_v37 = vpop.f32.mrf.mxu1 }
 0x512   :  { %4203 = vmatmul.msk.bf16.vlgmr.msra.gmra.mxu1 %vm334_vm2, %v4885_v27  ;;  %v4035_v27 = vld [vmem:[%s6648_s7 + $0x1f8] sm:$0xf] }
 0x513   :  { %2595 = vmatpush.bf16.msra.mxu1 %v5398_v56  ;;  %v4036_v51 = vor.u32 %v4857_v30, %v4035_v27  ;;  %v4163_v30 = vld [vmem:[%s6648_s7 + $0x2a0] sm:$0xf] }
 0x514   :  { %v1243_v43 = vpop.f32.mrf.mxu3 }
 0x515   :  { %v5777_v44 = vadd.f32 %v1396_v32, %v1243_v43  ;;  %v4037_v32 = vld [vmem:[%s6648_s7 + $0x204] sm:$0xf0]  ;;  %1837 = vmatpush.bf16.msra.mxu2 %v4036_v51  ;;  %v4879_v51 = vld [vmem:[%s6648_s7 + $0x2a4] sm:$0xf] }
 0x516   :  { %v1261_v49 = vpop.f32.mrf.mxu0  ;;  %v1398_v60 = vpop.f32.mrf.mxu2  ;;  %v4040_v59 = vor.u32 %v4856_v31, %v4037_v32  ;;  %v4880_v31 = vld [vmem:[%s6648_s7 + $0x2a8] sm:$0xf0] }
 0x517   :  { %2596 = vmatpush.bf16.msra.mxu1 %v5444_v42  ;;  %v5798_v63 = vpop.f32.mrf.mxu1  ;;  %v4011_v49 = vld [vmem:[%s6648_s7 + $0x1c8] sm:$0xf]  ;;  %v4852_v60 = vld [vmem:[%s6648_s7 + $0x1d8] sm:$0xf0]  ;;  %v4164_v32 = vor.u32 %v4880_v31, %v4163_v30  ;;  %v4293_v31 = vld [vmem:[%s6648_s7 + $0x354] sm:$0xf0] }
 0x518   :  { %1853 = vmatpush.bf16.msrb.mxu3 %v4040_v59  ;;  %v4020_v1 = vor.u32 %v4852_v60, %v4019_v58  ;;  %v4881_v59 = vld [vmem:[%s6648_s7 + $0x2b0] sm:$0xf0]  ;;  %v4147_v58 = vld [vmem:[%s6648_s7 + $0x278] sm:$0xf]  ;;  %v4875_v60 = vld [vmem:[%s6648_s7 + $0x280] sm:$0xf0] }
 0x519   :  { %1838 = vmatpush.bf16.msra.mxu2 %v4024_v34  ;;  %v4153_v34 = vld [vmem:[%s6648_s7 + $0x294] sm:$0xf0] }
 0x51a   :  { %1871 = vmatpush.bf16.msra.mxu0 %v4020_v1  ;;  %v4144_v1 = vor.u32 %v4873_v53, %v4141_v55  ;;  %v4945_v55 = vld [vmem:[%s6647_s6 + $0x80] sm:$0xff] }
 0x51c   :  { %v1245_v4 = vpop.f32.mrf.mxu3  ;;  %1854 = vmatpush.bf16.msrb.mxu3 %v4028_v46  ;;  %v4925_v46 = vld [vmem:[%s6647_s6 + $0x70] sm:$0xff] }
 0x51e   :  { %v1263_v6 = vpop.f32.mrf.mxu0  ;;  %v1400_v3 = vpop.f32.mrf.mxu2  ;;  %1872 = vmatpush.bf16.msra.mxu0 %v4008_v18  ;;  %v4115_v18 = vld [vmem:[%s6648_s7 + $0x240] sm:$0xf] }
 0x51f   :  { %v5803_v9 = vpop.f32.mrf.mxu1  ;;  %v4175_v3 = vld [vmem:[%s6648_s7 + $0x2b8] sm:$0xf] }
 0x520   :  { %1855 = vmatpush.bf16.msrb.mxu3 %v4016_v0 }
 0x522   :  { %4204 = vmatmul.msk.bf16.gmra.mxu1 %vm334_vm2, %v4886_v8  ;;  %v3999_v8 = vld [vmem:[%s6648_s7 + $0x1b0] sm:$0xf] }
 0x523   :  { %v4000_v13 = vor.u32 %v4848_v11, %v3999_v8  ;;  %v4127_v8 = vld [vmem:[%s6648_s7 + $0x258] sm:$0xf]  ;;  %v4871_v11 = vld [vmem:[%s6648_s7 + $0x260] sm:$0xf0] }
 0x524   :  { %v1247_v47 = vpop.f32.mrf.mxu3 }
 0x526   :  { %v1264_v7 = vpop.f32.mrf.mxu0  ;;  %v1401_v26 = vpop.f32.mrf.mxu2 }
 0x527   :  { %v5842_v23 = vpop.f32.mrf.mxu1  ;;  %v4883_v7 = vld [vmem:[%s6648_s7 + $0x2c0] sm:$0xf0]  ;;  %v4876_v26 = vld [vmem:[%s6648_s7 + $0x28c] sm:$0xf] }
 0x528   :  { %v4176_v20 = vor.u32 %v4883_v7, %v4175_v3  ;;  %v4156_v35 = vor.u32 %v4876_v26, %v4153_v34  ;;  %v4869_v3 = vld [vmem:[%s6648_s7 + $0x250] sm:$0xf0] }
 0x52c   :  { %v1248_v28 = vpop.f32.mrf.mxu3 }
 0x52d   :  { %v4168_v28 = vor.u32 %v4879_v51, %v4165_v54  ;;  %v4299_v51 = vld [vmem:[%s6648_s7 + $0x350] sm:$0xf] }
 0x52e   :  { %v1428_v33 = vpop.f32.mrf.mxu0 }
 0x52f   :  { %v5884_v43 = vadd.f32 %v1428_v33, %v5755_v37  ;;  %v1468_v45 = vpop.f32.mrf.mxu1  ;;  %v4012_v37 = vor.u32 %v4851_v50, %v4011_v49  ;;  %v4152_v33 = vor.u32 %v4877_v29, %v4151_v39  ;;  %v4139_v49 = vld [vmem:[%s6648_s7 + $0x270] sm:$0xf]  ;;  %v4874_v50 = vld [vmem:[%s6648_s7 + $0x278] sm:$0xf0]  ;;  %v4287_v39 = vld [vmem:[%s6648_s7 + $0x338] sm:$0xf] }
 0x530   :  { %v4901_v29 = vld [vmem:[%s6648_s7 + $0x340] sm:$0xf0] }
 0x531   :  { %1839 = vmatpush.bf16.msra.mxu2 %v4012_v37  ;;  %v4140_v37 = vor.u32 %v4874_v50, %v4139_v49  ;;  %v4288_v34 = vor.u32 %v4901_v29, %v4287_v39  ;;  %v4275_v49 = vld [vmem:[%s6648_s7 + $0x320] sm:$0xf]  ;;  %v4898_v50 = vld [vmem:[%s6648_s7 + $0x328] sm:$0xf0] }
 0x532   :  { %4319 = vmatmul.msk.bf16.vlgmr.msrb.gmra.mxu1 %vm334_vm2, %v4905_v38  ;;  %v4172_v38 = vor.u32 %v4881_v59, %v4171_v5  ;;  %v4279_v59 = vld [vmem:[%s6648_s7 + $0x330] sm:$0xf]  ;;  %v4395_v39 = vld [vmem:[%s6648_s7 + $0x3c0] sm:$0xf]  ;;  %v4920_v29 = vld [vmem:[%s6648_s7 + $0x3c8] sm:$0xf0] }
 0x533   :  { %2821 = vmatpush.bf16.msrb.mxu1 %v5398_v56  ;;  %v4847_v56 = vld [vmem:[%s6648_s7 + $0x1b4] sm:$0xf] }
 0x534   :  { %v1412_v4 = vpop.f32.mrf.mxu3 }
 0x535   :  { %v5907_v6 = vadd.f32 %v1412_v4, %v5744_v61  ;;  %v4001_v61 = vld [vmem:[%s6648_s7 + $0x1bc] sm:$0xf0]  ;;  %1840 = vmatpush.bf16.msra.mxu2 %v4000_v13  ;;  %v4148_v4 = vor.u32 %v4875_v60, %v4147_v58  ;;  %v4128_v13 = vor.u32 %v4871_v11, %v4127_v8  ;;  %v4894_v60 = vld [vmem:[%s6648_s7 + $0x308] sm:$0xf0]  ;;  %v4263_v8 = vld [vmem:[%s6648_s7 + $0x308] sm:$0xf] }
 0x536   :  { %v5918_v12 = vpop.f32.mrf.mxu0  ;;  %v4004_v17 = vor.u32 %v4847_v56, %v4001_v61  ;;  %v4870_v56 = vld [vmem:[%s6648_s7 + $0x25c] sm:$0xf]  ;;  %v4129_v61 = vld [vmem:[%s6648_s7 + $0x264] sm:$0xf0]  ;;  %v4255_v58 = vld [vmem:[%s6648_s7 + $0x300] sm:$0xf] }
 0x537   :  { %2822 = vmatpush.bf16.msrb.mxu1 %v5444_v42  ;;  %v1470_v16 = vpop.f32.mrf.mxu1  ;;  %v4895_v11 = vld [vmem:[%s6648_s7 + $0x310] sm:$0xf0] }
 0x538   :  { %v1478_v19 = vpack.c.bf16 %v1470_v16, %v1468_v45  ;;  %1856 = vmatpush.bf16.msrb.mxu3 %v4004_v17  ;;  %v4160_v45 = vor.u32 %v4878_v41, %v4159_v40  ;;  %v4132_v16 = vor.u32 %v4870_v56, %v4129_v61  ;;  %v4136_v17 = vor.u32 %v4872_v15, %v4135_v14  ;;  %v4267_v41 = vld [vmem:[%s6648_s7 + $0x318] sm:$0xf]  ;;  %v4243_v14 = vld [vmem:[%s6648_s7 + $0x2e8] sm:$0xf]  ;;  %v4891_v15 = vld [vmem:[%s6648_s7 + $0x2f0] sm:$0xf0] }
 0x539   :  { %v4264_v61 = vor.u32 %v4895_v11, %v4263_v8  ;;  %v4914_v8 = vld [vmem:[%s6648_s7 + $0x398] sm:$0xf0]  ;;  %v4913_v11 = vld [vmem:[%s6648_s7 + $0x394] sm:$0xf] }
 0x53a   :  { %3953 = vmatmul.msk.bf16.vlgmr.msrb.gmra.mxu2 %vm1227_vm3, %v1478_v19  ;;  %3955 = vmatmul.msk.bf16.vlgmr.msra.gmra.mxu3 %vm1227_vm3, %v1478_v19 }
 0x53b   :  { %3957 = vmatmul.msk.bf16.vlgmr.msrb.gmra.mxu0 %vm1227_vm3, %v1478_v19  ;;  %2061 = vmatpush.bf16.msrb.mxu2 %v4176_v20  ;;  %v4868_v19 = vld [vmem:[%s6648_s7 + $0x248] sm:$0xf0] }
 0x53c   :  { %v1414_v47 = vpop.f32.mrf.mxu3  ;;  %2093 = vmatpush.bf16.msrb.mxu0 %v4184_v25  ;;  %v4903_v25 = vld [vmem:[%s6648_s7 + $0x350] sm:$0xf0] }
 0x53d   :  { %v4867_v47 = vld [vmem:[%s6648_s7 + $0x244] sm:$0xf] }
 0x53e   :  { %v1433_v52 = vpop.f32.mrf.mxu0 }
 0x53f   :  { %v5937_v42 = vadd.f32 %v1433_v52, %v5803_v9  ;;  %v1473_v62 = vpop.f32.mrf.mxu1  ;;  %v4177_v9 = vld [vmem:[%s6648_s7 + $0x2c4] sm:$0xf0]  ;;  %2062 = vmatpush.bf16.msrb.mxu2 %v4164_v32  ;;  %v4116_v52 = vor.u32 %v4868_v19, %v4115_v18  ;;  %v4904_v32 = vld [vmem:[%s6648_s7 + $0x358] sm:$0xf0]  ;;  %v4245_v18 = vld [vmem:[%s6648_s7 + $0x2f4] sm:$0xf0] }
 0x540   :  { %v4180_v24 = vor.u32 %v4882_v10, %v4177_v9  ;;  %2094 = vmatpush.bf16.msrb.mxu0 %v4172_v38  ;;  %v4300_v5 = vor.u32 %v4904_v32, %v4299_v51  ;;  %v4251_v19 = vld [vmem:[%s6648_s7 + $0x2f0] sm:$0xf]  ;;  %v4407_v51 = vld [vmem:[%s6648_s7 + $0x3d8] sm:$0xf]  ;;  %v4923_v32 = vld [vmem:[%s6648_s7 + $0x3e0] sm:$0xf0] }
 0x542   :  { %4320 = vmatmul.msk.bf16.gmra.mxu1 %vm334_vm2, %v4906_v57  ;;  %2077 = vmatpush.bf16.msra.mxu3 %v4180_v24  ;;  %v4117_v57 = vld [vmem:[%s6648_s7 + $0x24c] sm:$0xf0]  ;;  %v4291_v24 = vld [vmem:[%s6648_s7 + $0x348] sm:$0xf] }
 0x543   :  { %2063 = vmatpush.bf16.msrb.mxu2 %v4152_v33  ;;  %v4120_v10 = vor.u32 %v4867_v47, %v4117_v57  ;;  %v4292_v30 = vor.u32 %v4903_v25, %v4291_v24  ;;  %v4892_v47 = vld [vmem:[%s6648_s7 + $0x2f8] sm:$0xf0] }
 0x544   :  { %v1416_v27 = vpop.f32.mrf.mxu3  ;;  %2095 = vmatpush.bf16.msrb.mxu0 %v4160_v45  ;;  %v4896_v45 = vld [vmem:[%s6648_s7 + $0x31c] sm:$0xf]  ;;  %v4252_v57 = vor.u32 %v4892_v47, %v4251_v19  ;;  %v4911_v19 = vld [vmem:[%s6648_s7 + $0x380] sm:$0xf0] }
 0x545   :  { %v4902_v27 = vld [vmem:[%s6648_s7 + $0x34c] sm:$0xf]  ;;  %v4910_v47 = vld [vmem:[%s6648_s7 + $0x37c] sm:$0xf] }
 0x546   :  { %2078 = vmatpush.bf16.msra.mxu3 %v4168_v28  ;;  %v4296_v54 = vor.u32 %v4902_v27, %v4293_v31  ;;  %v4899_v28 = vld [vmem:[%s6648_s7 + $0x334] sm:$0xf] }
 0x547   :  { %v1475_v36 = vpop.f32.mrf.mxu1  ;;  %2064 = vmatpush.bf16.msrb.mxu2 %v4140_v37  ;;  %v4276_v37 = vor.u32 %v4898_v50, %v4275_v49  ;;  %v4383_v49 = vld [vmem:[%s6648_s7 + $0x3a8] sm:$0xf]  ;;  %v4917_v50 = vld [vmem:[%s6648_s7 + $0x3b0] sm:$0xf0] }
 0x548   :  { %v1479_v2 = vpack.c.bf16 %v1475_v36, %v1473_v62  ;;  %2096 = vmatpush.bf16.msrb.mxu0 %v4148_v4  ;;  %v4123_v62 = vld [vmem:[%s6648_s7 + $0x248] sm:$0xf]  ;;  %v4900_v36 = vld [vmem:[%s6648_s7 + $0x338] sm:$0xf0]  ;;  %v4257_v4 = vld [vmem:[%s6648_s7 + $0x30c] sm:$0xf0] }
 0x549   :  { %v4124_v20 = vor.u32 %v4869_v3, %v4123_v62  ;;  %v4280_v38 = vor.u32 %v4900_v36, %v4279_v59  ;;  %v4231_v62 = vld [vmem:[%s6648_s7 + $0x2d0] sm:$0xf]  ;;  %v4888_v3 = vld [vmem:[%s6648_s7 + $0x2d8] sm:$0xf0]  ;;  %v4409_v59 = vld [vmem:[%s6648_s7 + $0x3e4] sm:$0xf0] }
 0x54a   :  { %3954 = vmatmul.msk.bf16.gmra.mxu2 %vm1227_vm3, %v1479_v2  ;;  %3956 = vmatmul.msk.bf16.gmra.mxu3 %vm1227_vm3, %v1479_v2  ;;  %v4415_v36 = vld [vmem:[%s6648_s7 + $0x3e0] sm:$0xf] }
 0x54b   :  { %3958 = vmatmul.msk.bf16.gmra.mxu0 %vm1227_vm3, %v1479_v2  ;;  %2079 = vmatpush.bf16.msra.mxu3 %v4156_v35  ;;  %v4281_v2 = vld [vmem:[%s6648_s7 + $0x33c] sm:$0xf0]  ;;  %v4897_v35 = vld [vmem:[%s6648_s7 + $0x320] sm:$0xf0] }
 0x54c   :  { %v1417_v48 = vpop.f32.mrf.mxu3  ;;  %2065 = vmatpush.bf16.msrb.mxu2 %v4128_v13  ;;  %2097 = vmatpush.bf16.msrb.mxu0 %v4136_v17  ;;  %v4284_v33 = vor.u32 %v4899_v28, %v4281_v2  ;;  %v4244_v17 = vor.u32 %v4891_v15, %v4243_v14  ;;  %v4924_v28 = vld [vmem:[%s6648_s7 + $0x3e8] sm:$0xf0]  ;;  %v4915_v14 = vld [vmem:[%s6648_s7 + $0x3a0] sm:$0xf0] }
 0x54d   :  { %v4269_v48 = vld [vmem:[%s6648_s7 + $0x324] sm:$0xf0]  ;;  %v4416_v2 = vor.u32 %v4924_v28, %v4415_v36  ;;  %v4942_v36 = vld [vmem:[%s6648_s7 + $0x46c] sm:$0xf] }
 0x54e   :  { %v4272_v53 = vor.u32 %v4896_v45, %v4269_v48 }
 0x54f   :  { %v1694_v0 = vpop.f32.mrf.mxu1  ;;  %2080 = vmatpush.bf16.msra.mxu3 %v4144_v1  ;;  %v4256_v1 = vor.u32 %v4894_v60, %v4255_v58  ;;  %v4391_v58 = vld [vmem:[%s6648_s7 + $0x3b0] sm:$0xf]  ;;  %v4918_v60 = vld [vmem:[%s6648_s7 + $0x3b8] sm:$0xf0] }
 0x550   :  { %2066 = vmatpush.bf16.msrb.mxu2 %v4116_v52  ;;  %2098 = vmatpush.bf16.msrb.mxu0 %v4124_v20  ;;  %v4233_v20 = vld [vmem:[%s6648_s7 + $0x2dc] sm:$0xf0] }
 0x552   :  { %4435 = vmatmul.msk.bf16.vlgmr.msra.gmra.mxu1 %vm334_vm2, %v4925_v46  ;;  %v4268_v46 = vor.u32 %v4897_v35, %v4267_v41  ;;  %v4921_v41 = vld [vmem:[%s6648_s7 + $0x3d0] sm:$0xf0] }
 0x553   :  { %2081 = vmatpush.bf16.msra.mxu3 %v4132_v16  ;;  %v4890_v16 = vld [vmem:[%s6648_s7 + $0x2ec] sm:$0xf] }
 0x554   :  { %v4248_v52 = vor.u32 %v4890_v16, %v4245_v18  ;;  %v4359_v18 = vld [vmem:[%s6648_s7 + $0x378] sm:$0xf] }
 0x557   :  { %v1696_v7 = vpop.f32.mrf.mxu1  ;;  %2082 = vmatpush.bf16.msra.mxu3 %v4120_v10  ;;  %v4232_v10 = vor.u32 %v4888_v3, %v4231_v62  ;;  %v4367_v62 = vld [vmem:[%s6648_s7 + $0x380] sm:$0xf]  ;;  %v4912_v3 = vld [vmem:[%s6648_s7 + $0x388] sm:$0xf0] }
 0x558   :  { %v1704_v9 = vpack.c.bf16 %v1696_v7, %v1694_v0  ;;  %v4893_v0 = vld [vmem:[%s6648_s7 + $0x304] sm:$0xf]  ;;  %v4887_v7 = vld [vmem:[%s6648_s7 + $0x2d4] sm:$0xf] }
 0x559   :  { %v4260_v13 = vor.u32 %v4893_v0, %v4257_v4  ;;  %v4236_v24 = vor.u32 %v4887_v7, %v4233_v20  ;;  %v4371_v4 = vld [vmem:[%s6648_s7 + $0x390] sm:$0xf]  ;;  %v4347_v20 = vld [vmem:[%s6648_s7 + $0x360] sm:$0xf] }
 0x55a   :  { %4069 = vmatmul.msk.bf16.vlgmr.msra.gmra.mxu2 %vm1227_vm3, %v1704_v9  ;;  %4071 = vmatmul.msk.bf16.vlgmr.msrb.gmra.mxu3 %vm1227_vm3, %v1704_v9 }
 0x55b   :  { %4073 = vmatmul.msk.bf16.vlgmr.msra.gmra.mxu0 %vm1227_vm3, %v1704_v9  ;;  %2287 = vmatpush.bf16.msra.mxu2 %v4292_v30  ;;  %v4239_v9 = vld [vmem:[%s6648_s7 + $0x2d8] sm:$0xf]  ;;  %v4946_v30 = vld [vmem:[%s6647_s6 + $0x88] sm:$0xff] }
 0x55c   :  { %2303 = vmatpush.bf16.msrb.mxu3 %v4296_v54  ;;  %2319 = vmatpush.bf16.msra.mxu0 %v4300_v5  ;;  %v4922_v54 = vld [vmem:[%s6648_s7 + $0x3dc] sm:$0xf]  ;;  %v4408_v5 = vor.u32 %v4923_v32, %v4407_v51 }
 0x55f   :  { %v1699_v22 = vpop.f32.mrf.mxu1  ;;  %2288 = vmatpush.bf16.msra.mxu2 %v4280_v38  ;;  %v4412_v38 = vor.u32 %v4922_v54, %v4409_v59  ;;  %v4943_v59 = vld [vmem:[%s6648_s7 + $0x470] sm:$0xf0] }
 0x560   :  { %2304 = vmatpush.bf16.msrb.mxu3 %v4284_v33  ;;  %2320 = vmatpush.bf16.msra.mxu0 %v4288_v34  ;;  %v4396_v33 = vor.u32 %v4920_v29, %v4395_v39  ;;  %v4397_v34 = vld [vmem:[%s6648_s7 + $0x3cc] sm:$0xf0]  ;;  %v4944_v39 = vld [vmem:[%s6648_s7 + $0x478] sm:$0xf0] }
 0x562   :  { %4436 = vmatmul.msk.bf16.gmra.mxu1 %vm334_vm2, %v4926_v21  ;;  %v4889_v21 = vld [vmem:[%s6648_s7 + $0x2e0] sm:$0xf0] }
 0x563   :  { %2289 = vmatpush.bf16.msra.mxu2 %v4268_v46  ;;  %v4240_v25 = vor.u32 %v4889_v21, %v4239_v9  ;;  %v4908_v9 = vld [vmem:[%s6648_s7 + $0x368] sm:$0xf0]  ;;  %v4907_v21 = vld [vmem:[%s6648_s7 + $0x364] sm:$0xf] }
 0x564   :  { %2305 = vmatpush.bf16.msrb.mxu3 %v4272_v53  ;;  %2321 = vmatpush.bf16.msra.mxu0 %v4276_v37  ;;  %v4916_v53 = vld [vmem:[%s6648_s7 + $0x3ac] sm:$0xf]  ;;  %v4384_v37 = vor.u32 %v4917_v50, %v4383_v49 }
 0x567   :  { %v1701_v26 = vpop.f32.mrf.mxu1  ;;  %2290 = vmatpush.bf16.msra.mxu2 %v4256_v1  ;;  %v4392_v1 = vor.u32 %v4918_v60, %v4391_v58  ;;  %v4936_v58 = vld [vmem:[%s6648_s7 + $0x43c] sm:$0xf] }
 0x568   :  { %v1705_v40 = vpack.c.bf16 %v1701_v26, %v1699_v22  ;;  %2306 = vmatpush.bf16.msrb.mxu3 %v4260_v13  ;;  %2322 = vmatpush.bf16.msra.mxu0 %v4264_v61  ;;  %v4919_v26 = vld [vmem:[%s6648_s7 + $0x3c4] sm:$0xf]  ;;  %v4373_v13 = vld [vmem:[%s6648_s7 + $0x39c] sm:$0xf0]  ;;  %v4379_v61 = vld [vmem:[%s6648_s7 + $0x398] sm:$0xf] }
 0x569   :  { %v4400_v45 = vor.u32 %v4919_v26, %v4397_v34  ;;  %v4376_v16 = vor.u32 %v4913_v11, %v4373_v13  ;;  %v4940_v34 = vld [vmem:[%s6648_s7 + $0x458] sm:$0xf0]  ;;  %v4934_v13 = vld [vmem:[%s6648_s7 + $0x428] sm:$0xf0] }
 0x56a   :  { %4070 = vmatmul.msk.bf16.gmra.mxu2 %vm1227_vm3, %v1705_v40  ;;  %4072 = vmatmul.msk.bf16.gmra.mxu3 %vm1227_vm3, %v1705_v40 }
 0x56b   :  { %4074 = vmatmul.msk.bf16.gmra.mxu0 %vm1227_vm3, %v1705_v40  ;;  %2291 = vmatpush.bf16.msra.mxu2 %v4244_v17  ;;  %v4403_v40 = vld [vmem:[%s6648_s7 + $0x3c8] sm:$0xf]  ;;  %v4380_v17 = vor.u32 %v4915_v14, %v4379_v61  ;;  %v4933_v61 = vld [vmem:[%s6648_s7 + $0x424] sm:$0xf] }
 0x56c   :  { %2307 = vmatpush.bf16.msrb.mxu3 %v4248_v52  ;;  %2323 = vmatpush.bf16.msra.mxu0 %v4252_v57  ;;  %v4404_v46 = vor.u32 %v4921_v41, %v4403_v40  ;;  %v4360_v52 = vor.u32 %v4911_v19, %v4359_v18  ;;  %v4361_v57 = vld [vmem:[%s6648_s7 + $0x384] sm:$0xf0]  ;;  %v4939_v40 = vld [vmem:[%s6648_s7 + $0x454] sm:$0xf] }
 0x56d   :  { %v4364_v7 = vor.u32 %v4910_v47, %v4361_v57  ;;  %v4475_v57 = vld [vmem:[%s6648_s7 + $0x408] sm:$0xf] }
 0x56f   :  { %v1920_v56 = vpop.f32.mrf.mxu1  ;;  %2292 = vmatpush.bf16.msra.mxu2 %v4232_v10  ;;  %v4368_v10 = vor.u32 %v4912_v3, %v4367_v62  ;;  %v4931_v62 = vld [vmem:[%s6648_s7 + $0x410] sm:$0xf0]  ;;  %v4930_v3 = vld [vmem:[%s6648_s7 + $0x40c] sm:$0xf] }
 0x570   :  { %2308 = vmatpush.bf16.msrb.mxu3 %v4236_v24  ;;  %2324 = vmatpush.bf16.msra.mxu0 %v4240_v25  ;;  %v4349_v24 = vld [vmem:[%s6648_s7 + $0x36c] sm:$0xf0]  ;;  %v4355_v25 = vld [vmem:[%s6648_s7 + $0x368] sm:$0xf] }
 0x572   :  { %4551 = vmatmul.msk.bf16.vlgmr.msrb.gmra.mxu1 %vm334_vm2, %v4945_v55  ;;  %v4385_v55 = vld [vmem:[%s6648_s7 + $0x3b4] sm:$0xf0] }
 0x573   :  { %v4388_v0 = vor.u32 %v4916_v53, %v4385_v55  ;;  %v4937_v55 = vld [vmem:[%s6648_s7 + $0x440] sm:$0xf0] }
 0x577   :  { %v1922_v22 = vpop.f32.mrf.mxu1 }
 0x578   :  { %v1930_v27 = vpack.c.bf16 %v1922_v22, %v1920_v56  ;;  %v4372_v56 = vor.u32 %v4914_v8, %v4371_v4  ;;  %v4348_v22 = vor.u32 %v4908_v9, %v4347_v20  ;;  %v4938_v4 = vld [vmem:[%s6648_s7 + $0x448] sm:$0xf0]  ;;  %v4483_v20 = vld [vmem:[%s6648_s7 + $0x410] sm:$0xf]  ;;  %v4932_v9 = vld [vmem:[%s6648_s7 + $0x418] sm:$0xf0] }
 0x57a   :  { %4185 = vmatmul.msk.bf16.vlgmr.msrb.gmra.mxu2 %vm1227_vm3, %v1930_v27  ;;  %4187 = vmatmul.msk.bf16.vlgmr.msra.gmra.mxu3 %vm1227_vm3, %v1930_v27 }
 0x57b   :  { %4189 = vmatmul.msk.bf16.vlgmr.msrb.gmra.mxu0 %vm1227_vm3, %v1930_v27  ;;  %2513 = vmatpush.bf16.msrb.mxu2 %v4408_v5  ;;  %v4909_v27 = vld [vmem:[%s6648_s7 + $0x370] sm:$0xf0]  ;;  %v4523_v5 = vld [vmem:[%s6648_s7 + $0x468] sm:$0xf] }
 0x57c   :  { %2529 = vmatpush.bf16.msra.mxu3 %v4412_v38  ;;  %2545 = vmatpush.bf16.msrb.mxu0 %v4416_v2  ;;  %v4356_v51 = vor.u32 %v4909_v27, %v4355_v25  ;;  %v4524_v28 = vor.u32 %v4943_v59, %v4523_v5  ;;  %v4525_v38 = vld [vmem:[%s6648_s7 + $0x474] sm:$0xf0]  ;;  %v4531_v2 = vld [vmem:[%s6648_s7 + $0x470] sm:$0xf]  ;;  %v4928_v25 = vld [vmem:[%s6648_s7 + $0x3f8] sm:$0xf0] }
 0x57d   :  { %v4528_v29 = vor.u32 %v4942_v36, %v4525_v38  ;;  %v4532_v26 = vor.u32 %v4944_v39, %v4531_v2  ;;  %v4927_v27 = vld [vmem:[%s6648_s7 + $0x3f4] sm:$0xf] }
 0x57f   :  { %v1925_v31 = vpop.f32.mrf.mxu1  ;;  %2514 = vmatpush.bf16.msrb.mxu2 %v4396_v33  ;;  %v4511_v33 = vld [vmem:[%s6648_s7 + $0x450] sm:$0xf] }
 0x580   :  { %2530 = vmatpush.bf16.msra.mxu3 %v4400_v45  ;;  %2546 = vmatpush.bf16.msrb.mxu0 %v4404_v46  ;;  %v4512_v41 = vor.u32 %v4940_v34, %v4511_v33  ;;  %v4519_v45 = vld [vmem:[%s6648_s7 + $0x458] sm:$0xf]  ;;  %v4941_v46 = vld [vmem:[%s6648_s7 + $0x460] sm:$0xf0] }
 0x581   :  { %v4520_v50 = vor.u32 %v4941_v46, %v4519_v45  ;;  %v4964_v45 = vld [vmem:[%s6648_s7 + $0x508] sm:$0xf0] }
 0x582   :  { %4552 = vmatmul.msk.bf16.gmra.mxu1 %vm334_vm2, %v4946_v30 }
 0x583   :  { %2515 = vmatpush.bf16.msrb.mxu2 %v4384_v37  ;;  %v4499_v37 = vld [vmem:[%s6648_s7 + $0x438] sm:$0xf] }
 0x584   :  { %2531 = vmatpush.bf16.msra.mxu3 %v4388_v0  ;;  %2547 = vmatpush.bf16.msrb.mxu0 %v4392_v1  ;;  %v4500_v60 = vor.u32 %v4937_v55, %v4499_v37  ;;  %v4501_v0 = vld [vmem:[%s6648_s7 + $0x444] sm:$0xf0]  ;;  %v4507_v1 = vld [vmem:[%s6648_s7 + $0x440] sm:$0xf]  ;;  %v4960_v37 = vld [vmem:[%s6648_s7 + $0x4e8] sm:$0xf0] }
 0x585   :  { %v4504_v8 = vor.u32 %v4936_v58, %v4501_v0  ;;  %v4508_v11 = vor.u32 %v4938_v4, %v4507_v1  ;;  %v4959_v55 = vld [vmem:[%s6648_s7 + $0x4e4] sm:$0xf]  ;;  %v4635_v0 = vld [vmem:[%s6648_s7 + $0x4e8] sm:$0xf]  ;;  %v4961_v1 = vld [vmem:[%s6648_s7 + $0x4f0] sm:$0xf0] }
 0x587   :  { %v1927_v35 = vpop.f32.mrf.mxu1  ;;  %2516 = vmatpush.bf16.msrb.mxu2 %v4372_v56  ;;  %v4487_v56 = vld [vmem:[%s6648_s7 + $0x420] sm:$0xf] }
 0x588   :  { %v1931_v48 = vpack.c.bf16 %v1927_v35, %v1925_v31  ;;  %2532 = vmatpush.bf16.msra.mxu3 %v4376_v16  ;;  %2548 = vmatpush.bf16.msrb.mxu0 %v4380_v17  ;;  %v4352_v31 = vor.u32 %v4907_v21, %v4349_v24  ;;  %v4513_v35 = vld [vmem:[%s6648_s7 + $0x45c] sm:$0xf0]  ;;  %v4488_v14 = vor.u32 %v4934_v13, %v4487_v56  ;;  %v4495_v16 = vld [vmem:[%s6648_s7 + $0x428] sm:$0xf]  ;;  %v4935_v17 = vld [vmem:[%s6648_s7 + $0x430] sm:$0xf0] }
 0x589   :  { %v4516_v49 = vor.u32 %v4939_v40, %v4513_v35  ;;  %v4496_v47 = vor.u32 %v4935_v17, %v4495_v16  ;;  %v4463_v24 = vld [vmem:[%s6648_s7 + $0x3f0] sm:$0xf]  ;;  %v4963_v35 = vld [vmem:[%s6648_s7 + $0x500] sm:$0xf0]  ;;  %v4956_v16 = vld [vmem:[%s6648_s7 + $0x4cc] sm:$0xf] }
 0x58a   :  { %4186 = vmatmul.msk.bf16.gmra.mxu2 %vm1227_vm3, %v1931_v48  ;;  %4188 = vmatmul.msk.bf16.gmra.mxu3 %vm1227_vm3, %v1931_v48  ;;  %v4617_v17 = vld [vmem:[%s6648_s7 + $0x4d4] sm:$0xf0] }
 0x58b   :  { %4190 = vmatmul.msk.bf16.gmra.mxu0 %vm1227_vm3, %v1931_v48  ;;  %2517 = vmatpush.bf16.msrb.mxu2 %v4360_v52  ;;  %v6373_v52 = vpop.f32.mrf.mxu0 }
 0x58c   :  { %2533 = vmatpush.bf16.msra.mxu3 %v4364_v7  ;;  %2549 = vmatpush.bf16.msrb.mxu0 %v4368_v10  ;;  %v4476_v7 = vor.u32 %v4931_v62, %v4475_v57  ;;  %v4477_v10 = vld [vmem:[%s6648_s7 + $0x414] sm:$0xf0] }
 0x58d   :  { %v4480_v21 = vor.u32 %v4930_v3, %v4477_v10  ;;  %v4954_v10 = vld [vmem:[%s6648_s7 + $0x4b8] sm:$0xf0] }
 0x58f   :  { %v2146_v15 = vpop.f32.mrf.mxu1  ;;  %2518 = vmatpush.bf16.msrb.mxu2 %v4348_v22  ;;  %v4484_v22 = vor.u32 %v4932_v9, %v4483_v20  ;;  %v4953_v20 = vld [vmem:[%s6648_s7 + $0x4b4] sm:$0xf] }
 0x590   :  { %2534 = vmatpush.bf16.msra.mxu3 %v4352_v31  ;;  %2550 = vmatpush.bf16.msrb.mxu0 %v4356_v51  ;;  %v4465_v31 = vld [vmem:[%s6648_s7 + $0x3fc] sm:$0xf0]  ;;  %v4471_v51 = vld [vmem:[%s6648_s7 + $0x3f8] sm:$0xf] }
 0x591   :  { %v4468_v5 = vor.u32 %v4927_v27, %v4465_v31 }
 0x597   :  { %v2148_v30 = vpop.f32.mrf.mxu1 }
 0x598   :  { %v2156_v32 = vpack.c.bf16 %v2148_v30, %v2146_v15  ;;  %v4489_v15 = vld [vmem:[%s6648_s7 + $0x42c] sm:$0xf0]  ;;  %v4464_v30 = vor.u32 %v4928_v25, %v4463_v24  ;;  %v4955_v24 = vld [vmem:[%s6648_s7 + $0x4c0] sm:$0xf0]  ;;  %v1436_v25 = vadd.f32 %v6373_v52, %v5842_v23  ;;  %v4950_v23 = vld [vmem:[%s6648_s7 + $0x49c] sm:$0xf] }
 0x599   :  { %v4492_v19 = vor.u32 %v4933_v61, %v4489_v15  ;;  %v4957_v15 = vld [vmem:[%s6648_s7 + $0x4d0] sm:$0xf0] }
 0x59a   :  { %4301 = vmatmul.msk.bf16.vlgmr.msra.gmra.mxu2 %vm1227_vm3, %v2156_v32  ;;  %4303 = vmatmul.msk.bf16.vlgmr.msrb.gmra.mxu3 %vm1227_vm3, %v2156_v32 }
 0x59b   :  { %4305 = vmatmul.msk.bf16.vlgmr.msra.gmra.mxu0 %vm1227_vm3, %v2156_v32  ;;  %2739 = vmatpush.bf16.msra.mxu2 %v4524_v28  ;;  %v4929_v32 = vld [vmem:[%s6648_s7 + $0x400] sm:$0xf0] }
 0x59c   :  { %2755 = vmatpush.bf16.msrb.mxu3 %v4528_v29  ;;  %2771 = vmatpush.bf16.msra.mxu0 %v4532_v26  ;;  %v4472_v59 = vor.u32 %v4929_v32, %v4471_v51 }
 0x59f   :  { %v2151_v54 = vpop.f32.mrf.mxu1  ;;  %2740 = vmatpush.bf16.msra.mxu2 %v4512_v41  ;;  %v4639_v41 = vld [vmem:[%s6648_s7 + $0x4f8] sm:$0xf] }
 0x5a0   :  { %2756 = vmatpush.bf16.msrb.mxu3 %v4516_v49  ;;  %2772 = vmatpush.bf16.msra.mxu0 %v4520_v50 }
 0x5a3   :  { %2741 = vmatpush.bf16.msra.mxu2 %v4500_v60  ;;  %v4629_v60 = vld [vmem:[%s6648_s7 + $0x4ec] sm:$0xf0] }
 0x5a4   :  { %2757 = vmatpush.bf16.msrb.mxu3 %v4504_v8  ;;  %2773 = vmatpush.bf16.msra.mxu0 %v4508_v11  ;;  %v4632_v8 = vor.u32 %v4959_v55, %v4629_v60  ;;  %v4636_v11 = vor.u32 %v4961_v1, %v4635_v0 }
 0x5a7   :  { %v2153_v48 = vpop.f32.mrf.mxu1  ;;  %2742 = vmatpush.bf16.msra.mxu2 %v4488_v14  ;;  %v4615_v14 = vld [vmem:[%s6648_s7 + $0x4c8] sm:$0xf] }
 0x5a8   :  { %v2157_v53 = vpack.c.bf16 %v2153_v48, %v2151_v54  ;;  %2758 = vmatpush.bf16.msrb.mxu3 %v4492_v19  ;;  %2774 = vmatpush.bf16.msra.mxu0 %v4496_v47  ;;  %v4958_v19 = vld [vmem:[%s6648_s7 + $0x4d8] sm:$0xf0]  ;;  %v4620_v47 = vor.u32 %v4956_v16, %v4617_v17 }
 0x5aa   :  { %4302 = vmatmul.msk.bf16.gmra.mxu2 %vm1227_vm3, %v2157_v53  ;;  %4304 = vmatmul.msk.bf16.gmra.mxu3 %vm1227_vm3, %v2157_v53 }
 0x5ab   :  { %4306 = vmatmul.msk.bf16.gmra.mxu0 %vm1227_vm3, %v2157_v53  ;;  %2743 = vmatpush.bf16.msra.mxu2 %v4476_v7  ;;  %v4627_v53 = vld [vmem:[%s6648_s7 + $0x4e0] sm:$0xf]  ;;  %v4603_v7 = vld [vmem:[%s6648_s7 + $0x4b0] sm:$0xf] }
 0x5ac   :  { %2759 = vmatpush.bf16.msrb.mxu3 %v4480_v21  ;;  %2775 = vmatpush.bf16.msra.mxu0 %v4484_v22  ;;  %v4628_v58 = vor.u32 %v4960_v37, %v4627_v53  ;;  %v4604_v9 = vor.u32 %v4954_v10, %v4603_v7  ;;  %v4605_v21 = vld [vmem:[%s6648_s7 + $0x4bc] sm:$0xf0]  ;;  %v4611_v22 = vld [vmem:[%s6648_s7 + $0x4b8] sm:$0xf] }
 0x5ad   :  { %v4612_v31 = vor.u32 %v4955_v24, %v4611_v22 }
 0x5af   :  { %v2372_v18 = vpop.f32.mrf.mxu1  ;;  %2744 = vmatpush.bf16.msra.mxu2 %v4464_v30  ;;  %v4608_v30 = vor.u32 %v4953_v20, %v4605_v21 }
 0x5b0   :  { %2760 = vmatpush.bf16.msrb.mxu3 %v4468_v5  ;;  %2776 = vmatpush.bf16.msra.mxu0 %v4472_v59  ;;  %v4951_v5 = vld [vmem:[%s6648_s7 + $0x4a0] sm:$0xf0]  ;;  %v4593_v59 = vld [vmem:[%s6648_s7 + $0x4a4] sm:$0xf0] }
 0x5b7   :  { %v2374_v54 = vpop.f32.mrf.mxu1 }
 0x5b8   :  { %v1648_v36 = vpop.f32.mrf.mxu0  ;;  %v2382_v28 = vpack.c.bf16 %v2374_v54, %v2372_v18  ;;  %v4623_v18 = vld [vmem:[%s6648_s7 + $0x4d0] sm:$0xf]  ;;  %v4591_v54 = vld [vmem:[%s6648_s7 + $0x498] sm:$0xf] }
 0x5b9   :  { %v6412_v38 = vadd.f32 %v1648_v36, %v5884_v43  ;;  %v1431_v43 = vadd.f32 %v5918_v12, %v5798_v63  ;;  %v4641_v63 = vld [vmem:[%s6648_s7 + $0x504] sm:$0xf0]  ;;  %v4647_v12 = vld [vmem:[%s6648_s7 + $0x500] sm:$0xf]  ;;  %v4624_v57 = vor.u32 %v4958_v19, %v4623_v18  ;;  %v4592_v52 = vor.u32 %v4951_v5, %v4591_v54 }
 0x5ba   :  { %4417 = vmatmul.msk.bf16.vlgmr.msrb.gmra.mxu2 %vm1227_vm3, %v2382_v28  ;;  %4419 = vmatmul.msk.bf16.vlgmr.msra.gmra.mxu3 %vm1227_vm3, %v2382_v28  ;;  %v4648_v48 = vor.u32 %v4964_v45, %v4647_v12  ;;  %v4599_v36 = vld [vmem:[%s6648_s7 + $0x4a0] sm:$0xf]  ;;  %v4949_v12 = vld [vmem:[%s6648_s7 + $0x490] sm:$0xf0] }
 0x5bb   :  { %4421 = vmatmul.msk.bf16.vlgmr.msrb.gmra.mxu0 %vm1227_vm3, %v2382_v28  ;;  %v4952_v28 = vld [vmem:[%s6648_s7 + $0x4a8] sm:$0xf0] }
 0x5bc   :  { %2997 = vmatpush.bf16.msrb.mxu0 %v4648_v48 }
 0x5bd   :  { %v1616_v2 = vpop.f32.mrf.mxu2  ;;  %v1632_v39 = vpop.f32.mrf.mxu3 }
 0x5be   :  { %v6418_v29 = vadd.f32 %v1616_v2, %v5777_v44  ;;  %v6421_v26 = vadd.f32 %v1632_v39, %v5907_v6  ;;  %v4962_v44 = vld [vmem:[%s6648_s7 + $0x4fc] sm:$0xf]  ;;  %v4640_v6 = vor.u32 %v4963_v35, %v4639_v41  ;;  %v4596_v2 = vor.u32 %v4950_v23, %v4593_v59  ;;  %v4948_v41 = vld [vmem:[%s6648_s7 + $0x488] sm:$0xf0]  ;;  %v4947_v35 = vld [vmem:[%s6648_s7 + $0x484] sm:$0xf] }
 0x5bf   :  { %v2377_v33 = vpop.f32.mrf.mxu1  ;;  %v4644_v46 = vor.u32 %v4962_v44, %v4641_v63  ;;  %v4600_v39 = vor.u32 %v4952_v28, %v4599_v36  ;;  %v4587_v63 = vld [vmem:[%s6648_s7 + $0x488] sm:$0xf] }
 0x5c0   :  { %v1650_v34 = vpop.f32.mrf.mxu0  ;;  %2965 = vmatpush.bf16.msrb.mxu2 %v4640_v6  ;;  %2998 = vmatpush.bf16.msrb.mxu0 %v4636_v11  ;;  %v4581_v6 = vld [vmem:[%s6648_s7 + $0x48c] sm:$0xf0]  ;;  %v4588_v48 = vor.u32 %v4949_v12, %v4587_v63 }
 0x5c1   :  { %v6425_v40 = vadd.f32 %v1650_v34, %v1431_v43  ;;  %2981 = vmatpush.bf16.msra.mxu3 %v4644_v46  ;;  %v4579_v34 = vld [vmem:[%s6648_s7 + $0x480] sm:$0xf]  ;;  %v4584_v46 = vor.u32 %v4947_v35, %v4581_v6 }
 0x5c2   :  { %v4580_v44 = vor.u32 %v4948_v41, %v4579_v34 }
 0x5c4   :  { %2966 = vmatpush.bf16.msrb.mxu2 %v4628_v58  ;;  %2999 = vmatpush.bf16.msrb.mxu0 %v4624_v57 }
 0x5c5   :  { %v1618_v49 = vpop.f32.mrf.mxu2  ;;  %v1634_v50 = vpop.f32.mrf.mxu3  ;;  %2982 = vmatpush.bf16.msra.mxu3 %v4632_v8 }
 0x5c7   :  { %v2379_v4 = vpop.f32.mrf.mxu1 }
 0x5c8   :  { %v1653_v56 = vpop.f32.mrf.mxu0  ;;  %v2383_v13 = vpack.c.bf16 %v2379_v4, %v2377_v33  ;;  %3000 = vmatpush.bf16.msrb.mxu0 %v4612_v31 }
 0x5c9   :  { %v6464_v61 = vadd.f32 %v1653_v56, %v5937_v42  ;;  %v4616_v42 = vor.u32 %v4957_v15, %v4615_v14  ;;  %2983 = vmatpush.bf16.msra.mxu3 %v4620_v47 }
 0x5ca   :  { %4418 = vmatmul.msk.bf16.gmra.mxu2 %vm1227_vm3, %v2383_v13  ;;  %4420 = vmatmul.msk.bf16.gmra.mxu3 %vm1227_vm3, %v2383_v13 }
 0x5cb   :  { %4422 = vmatmul.msk.bf16.gmra.mxu0 %vm1227_vm3, %v2383_v13  ;;  %2967 = vmatpush.bf16.msrb.mxu2 %v4616_v42 }
 0x5cc   :  { %3001 = vmatpush.bf16.msrb.mxu0 %v4600_v39 }
 0x5cd   :  { %v1620_v62 = vpop.f32.mrf.mxu2  ;;  %v1636_v3 = vpop.f32.mrf.mxu3  ;;  %2984 = vmatpush.bf16.msra.mxu3 %v4608_v30 }
 0x5cf   :  { %v2598_v27 = vpop.f32.mrf.mxu1  ;;  %2968 = vmatpush.bf16.msrb.mxu2 %v4604_v9 }
 0x5d0   :  { %v1655_v51 = vpop.f32.mrf.mxu0  ;;  %3002 = vmatpush.bf16.msrb.mxu0 %v4588_v48 }
 0x5d1   :  { %v1663_v32 = vadd.f32 %v1655_v51, %v1436_v25  ;;  %2985 = vmatpush.bf16.msra.mxu3 %v4596_v2 }
 0x5d3   :  { %2969 = vmatpush.bf16.msrb.mxu2 %v4592_v52 }
 0x5d5   :  { %v1621_v43 = vpop.f32.mrf.mxu2  ;;  %v1637_v33 = vpop.f32.mrf.mxu3  ;;  %2986 = vmatpush.bf16.msra.mxu3 %v4584_v46 }
 0x5d7   :  { %v2600_v45 = vpop.f32.mrf.mxu1  ;;  %2970 = vmatpush.bf16.msrb.mxu2 %v4580_v44 }
 0x5d8   :  { %v1874_v49 = vpop.f32.mrf.mxu0  ;;  %v2608_v50 = vpack.c.bf16 %v2600_v45, %v2598_v27 }
 0x5d9   :  { %v1886_v53 = vadd.f32 %v1874_v49, %v6412_v38 }
 0x5da   :  { %4533 = vmatmul.msk.bf16.vlgmr.msra.gmra.mxu2 %vm1227_vm3, %v2608_v50  ;;  %4535 = vmatmul.msk.bf16.vlgmr.msrb.gmra.mxu3 %vm1227_vm3, %v2608_v50 }
 0x5db   :  { %4537 = vmatmul.msk.bf16.vlgmr.msra.gmra.mxu0 %vm1227_vm3, %v2608_v50 }
 0x5dd   :  { %v1842_v37 = vpop.f32.mrf.mxu2  ;;  %v1858_v55 = vpop.f32.mrf.mxu3 }
 0x5de   :  { %v1884_v58 = vadd.f32 %v1842_v37, %v6418_v29  ;;  %v1885_v60 = vadd.f32 %v1858_v55, %v6421_v26 }
 0x5df   :  { %v2603_v0 = vpop.f32.mrf.mxu1 }
 0x5e0   :  { %v1876_v1 = vpop.f32.mrf.mxu0 }
 0x5e1   :  { %v1887_v10 = vadd.f32 %v1876_v1, %v6425_v40 }
 0x5e5   :  { %v1844_v4 = vpop.f32.mrf.mxu2  ;;  %v1860_v8 = vpop.f32.mrf.mxu3 }
 0x5e7   :  { %v2605_v11 = vpop.f32.mrf.mxu1 }
 0x5e8   :  { %v1879_v38 = vpop.f32.mrf.mxu0  ;;  %v2609_v56 = vpack.c.bf16 %v2605_v11, %v2603_v0 }
 0x5e9   :  { %v1888_v13 = vadd.f32 %v1879_v38, %v6464_v61 }
 0x5ea   :  { %4534 = vmatmul.msk.bf16.gmra.mxu2 %vm1227_vm3, %v2609_v56  ;;  %4536 = vmatmul.msk.bf16.gmra.mxu3 %vm1227_vm3, %v2609_v56 }
 0x5eb   :  { %4538 = vmatmul.msk.bf16.gmra.mxu0 %vm1227_vm3, %v2609_v56 }
 0x5ed   :  { %v1846_v14 = vpop.f32.mrf.mxu2  ;;  %v1862_v15 = vpop.f32.mrf.mxu3 }
 0x5ef   :  { %v2824_v29 = vpop.f32.mrf.mxu1 }
 0x5f0   :  { %v1881_v16 = vpop.f32.mrf.mxu0 }
 0x5f1   :  { %v1889_v26 = vadd.f32 %v1881_v16, %v1663_v32 }
 0x5f5   :  { %v1847_v42 = vpop.f32.mrf.mxu2  ;;  %v1863_v17 = vpop.f32.mrf.mxu3 }
 0x5f7   :  { %v2826_v18 = vpop.f32.mrf.mxu1 }
 0x5f8   :  { %v2100_v19 = vpop.f32.mrf.mxu0  ;;  %v2834_v47 = vpack.c.bf16 %v2826_v18, %v2824_v29 }
 0x5f9   :  { %v2112_v57 = vadd.f32 %v2100_v19, %v1886_v53 }
 0x5fa   :  { %4649 = vmatmul.msk.bf16.vlgmr.msrb.gmra.mxu2 %vm1227_vm3, %v2834_v47  ;;  %4651 = vmatmul.msk.bf16.vlgmr.msra.gmra.mxu3 %vm1227_vm3, %v2834_v47 }
 0x5fb   :  { %4653 = vmatmul.msk.bf16.vlgmr.msrb.gmra.mxu0 %vm1227_vm3, %v2834_v47 }
 0x5fd   :  { %v2068_v61 = vpop.f32.mrf.mxu2  ;;  %v2084_v62 = vpop.f32.mrf.mxu3 }
 0x5fe   :  { %v2110_v3 = vadd.f32 %v2068_v61, %v1884_v58  ;;  %v2111_v7 = vadd.f32 %v2084_v62, %v1885_v60 }
 0x5ff   :  { %v2829_v20 = vpop.f32.mrf.mxu1 }
 0x600   :  { %v2102_v9 = vpop.f32.mrf.mxu0 }
 0x601   :  { %v2113_v21 = vadd.f32 %v2102_v9, %v1887_v10  ;;  %v3020_v9 = vld [vmem:[%s6649_s8] sm:$0x7] }
 0x605   :  { %v2070_v22 = vpop.f32.mrf.mxu2  ;;  %v2086_v24 = vpop.f32.mrf.mxu3 }
 0x606   :  { %v3023_v22 = vperm.slane %v3020_v9, 1 }
 0x607   :  { %v2831_v25 = vpop.f32.mrf.mxu1 }
 0x608   :  { %v2105_v27 = vpop.f32.mrf.mxu0  ;;  %v2835_v30 = vpack.c.bf16 %v2831_v25, %v2829_v20 }
 0x609   :  { %v2114_v31 = vadd.f32 %v2105_v27, %v1888_v13 }
 0x60a   :  { %4650 = vmatmul.msk.bf16.gmra.mxu2 %vm1227_vm3, %v2835_v30  ;;  %4652 = vmatmul.msk.bf16.gmra.mxu3 %vm1227_vm3, %v2835_v30 }
 0x60b   :  { %4654 = vmatmul.msk.bf16.gmra.mxu0 %vm1227_vm3, %v2835_v30 }
 0x60d   :  { %v2072_v51 = vpop.f32.mrf.mxu2  ;;  %v2088_v32 = vpop.f32.mrf.mxu3 }
 0x610   :  { %v2107_v54 = vpop.f32.mrf.mxu0 }
 0x611   :  { %v2115_v5 = vadd.f32 %v2107_v54, %v1889_v26  ;;  %v3024_v54 = vperm.slane %v3020_v9, 2 }
 0x615   :  { %v2073_v40 = vpop.f32.mrf.mxu2  ;;  %v2089_v23 = vpop.f32.mrf.mxu3 }
 0x618   :  { %v2326_v52 = vpop.f32.mrf.mxu0 }
 0x619   :  { %v2338_v59 = vadd.f32 %v2326_v52, %v2112_v57 }
 0x61d   :  { %v2294_v36 = vpop.f32.mrf.mxu2  ;;  %v2310_v28 = vpop.f32.mrf.mxu3 }
 0x61e   :  { %v2336_v2 = vadd.f32 %v2294_v36, %v2110_v3  ;;  %v2337_v39 = vadd.f32 %v2310_v28, %v2111_v7 }
 0x620   :  { %v2328_v43 = vpop.f32.mrf.mxu0 }
 0x621   :  { %v2339_v33 = vadd.f32 %v2328_v43, %v2113_v21  ;;  %v3022_v21 = vperm.slane %v3020_v9, 0  ;;  %v4976_v9 = vld [vmem:[%s6650_s9 + $0x58] sm:$0xff] }
 0x625   :  { %v2296_v34 = vpop.f32.mrf.mxu2  ;;  %v2312_v41 = vpop.f32.mrf.mxu3 }
 0x628   :  { %v2331_v35 = vpop.f32.mrf.mxu0 }
 0x629   :  { %v2340_v44 = vadd.f32 %v2331_v35, %v2114_v31 }
 0x62d   :  { %v2298_v6 = vpop.f32.mrf.mxu2  ;;  %v2314_v63 = vpop.f32.mrf.mxu3 }
 0x630   :  { %v2333_v12 = vpop.f32.mrf.mxu0 }
 0x631   :  { %v2341_v45 = vadd.f32 %v2333_v12, %v2115_v5 }
 0x635   :  { %v2299_v46 = vpop.f32.mrf.mxu2  ;;  %v2315_v48 = vpop.f32.mrf.mxu3 }
 0x638   :  { %v2552_v49 = vpop.f32.mrf.mxu0 }
 0x639   :  { %v2564_v50 = vadd.f32 %v2552_v49, %v2338_v59 }
 0x63d   :  { %v2520_v53 = vpop.f32.mrf.mxu2  ;;  %v2536_v37 = vpop.f32.mrf.mxu3 }
 0x63e   :  { %v2562_v55 = vadd.f32 %v2520_v53, %v2336_v2  ;;  %v2563_v58 = vadd.f32 %v2536_v37, %v2337_v39 }
 0x640   :  { %v2554_v60 = vpop.f32.mrf.mxu0 }
 0x641   :  { %v2565_v0 = vadd.f32 %v2554_v60, %v2339_v33 }
 0x645   :  { %v2522_v1 = vpop.f32.mrf.mxu2  ;;  %v2538_v4 = vpop.f32.mrf.mxu3 }
 0x648   :  { %v2557_v8 = vpop.f32.mrf.mxu0 }
 0x649   :  { %v2566_v11 = vadd.f32 %v2557_v8, %v2340_v44 }
 0x64d   :  { %v2524_v38 = vpop.f32.mrf.mxu2  ;;  %v2540_v56 = vpop.f32.mrf.mxu3 }
 0x650   :  { %v2559_v13 = vpop.f32.mrf.mxu0 }
 0x651   :  { %v2567_v33 = vadd.f32 %v2559_v13, %v2341_v45 }
 0x655   :  { %v2525_v14 = vpop.f32.mrf.mxu2  ;;  %v2541_v15 = vpop.f32.mrf.mxu3 }
 0x658   :  { %v2778_v29 = vpop.f32.mrf.mxu0 }
 0x659   :  { %v2790_v24 = vadd.f32 %v2778_v29, %v2564_v50  ;;  %v4972_v29 = vld [vmem:[%s6650_s9 + $0x38] sm:$0xff] }
 0x65a   :  { %3250 = vmatpush.bf16.msrb.mxu3 %v4972_v29 }
 0x65d   :  { %v2746_v16 = vpop.f32.mrf.mxu2  ;;  %v2762_v26 = vpop.f32.mrf.mxu3 }
 0x65e   :  { %v2788_v42 = vadd.f32 %v2746_v16, %v2562_v55  ;;  %v2789_v17 = vadd.f32 %v2762_v26, %v2563_v58  ;;  %v4980_v16 = vld [vmem:[%s6650_s9 + $0x78] sm:$0xff]  ;;  %v4971_v26 = vld [vmem:[%s6650_s9 + $0x30] sm:$0xff] }
 0x65f   :  { %3263 = vmatpush.bf16.msra.mxu0 %v4980_v16  ;;  %3251 = vmatpush.bf16.msrb.mxu3 %v4971_v26 }
 0x660   :  { %v2780_v18 = vpop.f32.mrf.mxu0 }
 0x661   :  { %v2791_v51 = vadd.f32 %v2780_v18, %v2565_v0  ;;  %v4970_v18 = vld [vmem:[%s6650_s9 + $0x28] sm:$0xff] }
 0x663   :  { %3252 = vmatpush.bf16.msrb.mxu3 %v4970_v18 }
 0x665   :  { %v2748_v19 = vpop.f32.mrf.mxu2  ;;  %v2764_v47 = vpop.f32.mrf.mxu3 }
 0x666   :  { %v4978_v47 = vld [vmem:[%s6650_s9 + $0x68] sm:$0xff] }
 0x668   :  { %v2783_v57 = vpop.f32.mrf.mxu0 }
 0x669   :  { %v2792_v34 = vadd.f32 %v2783_v57, %v2566_v11  ;;  %v4969_v57 = vld [vmem:[%s6650_s9 + $0x20] sm:$0xff] }
 0x66a   :  { %3253 = vmatpush.bf16.msrb.mxu3 %v4969_v57 }
 0x66d   :  { %v2750_v61 = vpop.f32.mrf.mxu2  ;;  %v2766_v62 = vpop.f32.mrf.mxu3 }
 0x66e   :  { %v4977_v62 = vld [vmem:[%s6650_s9 + $0x60] sm:$0xff] }
 0x670   :  { %v2785_v3 = vpop.f32.mrf.mxu0 }
 0x671   :  { %v2793_v44 = vadd.f32 %v2785_v3, %v2567_v33  ;;  %v4968_v3 = vld [vmem:[%s6650_s9 + $0x18] sm:$0xff] }
 0x672   :  { %3254 = vmatpush.bf16.msrb.mxu3 %v4968_v3 }
 0x675   :  { %v2751_v7 = vpop.f32.mrf.mxu2  ;;  %v2767_v10 = vpop.f32.mrf.mxu3 }
 0x678   :  { %v3004_v20 = vpop.f32.mrf.mxu0 }
 0x679   :  { %v3016_v32 = vadd.f32 %v3004_v20, %v2790_v24 }
 0x67b   :  { %v3030_v59 = vadd.f32 %v3024_v54, %v3016_v32 }
 0x67d   :  { %v2972_v25 = vpop.f32.mrf.mxu2  ;;  %v2988_v27 = vpop.f32.mrf.mxu3 }
 0x67e   :  { %v3014_v30 = vadd.f32 %v2972_v25, %v2788_v42  ;;  %v3015_v31 = vadd.f32 %v2988_v27, %v2789_v17  ;;  %v3067_v42 = vlaneseq  ;;  %v4979_v17 = vld [vmem:[%s6650_s9 + $0x70] sm:$0xff]  ;;  %v4966_v25 = vld [vmem:[%s6650_s9 + $0x8] sm:$0xff] }
 0x67f   :  { %3264 = vmatpush.bf16.msra.mxu0 %v4979_v17 }
 0x680   :  { %v6563_v5 = vadd.f32 %v3022_v21, %v3014_v30  ;;  %v6565_v40 = vadd.f32 %v3023_v22, %v3015_v31  ;;  %v3006_v23 = vpop.f32.mrf.mxu0  ;;  %v3068_v19 = vshrl.u32 %v3067_v42, 7  ;;  %v3070_v7 = vand.u32 127, %v3067_v42  ;;  %v4967_v21 = vld [vmem:[%s6650_s9 + $0x10] sm:$0xff] }
 0x681   :  { %v3017_v52 = vadd.f32 %v3006_v23, %v2791_v51  ;;  %3255 = vmatpush.bf16.msrb.mxu3 %v4967_v21  ;;  %v5028_v51 = vmov 0.0  }
 0x682   :  { %v3073_v61 = vadd.s32 1, %v3068_v19  ;;  %v3071_v10 = vmul.u32 4, %v3068_v19  ;;  %v3034_v22 = vmax.f32 %v6563_v5, 0.0  ;;  %v3035_v24 = vmax.f32 %v6565_v40, 0.0  ;;  %v4975_v40 = vld [vmem:[%s6650_s9 + $0x50] sm:$0xff] }
 0x683   :  { %v3031_v36 = vadd.f32 %v3024_v54, %v3017_v52  ;;  %3265 = vmatpush.bf16.msra.mxu0 %v4978_v47 }
 0x684   :  { %v3074_v20 = vmul.u32 4, %v3073_v61  ;;  %vm3072_vm8 = vcmp.ge.s32.totalorder %v3070_v7, %v3071_v10 }
 0x685   :  { %v3036_v28 = vmax.f32 %v3030_v59, %v3031_v36  ;;  %v2974_v2 = vpop.f32.mrf.mxu2  ;;  %v2990_v39 = vpop.f32.mrf.mxu3  ;;  %3256 = vmatpush.bf16.msrb.mxu3 %v4966_v25  ;;  %v4965_v36 = vld [vmem:[%s6650_s9] sm:$0xff] }
 0x686   :  { %vm3075_vm9 = vcmp.lt.s32.totalorder %v3070_v7, %v3074_v20  ;;  %v4973_v2 = vld [vmem:[%s6650_s9 + $0x40] sm:$0xff]  ;;  %v4984_v39 = vld [vmem:[%s6652_s11 + $0x18] sm:$0xff] }
 0x687   :  { %3266 = vmatpush.bf16.msra.mxu0 %v4977_v62  ;;  %vm3076_vm10 = vmand %vm3072_vm8, %vm3075_vm9 }
 0x688   :  { %v3009_v43 = vpop.f32.mrf.mxu0  ;;  %v3077_v32 = vsel %vm3076_vm10, 0.25, %v5028_v51 }
 0x689   :  { %v3018_v6 = vadd.f32 %v3009_v43, %v2792_v34  ;;  %v3078_v5 = vpack.c.bf16 %v3077_v32, %v3077_v32  ;;  %3257 = vmatpush.bf16.msrb.mxu3 %v4965_v36  ;;  %v4983_v43 = vld [vmem:[%s6652_s11 + $0x10] sm:$0xff] }
 0x68b   :  { %v3032_v46 = vadd.f32 %v3024_v54, %v3018_v6  ;;  %3267 = vmatpush.bf16.msra.mxu0 %v4976_v9 }
 0x68d   :  { %v2976_v41 = vpop.f32.mrf.mxu2  ;;  %v2992_v35 = vpop.f32.mrf.mxu3 }
 0x68f   :  { %3268 = vmatpush.bf16.msra.mxu0 %v4975_v40 }
 0x690   :  { %v3011_v63 = vpop.f32.mrf.mxu0 }
 0x691   :  { %v3019_v12 = vadd.f32 %v3011_v63, %v2793_v44  ;;  %v4982_v63 = vld [vmem:[%s6652_s11 + $0x8] sm:$0xff] }
 0x693   :  { %v3033_v48 = vadd.f32 %v3024_v54, %v3019_v12  ;;  %v4981_v12 = vld [vmem:[%s6652_s11] sm:$0xff] }
 0x695   :  { %v3037_v49 = vmax.f32 %v3032_v46, %v3033_v48  ;;  %v2977_v50 = vpop.f32.mrf.mxu2  ;;  %v2993_v53 = vpop.f32.mrf.mxu3  ;;  %v4991_v46 = vld [vmem:[%s6651_s10] ss:$0 sm:$0xff]  ;;  %s5029_s10 = smov [#allocation2]  }
 0x696   :  { %s3350_s11 = sshll.u32 %s5029_s10, 4  ;;  %s3351_s11 = int_to_ptr.vmem [resolvable:$true] %s3350_s11 }
 0x697   :  { %v3038_v37 = vmax.f32 %v3036_v28, %v3037_v49  ;;  %v4974_v28 = vld [vmem:[%s6650_s9 + $0x48] sm:$0xff] }
 0x698   :  { %3269 = vmatpush.bf16.msra.mxu0 %v4974_v28 }
 0x699   :  { %v3039_v55 = vsub.f32 0.0, %v3038_v37 }
 0x69b   :  { %v3040_v58 = vmul.f32 1.442695, %v3039_v55 }
 0x69c   :  { %3270 = vmatpush.bf16.msra.mxu0 %v4973_v2 }
 0x69d   :  { %4993 = vpow2.f32 %v3040_v58 }
 0x6a3   :  { %v4994_v60 = vpop.eup %4993 }
 0x6a4   :  { %v3042_v0 = vadd.f32 1.0, %v4994_v60 }
 0x6a6   :  { %4995 = vrcp.f32 %v3042_v0  ;;  %v3054_v8 = vand.u32 2147483648, %v3042_v0  ;;  %v3052_v38 = vand.u32 2147483647, %v3042_v0  ;;  %vm3048_vm5 = vweird.f32 %v3042_v0 }
 0x6a8   :  { %v3055_v13 = vor.u32 1.1754944e-38, %v3054_v8  ;;  %vm3053_vm7 = vcmp.eq.f32.partialorder %v3052_v38, 8.507059e+37 }
 0x6ac   :  { %v4996_v45 = vpop.eup %4995 }
 0x6ad   :  { %v3044_v1 = vmul.f32 %v4996_v45, %v3042_v0  ;;  %vm3049_vm4 = vweird.f32 %v4996_v45  ;;  %v4992_v0 = vld [vmem:[%s6653_s12] ss:$0 sm:$0xff] }
 0x6ae   :  { %vm3050_vm6 = vmor %vm3048_vm5, %vm3049_vm4 }
 0x6af   :  { %v3045_v4 = vsub.f32 1.0, %v3044_v1 }
 0x6b1   :  { %v3046_v11 = vmul.f32 %v4996_v45, %v3045_v4 }
 0x6b3   :  { %v3047_v56 = vadd.f32 %v4996_v45, %v3046_v11 }
 0x6b5   :  { %v3051_v14 = vsel %vm3050_vm6, %v4996_v45, %v3047_v56 }
 0x6b6   :  { %v3056_v15 = vsel %vm3053_vm7, %v3055_v13, %v3051_v14 }
 0x6b7   :  { %3060 = vperm.xlu0 %4988, %v3056_v15  }
 0x729   :  { %v3061_v27 = vpop.permute.xlu0 %3060 }
 0x72a   :  { %v3063_v30 = vmul.f32 %v3061_v27, %v3034_v22  ;;  %v3064_v31 = vmul.f32 %v3061_v27, %v3035_v24 }
 0x72c   :  { %v3065_v54 = vpack.c.bf16 %v3063_v30, %v3063_v30  ;;  %v3066_v23 = vpack.c.bf16 %v3064_v31, %v3064_v31 }
 0x72e   :  { %v3085_v52 = vsel %vm3083_vm11, %v3065_v54, 0  ;;  %v3088_v59 = vsel %vm3083_vm11, %v3066_v23, 0 }
 0x72f   :  { %3097 = vmatpush.bf16.msra.mxu1 %v3085_v52  ;;  %3110 = vmatpush.bf16.msra.mxu2 %v3088_v59 }
 0x732   :  { %4655 = vmatmul.msk.bf16.vlgmr.msra.gmra.mxu1 %vm3079_vm12, %v3078_v5  ;;  %4656 = vmatmul.msk.bf16.vlgmr.msra.gmra.mxu2 %vm3079_vm12, %v3078_v5 }
 0x733   :  { %3322 = vmatpush.bf16.msrb.mxu1 %v4984_v39 }
 0x737   :  { %3323 = vmatpush.bf16.msrb.mxu1 %v4983_v43 }
 0x73b   :  { %3324 = vmatpush.bf16.msrb.mxu1 %v4982_v63 }
 0x73f   :  { %3325 = vmatpush.bf16.msrb.mxu1 %v4981_v12 }
 0x7af   :  { %v3099_v33 = vpop.f32.mrf.mxu1 }
 0x7b0   :  { %v3116_v34 = vpack.c.bf16 %v3099_v33, %v3099_v33 }
 0x7b2   :  { %3258 = vmatmul.bf16.vlgmr.msrb.gmra.mxu3 %v3116_v34 }
 0x7b5   :  { %v3112_v41 = vpop.f32.mrf.mxu2 }
 0x7b6   :  { %v3117_v35 = vpack.c.bf16 %v3112_v41, %v3112_v41 }
 0x7b7   :  { %v3101_v44 = vpop.f32.mrf.mxu1 }
 0x7b8   :  { %3271 = vmatmul.bf16.vlgmr.msra.gmra.mxu0 %v3117_v35 }
 0x7bd   :  { %v3114_v6 = vpop.f32.mrf.mxu2 }
 0x835   :  { %v3259_v48 = vpop.f32.mrf.mxu3  ;;  %v3272_v49 = vpop.f32.mrf.mxu0 }
 0x836   :  { %v3260_v50 = vadd.f32 %v4991_v46, %v3259_v48 }
 0x838   :  { %v3273_v53 = vadd.f32 %v3272_v49, %v3260_v50 }
 0x83a   :  { %v3276_v37 = vmax.f32 %v3273_v53, 0.0 }
 0x83c   :  { %v3277_v55 = vpack.c.bf16 %v3276_v37, %v3276_v37 }
 0x83d   :  { %v3261_v58 = vpop.f32.mrf.mxu3  ;;  %v3274_v60 = vpop.f32.mrf.mxu0 }
 0x83e   :  { %4737 = vmatmul.msk.bf16.vlgmr.msrb.gmra.mxu1 %vm3314_vm13, %v3277_v55 }
 0x8bb   :  { %v3327_v45 = vpop.f32.mrf.mxu1 }
 0x8bc   :  { %v3328_v1 = vadd.f32 %v4992_v0, %v3327_v45 }
 0x8be   :  { %v3332_v4 = vsel %vm3331_vm14, %v3328_v1, -inf }
 0x8bf   :  { %3333 = vmax.xlane.f32.xlu0 %v3332_v4 }
 0x8c3   :  { %v3329_v8 = vpop.f32.mrf.mxu1 }
 0x932   :  { %v3334_v11 = vpop.xlane.xlu0 %3333 }
 0x933   :  { %v3335_v38 = vsub.f32 %v3328_v1, %v3334_v11 }
 0x935   :  { %v3336_v56 = vmul.f32 1.442695, %v3335_v38 }
 0x937   :  { %4997 = vpow2.f32 %v3336_v56 }
 0x93d   :  { %v4998_v13 = vpop.eup %4997 }
 0x93e   :  { %v3338_v14 = vsel %vm3331_vm14, %v4998_v13, 0.0 }
 0x93f   :  { %3339 = vadd.xlane.f32.xlu1 %v3338_v14 }
 0x9b2   :  { %v3340_v15 = vpop.xlane.xlu1 %3339 }
 0x9b3   :  { %4999 = vlog2.f32 %v3340_v15 }
 0x9b9   :  { %v5000_v29 = vpop.eup %4999 }
 0x9ba   :  { %v3342_v16 = vmul.f32 0.6931472, %v5000_v29 }
 0x9bc   :  { %v3343_v26 = vsub.f32 %v3335_v38, %v3342_v16 }
 0x9be   :  { %3344 = vst.msk [vmem:[#allocation2] sm:$0x3] %vm3331_vm14, %v3343_v26 }
 0x9bf   :  { %3355 = dma.vmem_to_hbm [thread:$0]  %s3351_s11, 32, %s3353_s27, [#allocation3]  }
 0x9c0   :  { %5025 = dma.done.wait [#allocation3], 32  }
 0x9c1   :  { %5026 = vsyncadd [#allocation3], 4294967264 }
 0x9c2   :  { %3360 = vsyncpa [#allocation3], 1 }

</bundles_post_ra>
